<compile_context>
chip_gen: v7x
topology: tpu7x:2x2x1
jax: 0.10.0
libtpu: 0.0.40
codegen_flags: <defaults>
</compile_context>

<pallas_src>
import functools

import jax
import jax.numpy as jnp
from jax.experimental import pallas as pl
from jax.experimental.pallas import tpu as pltpu

BN_EPS = 1e-5
TILE_M_TARGET = 2048  # rows (N*Ho*Wo) per grid step


def _round_up(x, m):
    return ((x + m - 1) // m) * m


def _tiles(m, unit):
    """Pick a row-tile size.  `unit` keeps the lane-dense pass-2 view aligned.

    Prefers >= 2 tiles so v7x's second TensorCore gets work; caps the tile at
    TILE_M_TARGET so double-buffered VMEM stays small on every generation.
    """
    m_unit = _round_up(m, unit)
    half = _round_up(-(-m_unit // 2), unit)
    tm = max(unit, min(TILE_M_TARGET, half))
    m_pad = _round_up(m_unit, tm)
    return tm, m_pad, m_pad // tm


# --------------------------------------------------------------------------
# Pallas kernels
# --------------------------------------------------------------------------
def _conv_stats_kernel(p_ref, w_ref, y_ref, s_ref):
    """Pass 1: im2col matmul tile + per-tile partial BN statistics.

    p_ref: (tm, K)   bf16 patches tile, K = 9*Cin
    w_ref: (K, C)    bf16 conv weight (resident across the grid)
    y_ref: (tm, C)   bf16 conv output tile (cast from the f32 accumulator)
    s_ref: (1, 2, C) f32 partial [sum, sum-of-squares] over this tile's rows
    """
    y = jnp.dot(p_ref[...], w_ref[...], preferred_element_type=jnp.float32)
    y_ref[...] = y.astype(y_ref.dtype)
    # Direct per-slice stores (no concat); padded rows are zero so they add 0.
    s_ref[0, 0:1, :] = jnp.sum(y, axis=0, keepdims=True)
    s_ref[0, 1:2, :] = jnp.sum(y * y, axis=0, keepdims=True)


def _affine_relu_kernel(y_ref, scale_ref, bias_ref, o_ref):
    """Pass 2 (no residual): relu(y*scale + bias), lane-dense 128-wide tiles."""
    y = y_ref[...].astype(jnp.float32) * scale_ref[...] + bias_ref[...]
    o_ref[...] = jnp.maximum(y, 0.0).astype(o_ref.dtype)


def _affine_res_relu_kernel(y_ref, scale_ref, bias_ref, r_ref, o_ref):
    """Pass 2 (with residual): relu(y*scale + bias + res)."""
    y = y_ref[...].astype(jnp.float32) * scale_ref[...] + bias_ref[...]
    y = y + r_ref[...].astype(jnp.float32)
    o_ref[...] = jnp.maximum(y, 0.0).astype(o_ref.dtype)


def _pool_fc_kernel(x_ref, w_ref, b_ref, o_ref):
    """Global average pool over the spatial axis fused with the final Linear.

    x_ref: (N, H*W, C) bf16, w_ref: (C, num_classes) f32, b_ref: (1, classes)
    """
    pooled = jnp.mean(x_ref[...].astype(jnp.float32), axis=1)  # (N, C)
    o_ref[...] = jnp.dot(pooled, w_ref[...],
                         preferred_element_type=jnp.float32) + b_ref[...]


# --------------------------------------------------------------------------
# Wrappers
# --------------------------------------------------------------------------
def conv3x3_bn(x, w, gamma, beta, *, stride, residual=None):
    """x: (N,H,W,Cin) NHWC, w: (3,3,Cin,Cout). Returns (N,Ho,Wo,Cout) bf16."""
    N, H, W, Cin = x.shape
    Cout = w.shape[-1]
    Ho, Wo = H // stride, W // stride
    M = N * Ho * Wo
    K = 9 * Cin

    # Lane-packing factor so pass 2 sees dense 128-wide lanes.
    r = 128 // Cout if (Cout <= 128 and 128 % Cout == 0) else 1
    unit = 8 * r  # row granularity keeping both passes' tile shapes legal

    # Cast to bf16 BEFORE the 9 strided slices (halves the im2col HBM glue).
    xb = x.astype(jnp.bfloat16)
    xp = jnp.pad(xb, ((0, 0), (1, 1), (1, 1), (0, 0)))
    cols = []
    for dy in range(3):
        for dx in range(3):
            patch = jax.lax.slice(
                xp,
                (0, dy, dx, 0),
                (N, dy + (Ho - 1) * stride + 1, dx + (Wo - 1) * stride + 1, Cin),
                (1, stride, stride, 1))
            cols.append(patch.reshape(M, Cin))
    patches = jnp.concatenate(cols, axis=1)  # (M, 9*Cin) bf16
    wmat = w.reshape(K, Cout).astype(jnp.bfloat16)

    tm, m_pad, n_tiles = _tiles(M, unit)
    if m_pad != M:
        # Zero padding rows contribute nothing to the channel sums / sumsq.
        patches = jnp.pad(patches, ((0, m_pad - M), (0, 0)))

    conv_out, part_stats = pl.pallas_call(
        _conv_stats_kernel,
        out_shape=(jax.ShapeDtypeStruct((m_pad, Cout), jnp.bfloat16),
                   jax.ShapeDtypeStruct((n_tiles, 2, Cout), jnp.float32)),
        grid=(n_tiles,),
        in_specs=[pl.BlockSpec((tm, K), lambda i: (i, 0)),
                  pl.BlockSpec((K, Cout), lambda i: (0, 0))],
        out_specs=(pl.BlockSpec((tm, Cout), lambda i: (i, 0)),
                   pl.BlockSpec((1, 2, Cout), lambda i: (i, 0, 0))),
        compiler_params=pltpu.CompilerParams(
            dimension_semantics=("parallel",)),
    )(patches, wmat)

    # Global (batch) BN statistics folded into a per-channel affine, all f32.
    stats = jnp.sum(part_stats, axis=0)          # (2, Cout)
    mean = stats[0] / M
    var = stats[1] / M - mean * mean             # biased variance (PyTorch BN fwd)
    inv = jax.lax.rsqrt(var + BN_EPS)
    lane_w = r * Cout                            # 128 when Cout divides 128
    scale = jnp.tile(gamma * inv, r).reshape(1, lane_w)
    bias = jnp.tile(beta - mean * gamma * inv, r).reshape(1, lane_w)

    # Lane-dense pass-2 view: (m_pad, Cout) -> (m_pad // r, r*Cout) is a free
    # row-major reinterpretation; lane j holds channel j % Cout.
    y2 = conv_out.reshape(m_pad // r, lane_w)
    tm2 = tm // r

    common_specs = [pl.BlockSpec((tm2, lane_w), lambda i: (i, 0)),
                    pl.BlockSpec((1, lane_w), lambda i: (0, 0)),
                    pl.BlockSpec((1, lane_w), lambda i: (0, 0))]
    out_spec = pl.BlockSpec((tm2, lane_w), lambda i: (i, 0))
    cparams = pltpu.CompilerParams(dimension_semantics=("parallel",))
    out_shape2 = jax.ShapeDtypeStruct((m_pad // r, lane_w), jnp.bfloat16)

    if residual is not None:
        res = residual.reshape(M, Cout).astype(jnp.bfloat16)
        if m_pad != M:
            res = jnp.pad(res, ((0, m_pad - M), (0, 0)))
        res2 = res.reshape(m_pad // r, lane_w)
        out2 = pl.pallas_call(
            _affine_res_relu_kernel,
            out_shape=out_shape2,
            grid=(n_tiles,),
            in_specs=common_specs + [pl.BlockSpec((tm2, lane_w),
                                                  lambda i: (i, 0))],
            out_specs=out_spec,
            compiler_params=cparams,
        )(y2, scale, bias, res2)
    else:
        out2 = pl.pallas_call(
            _affine_relu_kernel,
            out_shape=out_shape2,
            grid=(n_tiles,),
            in_specs=common_specs,
            out_specs=out_spec,
            compiler_params=cparams,
        )(y2, scale, bias)

    out = out2.reshape(m_pad, Cout)
    if m_pad != M:
        out = out[:M]
    return out.reshape(N, Ho, Wo, Cout)


def pool_fc(x, w_fc, b_fc):
    """x: (N,Hf,Wf,C) NHWC bf16 -> logits (N, num_classes) f32."""
    N, Hf, Wf, C = x.shape
    num_classes = w_fc.shape[-1]
    x_flat = x.reshape(N, Hf * Wf, C)
    return pl.pallas_call(
        _pool_fc_kernel,
        out_shape=jax.ShapeDtypeStruct((N, num_classes), jnp.float32),
        grid=(1,),
        in_specs=[pl.BlockSpec((N, Hf * Wf, C), lambda i: (0, 0, 0)),
                  pl.BlockSpec((C, num_classes), lambda i: (0, 0)),
                  pl.BlockSpec((1, num_classes), lambda i: (0, 0))],
        out_specs=pl.BlockSpec((N, num_classes), lambda i: (0, 0)),
        compiler_params=pltpu.CompilerParams(
            dimension_semantics=("arbitrary",)),
    )(x_flat, w_fc, b_fc.reshape(1, num_classes))


def basic_block_forward(x, blk, stride):
    """CIFAR BasicBlock: conv-bn-relu, conv-bn, + option-'A' shortcut, relu."""
    planes = blk['conv2'].shape[-1]
    out = conv3x3_bn(x, blk['conv1'], blk['bn1_g'], blk['bn1_b'],
                     stride=stride, residual=None)
    if stride != 1 or x.shape[-1] != planes:
        # option 'A': spatial subsample + zero-pad channels (planes//4 each side)
        pad = planes // 4
        sc = jnp.pad(x[:, ::stride, ::stride, :],
                     ((0, 0), (0, 0), (0, 0), (pad, pad)))
    else:
        sc = x
    out = conv3x3_bn(out, blk['conv2'], blk['bn2_g'], blk['bn2_b'],
                     stride=1, residual=sc)
    return out


@functools.partial(jax.jit, static_argnames=("strides",))
def resnet_forward(x_nchw, params, strides):
    x = jnp.transpose(x_nchw, (0, 2, 3, 1))  # NCHW -> NHWC
    x = conv3x3_bn(x, params['conv1'], params['bn1_g'], params['bn1_b'],
                   stride=1, residual=None)
    for blk, s in zip(params['blocks'], strides):
        x = basic_block_forward(x, blk, s)
    return pool_fc(x, params['fc_w'], params['fc_b'])


# --------------------------------------------------------------------------
# Deterministic parameter init (matches __init__ shapes; kaiming-style)
# --------------------------------------------------------------------------
def init_params(key, layers=(2, 2, 2), num_classes=10):
    keys = iter(jax.random.split(key, 64))

    def kaiming_conv(k, cin, cout):
        fan_in = cin * 9
        return jax.random.normal(k, (3, 3, cin, cout), jnp.float32) * (2.0 / fan_in) ** 0.5

    params = {
        'conv1': kaiming_conv(next(keys), 3, 16),
        'bn1_g': jnp.ones((16,), jnp.float32),
        'bn1_b': jnp.zeros((16,), jnp.float32),
    }

    in_planes = 16
    blocks = []
    strides = []
    for planes, n_blocks, stride in zip((16, 32, 64), layers, (1, 2, 2)):
        for s in [stride] + [1] * (n_blocks - 1):
            blocks.append({
                'conv1': kaiming_conv(next(keys), in_planes, planes),
                'bn1_g': jnp.ones((planes,), jnp.float32),
                'bn1_b': jnp.zeros((planes,), jnp.float32),
                'conv2': kaiming_conv(next(keys), planes, planes),
                'bn2_g': jnp.ones((planes,), jnp.float32),
                'bn2_b': jnp.zeros((planes,), jnp.float32),
            })
            strides.append(s)
            in_planes = planes
    params['blocks'] = blocks

    fan_in = 64
    params['fc_w'] = (jax.random.normal(next(keys), (64, num_classes), jnp.float32)
                      * (2.0 / fan_in) ** 0.5)
    bound = 1.0 / fan_in ** 0.5
    params['fc_b'] = jax.random.uniform(next(keys), (num_classes,), jnp.float32,
                                        minval=-bound, maxval=bound)
    return params, tuple(strides)


if __name__ == "__main__":
    key = jax.random.PRNGKey(0)
    pkey, xkey = jax.random.split(key)
    params, strides = init_params(pkey, layers=(2, 2, 2), num_classes=10)
    # NCHW input, PyTorch convention (conv1 requires 3 input channels).
    x = jax.random.normal(xkey, (2, 3, 16, 16), jnp.float32)
    logits = resnet_forward(x, params, strides=strides)
    jax.block_until_ready(logits)
    assert logits.shape == (2, 10) and logits.dtype == jnp.float32
    print("KERNEL_OK")
</pallas_src>

<mosaic_0001>
module attributes {stable_mosaic.version = 11 : i64} {
  func.func @_affine_relu_kernel(%arg0: i32, %arg1: memref<32x128xbf16, #tpu.memory_space<vmem>>, %arg2: memref<1x128xf32, #tpu.memory_space<vmem>>, %arg3: memref<1x128xf32, #tpu.memory_space<vmem>>, %arg4: memref<32x128xbf16, #tpu.memory_space<vmem>>) attributes {dimension_semantics = [#tpu.dimension_semantics<parallel>], iteration_bounds = array<i64: 2>, scalar_prefetch = 0 : i64, scratch_operands = 0 : i64, tpu.core_type = #tpu.core_type<tc>, window_params = [{transform_indices = @transform_0, window_bounds = array<i64: 32, 128>}, {pipeline_mode = #tpu.pipeline_mode<synchronous>, transform_indices = @transform_1, window_bounds = array<i64: 1, 128>}, {pipeline_mode = #tpu.pipeline_mode<synchronous>, transform_indices = @transform_2, window_bounds = array<i64: 1, 128>}, {transform_indices = @transform_3, window_bounds = array<i64: 32, 128>}]} {
    %c0 = arith.constant 0 : index
    %c0_0 = arith.constant 0 : index
    %0 = vector.load %arg1[%c0, %c0_0] : memref<32x128xbf16, #tpu.memory_space<vmem>>, vector<32x128xbf16>
    %1 = arith.extf %0 : vector<32x128xbf16> to vector<32x128xf32>
    %c0_1 = arith.constant 0 : index
    %c0_2 = arith.constant 0 : index
    %2 = vector.load %arg2[%c0_1, %c0_2] : memref<1x128xf32, #tpu.memory_space<vmem>>, vector<1x128xf32>
    %3 = vector.broadcast %2 : vector<1x128xf32> to vector<32x128xf32>
    %4 = arith.mulf %1, %3 : vector<32x128xf32>
    %c0_3 = arith.constant 0 : index
    %c0_4 = arith.constant 0 : index
    %5 = vector.load %arg3[%c0_3, %c0_4] : memref<1x128xf32, #tpu.memory_space<vmem>>, vector<1x128xf32>
    %6 = vector.broadcast %5 : vector<1x128xf32> to vector<32x128xf32>
    %7 = arith.addf %4, %6 : vector<32x128xf32>
    %cst = arith.constant 0.000000e+00 : f32
    %8 = vector.broadcast %cst : f32 to vector<32x128xf32>
    %9 = arith.maximumf %7, %8 : vector<32x128xf32>
    %10 = arith.truncf %9 : vector<32x128xf32> to vector<32x128xbf16>
    %c0_5 = arith.constant 0 : index
    %c0_6 = arith.constant 0 : index
    %11 = vector.load %arg4[%c0_5, %c0_6] : memref<32x128xbf16, #tpu.memory_space<vmem>>, vector<32x128xbf16>
    tpu.vector_store %arg4[%c0_5, %c0_6], %10 {strides = array<i32>} : memref<32x128xbf16, #tpu.memory_space<vmem>>, vector<32x128xbf16>,
    return
  }
  func.func @transform_0(%arg0: i32) -> (i32, i32) {
    %c0_i32 = arith.constant 0 : i32
    %c0_i32_0 = arith.constant 0 : i32
    return %arg0, %c0_i32 : i32, i32
  }
  func.func @transform_1(%arg0: i32) -> (i32, i32) {
    %c0_i32 = arith.constant 0 : i32
    %c0_i32_0 = arith.constant 0 : i32
    %c0_i32_1 = arith.constant 0 : i32
    return %c0_i32, %c0_i32_0 : i32, i32
  }
  func.func @transform_2(%arg0: i32) -> (i32, i32) {
    %c0_i32 = arith.constant 0 : i32
    %c0_i32_0 = arith.constant 0 : i32
    %c0_i32_1 = arith.constant 0 : i32
    return %c0_i32, %c0_i32_0 : i32, i32
  }
  func.func @transform_3(%arg0: i32) -> (i32, i32) {
    %c0_i32 = arith.constant 0 : i32
    %c0_i32_0 = arith.constant 0 : i32
    return %arg0, %c0_i32 : i32, i32
  }
}

module attributes {stable_mosaic.version = 11 : i64} {
  func.func @_conv_stats_kernel(%arg0: i32, %arg1: memref<256x27xbf16, #tpu.memory_space<vmem>>, %arg2: memref<27x16xbf16, #tpu.memory_space<vmem>>, %arg3: memref<256x16xbf16, #tpu.memory_space<vmem>>, %arg4: memref<1x2x16xf32, #tpu.memory_space<vmem>>) attributes {dimension_semantics = [#tpu.dimension_semantics<parallel>], iteration_bounds = array<i64: 2>, scalar_prefetch = 0 : i64, scratch_operands = 0 : i64, tpu.core_type = #tpu.core_type<tc>, window_params = [{transform_indices = @transform_0, window_bounds = array<i64: 256, 27>}, {pipeline_mode = #tpu.pipeline_mode<synchronous>, transform_indices = @transform_1, window_bounds = array<i64: 27, 16>}, {transform_indices = @transform_2, window_bounds = array<i64: 256, 16>}, {transform_indices = @transform_3, window_bounds = array<i64: 1, 2, 16>}]} {
    %c0 = arith.constant 0 : index
    %c0_0 = arith.constant 0 : index
    %0 = vector.load %arg1[%c0, %c0_0] : memref<256x27xbf16, #tpu.memory_space<vmem>>, vector<256x27xbf16>
    %c0_1 = arith.constant 0 : index
    %c0_2 = arith.constant 0 : index
    %1 = vector.load %arg2[%c0_1, %c0_2] : memref<27x16xbf16, #tpu.memory_space<vmem>>, vector<27x16xbf16>
    %cst = arith.constant dense<0.000000e+00> : vector<256x16xf32>
    %2 = tpu.matmul %0, %1, %cst {dimension_numbers = #tpu.dot_dimension_numbers<[1], [0], [0], [1], [0, 0, 1, 1], [], []>} : vector<256x27xbf16>, vector<27x16xbf16>, vector<256x16xf32> -> vector<256x16xf32>
    %3 = arith.truncf %2 : vector<256x16xf32> to vector<256x16xbf16>
    %c0_3 = arith.constant 0 : index
    %c0_4 = arith.constant 0 : index
    %4 = vector.load %arg3[%c0_3, %c0_4] : memref<256x16xbf16, #tpu.memory_space<vmem>>, vector<256x16xbf16>
    tpu.vector_store %arg3[%c0_3, %c0_4], %3 {strides = array<i32>} : memref<256x16xbf16, #tpu.memory_space<vmem>>, vector<256x16xbf16>,
    %cst_5 = arith.constant dense<0.000000e+00> : vector<16xf32>
    %5 = vector.multi_reduction <add>, %2, %cst_5 [0] : vector<256x16xf32> to vector<16xf32>
    %6 = vector.shape_cast %5 : vector<16xf32> to vector<1x16xf32>
    %c0_6 = arith.constant 0 : index
    %c0_7 = arith.constant 0 : index
    %c0_8 = arith.constant 0 : index
    %7 = vector.load %arg4[%c0_6, %c0_7, %c0_8] : memref<1x2x16xf32, #tpu.memory_space<vmem>>, vector<1x1x16xf32>
    %8 = vector.shape_cast %7 : vector<1x1x16xf32> to vector<1x16xf32>
    %9 = vector.shape_cast %6 : vector<1x16xf32> to vector<1x1x16xf32>
    tpu.vector_store %arg4[%c0_6, %c0_7, %c0_8], %9 {strides = array<i32>} : memref<1x2x16xf32, #tpu.memory_space<vmem>>, vector<1x1x16xf32>,
    %10 = arith.mulf %2, %2 : vector<256x16xf32>
    %cst_9 = arith.constant dense<0.000000e+00> : vector<16xf32>
    %11 = vector.multi_reduction <add>, %10, %cst_9 [0] : vector<256x16xf32> to vector<16xf32>
    %12 = vector.shape_cast %11 : vector<16xf32> to vector<1x16xf32>
    %c0_10 = arith.constant 0 : index
    %c1 = arith.constant 1 : index
    %c0_11 = arith.constant 0 : index
    %13 = vector.load %arg4[%c0_10, %c1, %c0_11] : memref<1x2x16xf32, #tpu.memory_space<vmem>>, vector<1x1x16xf32>
    %14 = vector.shape_cast %13 : vector<1x1x16xf32> to vector<1x16xf32>
    %15 = vector.shape_cast %12 : vector<1x16xf32> to vector<1x1x16xf32>
    tpu.vector_store %arg4[%c0_10, %c1, %c0_11], %15 {strides = array<i32>} : memref<1x2x16xf32, #tpu.memory_space<vmem>>, vector<1x1x16xf32>,
    return
  }
  func.func @transform_0(%arg0: i32) -> (i32, i32) {
    %c0_i32 = arith.constant 0 : i32
    %c0_i32_0 = arith.constant 0 : i32
    return %arg0, %c0_i32 : i32, i32
  }
  func.func @transform_1(%arg0: i32) -> (i32, i32) {
    %c0_i32 = arith.constant 0 : i32
    %c0_i32_0 = arith.constant 0 : i32
    %c0_i32_1 = arith.constant 0 : i32
    return %c0_i32, %c0_i32_0 : i32, i32
  }
  func.func @transform_2(%arg0: i32) -> (i32, i32) {
    %c0_i32 = arith.constant 0 : i32
    %c0_i32_0 = arith.constant 0 : i32
    return %arg0, %c0_i32 : i32, i32
  }
  func.func @transform_3(%arg0: i32) -> (i32, i32, i32) {
    %c0_i32 = arith.constant 0 : i32
    %c0_i32_0 = arith.constant 0 : i32
    %c0_i32_1 = arith.constant 0 : i32
    return %arg0, %c0_i32, %c0_i32_0 : i32, i32, i32
  }
}

module attributes {stable_mosaic.version = 11 : i64} {
  func.func @_conv_stats_kernel(%arg0: i32, %arg1: memref<256x144xbf16, #tpu.memory_space<vmem>>, %arg2: memref<144x16xbf16, #tpu.memory_space<vmem>>, %arg3: memref<256x16xbf16, #tpu.memory_space<vmem>>, %arg4: memref<1x2x16xf32, #tpu.memory_space<vmem>>) attributes {dimension_semantics = [#tpu.dimension_semantics<parallel>], iteration_bounds = array<i64: 2>, scalar_prefetch = 0 : i64, scratch_operands = 0 : i64, tpu.core_type = #tpu.core_type<tc>, window_params = [{transform_indices = @transform_0, window_bounds = array<i64: 256, 144>}, {pipeline_mode = #tpu.pipeline_mode<synchronous>, transform_indices = @transform_1, window_bounds = array<i64: 144, 16>}, {transform_indices = @transform_2, window_bounds = array<i64: 256, 16>}, {transform_indices = @transform_3, window_bounds = array<i64: 1, 2, 16>}]} {
    %c0 = arith.constant 0 : index
    %c0_0 = arith.constant 0 : index
    %0 = vector.load %arg1[%c0, %c0_0] : memref<256x144xbf16, #tpu.memory_space<vmem>>, vector<256x144xbf16>
    %c0_1 = arith.constant 0 : index
    %c0_2 = arith.constant 0 : index
    %1 = vector.load %arg2[%c0_1, %c0_2] : memref<144x16xbf16, #tpu.memory_space<vmem>>, vector<144x16xbf16>
    %cst = arith.constant dense<0.000000e+00> : vector<256x16xf32>
    %2 = tpu.matmul %0, %1, %cst {dimension_numbers = #tpu.dot_dimension_numbers<[1], [0], [0], [1], [0, 0, 1, 1], [], []>} : vector<256x144xbf16>, vector<144x16xbf16>, vector<256x16xf32> -> vector<256x16xf32>
    %3 = arith.truncf %2 : vector<256x16xf32> to vector<256x16xbf16>
    %c0_3 = arith.constant 0 : index
    %c0_4 = arith.constant 0 : index
    %4 = vector.load %arg3[%c0_3, %c0_4] : memref<256x16xbf16, #tpu.memory_space<vmem>>, vector<256x16xbf16>
    tpu.vector_store %arg3[%c0_3, %c0_4], %3 {strides = array<i32>} : memref<256x16xbf16, #tpu.memory_space<vmem>>, vector<256x16xbf16>,
    %cst_5 = arith.constant dense<0.000000e+00> : vector<16xf32>
    %5 = vector.multi_reduction <add>, %2, %cst_5 [0] : vector<256x16xf32> to vector<16xf32>
    %6 = vector.shape_cast %5 : vector<16xf32> to vector<1x16xf32>
    %c0_6 = arith.constant 0 : index
    %c0_7 = arith.constant 0 : index
    %c0_8 = arith.constant 0 : index
    %7 = vector.load %arg4[%c0_6, %c0_7, %c0_8] : memref<1x2x16xf32, #tpu.memory_space<vmem>>, vector<1x1x16xf32>
    %8 = vector.shape_cast %7 : vector<1x1x16xf32> to vector<1x16xf32>
    %9 = vector.shape_cast %6 : vector<1x16xf32> to vector<1x1x16xf32>
    tpu.vector_store %arg4[%c0_6, %c0_7, %c0_8], %9 {strides = array<i32>} : memref<1x2x16xf32, #tpu.memory_space<vmem>>, vector<1x1x16xf32>,
    %10 = arith.mulf %2, %2 : vector<256x16xf32>
    %cst_9 = arith.constant dense<0.000000e+00> : vector<16xf32>
    %11 = vector.multi_reduction <add>, %10, %cst_9 [0] : vector<256x16xf32> to vector<16xf32>
    %12 = vector.shape_cast %11 : vector<16xf32> to vector<1x16xf32>
    %c0_10 = arith.constant 0 : index
    %c1 = arith.constant 1 : index
    %c0_11 = arith.constant 0 : index
    %13 = vector.load %arg4[%c0_10, %c1, %c0_11] : memref<1x2x16xf32, #tpu.memory_space<vmem>>, vector<1x1x16xf32>
    %14 = vector.shape_cast %13 : vector<1x1x16xf32> to vector<1x16xf32>
    %15 = vector.shape_cast %12 : vector<1x16xf32> to vector<1x1x16xf32>
    tpu.vector_store %arg4[%c0_10, %c1, %c0_11], %15 {strides = array<i32>} : memref<1x2x16xf32, #tpu.memory_space<vmem>>, vector<1x1x16xf32>,
    return
  }
  func.func @transform_0(%arg0: i32) -> (i32, i32) {
    %c0_i32 = arith.constant 0 : i32
    %c0_i32_0 = arith.constant 0 : i32
    return %arg0, %c0_i32 : i32, i32
  }
  func.func @transform_1(%arg0: i32) -> (i32, i32) {
    %c0_i32 = arith.constant 0 : i32
    %c0_i32_0 = arith.constant 0 : i32
    %c0_i32_1 = arith.constant 0 : i32
    return %c0_i32, %c0_i32_0 : i32, i32
  }
  func.func @transform_2(%arg0: i32) -> (i32, i32) {
    %c0_i32 = arith.constant 0 : i32
    %c0_i32_0 = arith.constant 0 : i32
    return %arg0, %c0_i32 : i32, i32
  }
  func.func @transform_3(%arg0: i32) -> (i32, i32, i32) {
    %c0_i32 = arith.constant 0 : i32
    %c0_i32_0 = arith.constant 0 : i32
    %c0_i32_1 = arith.constant 0 : i32
    return %arg0, %c0_i32, %c0_i32_0 : i32, i32, i32
  }
}

module attributes {stable_mosaic.version = 11 : i64} {
  func.func @_affine_res_relu_kernel(%arg0: i32, %arg1: memref<32x128xbf16, #tpu.memory_space<vmem>>, %arg2: memref<1x128xf32, #tpu.memory_space<vmem>>, %arg3: memref<1x128xf32, #tpu.memory_space<vmem>>, %arg4: memref<32x128xbf16, #tpu.memory_space<vmem>>, %arg5: memref<32x128xbf16, #tpu.memory_space<vmem>>) attributes {dimension_semantics = [#tpu.dimension_semantics<parallel>], iteration_bounds = array<i64: 2>, scalar_prefetch = 0 : i64, scratch_operands = 0 : i64, tpu.core_type = #tpu.core_type<tc>, window_params = [{transform_indices = @transform_0, window_bounds = array<i64: 32, 128>}, {pipeline_mode = #tpu.pipeline_mode<synchronous>, transform_indices = @transform_1, window_bounds = array<i64: 1, 128>}, {pipeline_mode = #tpu.pipeline_mode<synchronous>, transform_indices = @transform_2, window_bounds = array<i64: 1, 128>}, {transform_indices = @transform_3, window_bounds = array<i64: 32, 128>}, {transform_indices = @transform_4, window_bounds = array<i64: 32, 128>}]} {
    %c0 = arith.constant 0 : index
    %c0_0 = arith.constant 0 : index
    %0 = vector.load %arg1[%c0, %c0_0] : memref<32x128xbf16, #tpu.memory_space<vmem>>, vector<32x128xbf16>
    %1 = arith.extf %0 : vector<32x128xbf16> to vector<32x128xf32>
    %c0_1 = arith.constant 0 : index
    %c0_2 = arith.constant 0 : index
    %2 = vector.load %arg2[%c0_1, %c0_2] : memref<1x128xf32, #tpu.memory_space<vmem>>, vector<1x128xf32>
    %3 = vector.broadcast %2 : vector<1x128xf32> to vector<32x128xf32>
    %4 = arith.mulf %1, %3 : vector<32x128xf32>
    %c0_3 = arith.constant 0 : index
    %c0_4 = arith.constant 0 : index
    %5 = vector.load %arg3[%c0_3, %c0_4] : memref<1x128xf32, #tpu.memory_space<vmem>>, vector<1x128xf32>
    %6 = vector.broadcast %5 : vector<1x128xf32> to vector<32x128xf32>
    %7 = arith.addf %4, %6 : vector<32x128xf32>
    %c0_5 = arith.constant 0 : index
    %c0_6 = arith.constant 0 : index
    %8 = vector.load %arg4[%c0_5, %c0_6] : memref<32x128xbf16, #tpu.memory_space<vmem>>, vector<32x128xbf16>
    %9 = arith.extf %8 : vector<32x128xbf16> to vector<32x128xf32>
    %10 = arith.addf %7, %9 : vector<32x128xf32>
    %cst = arith.constant 0.000000e+00 : f32
    %11 = vector.broadcast %cst : f32 to vector<32x128xf32>
    %12 = arith.maximumf %10, %11 : vector<32x128xf32>
    %13 = arith.truncf %12 : vector<32x128xf32> to vector<32x128xbf16>
    %c0_7 = arith.constant 0 : index
    %c0_8 = arith.constant 0 : index
    %14 = vector.load %arg5[%c0_7, %c0_8] : memref<32x128xbf16, #tpu.memory_space<vmem>>, vector<32x128xbf16>
    tpu.vector_store %arg5[%c0_7, %c0_8], %13 {strides = array<i32>} : memref<32x128xbf16, #tpu.memory_space<vmem>>, vector<32x128xbf16>,
    return
  }
  func.func @transform_0(%arg0: i32) -> (i32, i32) {
    %c0_i32 = arith.constant 0 : i32
    %c0_i32_0 = arith.constant 0 : i32
    return %arg0, %c0_i32 : i32, i32
  }
  func.func @transform_1(%arg0: i32) -> (i32, i32) {
    %c0_i32 = arith.constant 0 : i32
    %c0_i32_0 = arith.constant 0 : i32
    %c0_i32_1 = arith.constant 0 : i32
    return %c0_i32, %c0_i32_0 : i32, i32
  }
  func.func @transform_2(%arg0: i32) -> (i32, i32) {
    %c0_i32 = arith.constant 0 : i32
    %c0_i32_0 = arith.constant 0 : i32
    %c0_i32_1 = arith.constant 0 : i32
    return %c0_i32, %c0_i32_0 : i32, i32
  }
  func.func @transform_3(%arg0: i32) -> (i32, i32) {
    %c0_i32 = arith.constant 0 : i32
    %c0_i32_0 = arith.constant 0 : i32
    return %arg0, %c0_i32 : i32, i32
  }
  func.func @transform_4(%arg0: i32) -> (i32, i32) {
    %c0_i32 = arith.constant 0 : i32
    %c0_i32_0 = arith.constant 0 : i32
    return %arg0, %c0_i32 : i32, i32
  }
}

module attributes {stable_mosaic.version = 11 : i64} {
  func.func @_conv_stats_kernel(%arg0: i32, %arg1: memref<64x144xbf16, #tpu.memory_space<vmem>>, %arg2: memref<144x32xbf16, #tpu.memory_space<vmem>>, %arg3: memref<64x32xbf16, #tpu.memory_space<vmem>>, %arg4: memref<1x2x32xf32, #tpu.memory_space<vmem>>) attributes {dimension_semantics = [#tpu.dimension_semantics<parallel>], iteration_bounds = array<i64: 2>, scalar_prefetch = 0 : i64, scratch_operands = 0 : i64, tpu.core_type = #tpu.core_type<tc>, window_params = [{transform_indices = @transform_0, window_bounds = array<i64: 64, 144>}, {pipeline_mode = #tpu.pipeline_mode<synchronous>, transform_indices = @transform_1, window_bounds = array<i64: 144, 32>}, {transform_indices = @transform_2, window_bounds = array<i64: 64, 32>}, {transform_indices = @transform_3, window_bounds = array<i64: 1, 2, 32>}]} {
    %c0 = arith.constant 0 : index
    %c0_0 = arith.constant 0 : index
    %0 = vector.load %arg1[%c0, %c0_0] : memref<64x144xbf16, #tpu.memory_space<vmem>>, vector<64x144xbf16>
    %c0_1 = arith.constant 0 : index
    %c0_2 = arith.constant 0 : index
    %1 = vector.load %arg2[%c0_1, %c0_2] : memref<144x32xbf16, #tpu.memory_space<vmem>>, vector<144x32xbf16>
    %cst = arith.constant dense<0.000000e+00> : vector<64x32xf32>
    %2 = tpu.matmul %0, %1, %cst {dimension_numbers = #tpu.dot_dimension_numbers<[1], [0], [0], [1], [0, 0, 1, 1], [], []>} : vector<64x144xbf16>, vector<144x32xbf16>, vector<64x32xf32> -> vector<64x32xf32>
    %3 = arith.truncf %2 : vector<64x32xf32> to vector<64x32xbf16>
    %c0_3 = arith.constant 0 : index
    %c0_4 = arith.constant 0 : index
    %4 = vector.load %arg3[%c0_3, %c0_4] : memref<64x32xbf16, #tpu.memory_space<vmem>>, vector<64x32xbf16>
    tpu.vector_store %arg3[%c0_3, %c0_4], %3 {strides = array<i32>} : memref<64x32xbf16, #tpu.memory_space<vmem>>, vector<64x32xbf16>,
    %cst_5 = arith.constant dense<0.000000e+00> : vector<32xf32>
    %5 = vector.multi_reduction <add>, %2, %cst_5 [0] : vector<64x32xf32> to vector<32xf32>
    %6 = vector.shape_cast %5 : vector<32xf32> to vector<1x32xf32>
    %c0_6 = arith.constant 0 : index
    %c0_7 = arith.constant 0 : index
    %c0_8 = arith.constant 0 : index
    %7 = vector.load %arg4[%c0_6, %c0_7, %c0_8] : memref<1x2x32xf32, #tpu.memory_space<vmem>>, vector<1x1x32xf32>
    %8 = vector.shape_cast %7 : vector<1x1x32xf32> to vector<1x32xf32>
    %9 = vector.shape_cast %6 : vector<1x32xf32> to vector<1x1x32xf32>
    tpu.vector_store %arg4[%c0_6, %c0_7, %c0_8], %9 {strides = array<i32>} : memref<1x2x32xf32, #tpu.memory_space<vmem>>, vector<1x1x32xf32>,
    %10 = arith.mulf %2, %2 : vector<64x32xf32>
    %cst_9 = arith.constant dense<0.000000e+00> : vector<32xf32>
    %11 = vector.multi_reduction <add>, %10, %cst_9 [0] : vector<64x32xf32> to vector<32xf32>
    %12 = vector.shape_cast %11 : vector<32xf32> to vector<1x32xf32>
    %c0_10 = arith.constant 0 : index
    %c1 = arith.constant 1 : index
    %c0_11 = arith.constant 0 : index
    %13 = vector.load %arg4[%c0_10, %c1, %c0_11] : memref<1x2x32xf32, #tpu.memory_space<vmem>>, vector<1x1x32xf32>
    %14 = vector.shape_cast %13 : vector<1x1x32xf32> to vector<1x32xf32>
    %15 = vector.shape_cast %12 : vector<1x32xf32> to vector<1x1x32xf32>
    tpu.vector_store %arg4[%c0_10, %c1, %c0_11], %15 {strides = array<i32>} : memref<1x2x32xf32, #tpu.memory_space<vmem>>, vector<1x1x32xf32>,
    return
  }
  func.func @transform_0(%arg0: i32) -> (i32, i32) {
    %c0_i32 = arith.constant 0 : i32
    %c0_i32_0 = arith.constant 0 : i32
    return %arg0, %c0_i32 : i32, i32
  }
  func.func @transform_1(%arg0: i32) -> (i32, i32) {
    %c0_i32 = arith.constant 0 : i32
    %c0_i32_0 = arith.constant 0 : i32
    %c0_i32_1 = arith.constant 0 : i32
    return %c0_i32, %c0_i32_0 : i32, i32
  }
  func.func @transform_2(%arg0: i32) -> (i32, i32) {
    %c0_i32 = arith.constant 0 : i32
    %c0_i32_0 = arith.constant 0 : i32
    return %arg0, %c0_i32 : i32, i32
  }
  func.func @transform_3(%arg0: i32) -> (i32, i32, i32) {
    %c0_i32 = arith.constant 0 : i32
    %c0_i32_0 = arith.constant 0 : i32
    %c0_i32_1 = arith.constant 0 : i32
    return %arg0, %c0_i32, %c0_i32_0 : i32, i32, i32
  }
}

module attributes {stable_mosaic.version = 11 : i64} {
  func.func @_affine_relu_kernel(%arg0: i32, %arg1: memref<16x128xbf16, #tpu.memory_space<vmem>>, %arg2: memref<1x128xf32, #tpu.memory_space<vmem>>, %arg3: memref<1x128xf32, #tpu.memory_space<vmem>>, %arg4: memref<16x128xbf16, #tpu.memory_space<vmem>>) attributes {dimension_semantics = [#tpu.dimension_semantics<parallel>], iteration_bounds = array<i64: 2>, scalar_prefetch = 0 : i64, scratch_operands = 0 : i64, tpu.core_type = #tpu.core_type<tc>, window_params = [{transform_indices = @transform_0, window_bounds = array<i64: 16, 128>}, {pipeline_mode = #tpu.pipeline_mode<synchronous>, transform_indices = @transform_1, window_bounds = array<i64: 1, 128>}, {pipeline_mode = #tpu.pipeline_mode<synchronous>, transform_indices = @transform_2, window_bounds = array<i64: 1, 128>}, {transform_indices = @transform_3, window_bounds = array<i64: 16, 128>}]} {
    %c0 = arith.constant 0 : index
    %c0_0 = arith.constant 0 : index
    %0 = vector.load %arg1[%c0, %c0_0] : memref<16x128xbf16, #tpu.memory_space<vmem>>, vector<16x128xbf16>
    %1 = arith.extf %0 : vector<16x128xbf16> to vector<16x128xf32>
    %c0_1 = arith.constant 0 : index
    %c0_2 = arith.constant 0 : index
    %2 = vector.load %arg2[%c0_1, %c0_2] : memref<1x128xf32, #tpu.memory_space<vmem>>, vector<1x128xf32>
    %3 = vector.broadcast %2 : vector<1x128xf32> to vector<16x128xf32>
    %4 = arith.mulf %1, %3 : vector<16x128xf32>
    %c0_3 = arith.constant 0 : index
    %c0_4 = arith.constant 0 : index
    %5 = vector.load %arg3[%c0_3, %c0_4] : memref<1x128xf32, #tpu.memory_space<vmem>>, vector<1x128xf32>
    %6 = vector.broadcast %5 : vector<1x128xf32> to vector<16x128xf32>
    %7 = arith.addf %4, %6 : vector<16x128xf32>
    %cst = arith.constant 0.000000e+00 : f32
    %8 = vector.broadcast %cst : f32 to vector<16x128xf32>
    %9 = arith.maximumf %7, %8 : vector<16x128xf32>
    %10 = arith.truncf %9 : vector<16x128xf32> to vector<16x128xbf16>
    %c0_5 = arith.constant 0 : index
    %c0_6 = arith.constant 0 : index
    %11 = vector.load %arg4[%c0_5, %c0_6] : memref<16x128xbf16, #tpu.memory_space<vmem>>, vector<16x128xbf16>
    tpu.vector_store %arg4[%c0_5, %c0_6], %10 {strides = array<i32>} : memref<16x128xbf16, #tpu.memory_space<vmem>>, vector<16x128xbf16>,
    return
  }
  func.func @transform_0(%arg0: i32) -> (i32, i32) {
    %c0_i32 = arith.constant 0 : i32
    %c0_i32_0 = arith.constant 0 : i32
    return %arg0, %c0_i32 : i32, i32
  }
  func.func @transform_1(%arg0: i32) -> (i32, i32) {
    %c0_i32 = arith.constant 0 : i32
    %c0_i32_0 = arith.constant 0 : i32
    %c0_i32_1 = arith.constant 0 : i32
    return %c0_i32, %c0_i32_0 : i32, i32
  }
  func.func @transform_2(%arg0: i32) -> (i32, i32) {
    %c0_i32 = arith.constant 0 : i32
    %c0_i32_0 = arith.constant 0 : i32
    %c0_i32_1 = arith.constant 0 : i32
    return %c0_i32, %c0_i32_0 : i32, i32
  }
  func.func @transform_3(%arg0: i32) -> (i32, i32) {
    %c0_i32 = arith.constant 0 : i32
    %c0_i32_0 = arith.constant 0 : i32
    return %arg0, %c0_i32 : i32, i32
  }
}

module attributes {stable_mosaic.version = 11 : i64} {
  func.func @_conv_stats_kernel(%arg0: i32, %arg1: memref<64x288xbf16, #tpu.memory_space<vmem>>, %arg2: memref<288x32xbf16, #tpu.memory_space<vmem>>, %arg3: memref<64x32xbf16, #tpu.memory_space<vmem>>, %arg4: memref<1x2x32xf32, #tpu.memory_space<vmem>>) attributes {dimension_semantics = [#tpu.dimension_semantics<parallel>], iteration_bounds = array<i64: 2>, scalar_prefetch = 0 : i64, scratch_operands = 0 : i64, tpu.core_type = #tpu.core_type<tc>, window_params = [{transform_indices = @transform_0, window_bounds = array<i64: 64, 288>}, {pipeline_mode = #tpu.pipeline_mode<synchronous>, transform_indices = @transform_1, window_bounds = array<i64: 288, 32>}, {transform_indices = @transform_2, window_bounds = array<i64: 64, 32>}, {transform_indices = @transform_3, window_bounds = array<i64: 1, 2, 32>}]} {
    %c0 = arith.constant 0 : index
    %c0_0 = arith.constant 0 : index
    %0 = vector.load %arg1[%c0, %c0_0] : memref<64x288xbf16, #tpu.memory_space<vmem>>, vector<64x288xbf16>
    %c0_1 = arith.constant 0 : index
    %c0_2 = arith.constant 0 : index
    %1 = vector.load %arg2[%c0_1, %c0_2] : memref<288x32xbf16, #tpu.memory_space<vmem>>, vector<288x32xbf16>
    %cst = arith.constant dense<0.000000e+00> : vector<64x32xf32>
    %2 = tpu.matmul %0, %1, %cst {dimension_numbers = #tpu.dot_dimension_numbers<[1], [0], [0], [1], [0, 0, 1, 1], [], []>} : vector<64x288xbf16>, vector<288x32xbf16>, vector<64x32xf32> -> vector<64x32xf32>
    %3 = arith.truncf %2 : vector<64x32xf32> to vector<64x32xbf16>
    %c0_3 = arith.constant 0 : index
    %c0_4 = arith.constant 0 : index
    %4 = vector.load %arg3[%c0_3, %c0_4] : memref<64x32xbf16, #tpu.memory_space<vmem>>, vector<64x32xbf16>
    tpu.vector_store %arg3[%c0_3, %c0_4], %3 {strides = array<i32>} : memref<64x32xbf16, #tpu.memory_space<vmem>>, vector<64x32xbf16>,
    %cst_5 = arith.constant dense<0.000000e+00> : vector<32xf32>
    %5 = vector.multi_reduction <add>, %2, %cst_5 [0] : vector<64x32xf32> to vector<32xf32>
    %6 = vector.shape_cast %5 : vector<32xf32> to vector<1x32xf32>
    %c0_6 = arith.constant 0 : index
    %c0_7 = arith.constant 0 : index
    %c0_8 = arith.constant 0 : index
    %7 = vector.load %arg4[%c0_6, %c0_7, %c0_8] : memref<1x2x32xf32, #tpu.memory_space<vmem>>, vector<1x1x32xf32>
    %8 = vector.shape_cast %7 : vector<1x1x32xf32> to vector<1x32xf32>
    %9 = vector.shape_cast %6 : vector<1x32xf32> to vector<1x1x32xf32>
    tpu.vector_store %arg4[%c0_6, %c0_7, %c0_8], %9 {strides = array<i32>} : memref<1x2x32xf32, #tpu.memory_space<vmem>>, vector<1x1x32xf32>,
    %10 = arith.mulf %2, %2 : vector<64x32xf32>
    %cst_9 = arith.constant dense<0.000000e+00> : vector<32xf32>
    %11 = vector.multi_reduction <add>, %10, %cst_9 [0] : vector<64x32xf32> to vector<32xf32>
    %12 = vector.shape_cast %11 : vector<32xf32> to vector<1x32xf32>
    %c0_10 = arith.constant 0 : index
    %c1 = arith.constant 1 : index
    %c0_11 = arith.constant 0 : index
    %13 = vector.load %arg4[%c0_10, %c1, %c0_11] : memref<1x2x32xf32, #tpu.memory_space<vmem>>, vector<1x1x32xf32>
    %14 = vector.shape_cast %13 : vector<1x1x32xf32> to vector<1x32xf32>
    %15 = vector.shape_cast %12 : vector<1x32xf32> to vector<1x1x32xf32>
    tpu.vector_store %arg4[%c0_10, %c1, %c0_11], %15 {strides = array<i32>} : memref<1x2x32xf32, #tpu.memory_space<vmem>>, vector<1x1x32xf32>,
    return
  }
  func.func @transform_0(%arg0: i32) -> (i32, i32) {
    %c0_i32 = arith.constant 0 : i32
    %c0_i32_0 = arith.constant 0 : i32
    return %arg0, %c0_i32 : i32, i32
  }
  func.func @transform_1(%arg0: i32) -> (i32, i32) {
    %c0_i32 = arith.constant 0 : i32
    %c0_i32_0 = arith.constant 0 : i32
    %c0_i32_1 = arith.constant 0 : i32
    return %c0_i32, %c0_i32_0 : i32, i32
  }
  func.func @transform_2(%arg0: i32) -> (i32, i32) {
    %c0_i32 = arith.constant 0 : i32
    %c0_i32_0 = arith.constant 0 : i32
    return %arg0, %c0_i32 : i32, i32
  }
  func.func @transform_3(%arg0: i32) -> (i32, i32, i32) {
    %c0_i32 = arith.constant 0 : i32
    %c0_i32_0 = arith.constant 0 : i32
    %c0_i32_1 = arith.constant 0 : i32
    return %arg0, %c0_i32, %c0_i32_0 : i32, i32, i32
  }
}

module attributes {stable_mosaic.version = 11 : i64} {
  func.func @_affine_res_relu_kernel(%arg0: i32, %arg1: memref<16x128xbf16, #tpu.memory_space<vmem>>, %arg2: memref<1x128xf32, #tpu.memory_space<vmem>>, %arg3: memref<1x128xf32, #tpu.memory_space<vmem>>, %arg4: memref<16x128xbf16, #tpu.memory_space<vmem>>, %arg5: memref<16x128xbf16, #tpu.memory_space<vmem>>) attributes {dimension_semantics = [#tpu.dimension_semantics<parallel>], iteration_bounds = array<i64: 2>, scalar_prefetch = 0 : i64, scratch_operands = 0 : i64, tpu.core_type = #tpu.core_type<tc>, window_params = [{transform_indices = @transform_0, window_bounds = array<i64: 16, 128>}, {pipeline_mode = #tpu.pipeline_mode<synchronous>, transform_indices = @transform_1, window_bounds = array<i64: 1, 128>}, {pipeline_mode = #tpu.pipeline_mode<synchronous>, transform_indices = @transform_2, window_bounds = array<i64: 1, 128>}, {transform_indices = @transform_3, window_bounds = array<i64: 16, 128>}, {transform_indices = @transform_4, window_bounds = array<i64: 16, 128>}]} {
    %c0 = arith.constant 0 : index
    %c0_0 = arith.constant 0 : index
    %0 = vector.load %arg1[%c0, %c0_0] : memref<16x128xbf16, #tpu.memory_space<vmem>>, vector<16x128xbf16>
    %1 = arith.extf %0 : vector<16x128xbf16> to vector<16x128xf32>
    %c0_1 = arith.constant 0 : index
    %c0_2 = arith.constant 0 : index
    %2 = vector.load %arg2[%c0_1, %c0_2] : memref<1x128xf32, #tpu.memory_space<vmem>>, vector<1x128xf32>
    %3 = vector.broadcast %2 : vector<1x128xf32> to vector<16x128xf32>
    %4 = arith.mulf %1, %3 : vector<16x128xf32>
    %c0_3 = arith.constant 0 : index
    %c0_4 = arith.constant 0 : index
    %5 = vector.load %arg3[%c0_3, %c0_4] : memref<1x128xf32, #tpu.memory_space<vmem>>, vector<1x128xf32>
    %6 = vector.broadcast %5 : vector<1x128xf32> to vector<16x128xf32>
    %7 = arith.addf %4, %6 : vector<16x128xf32>
    %c0_5 = arith.constant 0 : index
    %c0_6 = arith.constant 0 : index
    %8 = vector.load %arg4[%c0_5, %c0_6] : memref<16x128xbf16, #tpu.memory_space<vmem>>, vector<16x128xbf16>
    %9 = arith.extf %8 : vector<16x128xbf16> to vector<16x128xf32>
    %10 = arith.addf %7, %9 : vector<16x128xf32>
    %cst = arith.constant 0.000000e+00 : f32
    %11 = vector.broadcast %cst : f32 to vector<16x128xf32>
    %12 = arith.maximumf %10, %11 : vector<16x128xf32>
    %13 = arith.truncf %12 : vector<16x128xf32> to vector<16x128xbf16>
    %c0_7 = arith.constant 0 : index
    %c0_8 = arith.constant 0 : index
    %14 = vector.load %arg5[%c0_7, %c0_8] : memref<16x128xbf16, #tpu.memory_space<vmem>>, vector<16x128xbf16>
    tpu.vector_store %arg5[%c0_7, %c0_8], %13 {strides = array<i32>} : memref<16x128xbf16, #tpu.memory_space<vmem>>, vector<16x128xbf16>,
    return
  }
  func.func @transform_0(%arg0: i32) -> (i32, i32) {
    %c0_i32 = arith.constant 0 : i32
    %c0_i32_0 = arith.constant 0 : i32
    return %arg0, %c0_i32 : i32, i32
  }
  func.func @transform_1(%arg0: i32) -> (i32, i32) {
    %c0_i32 = arith.constant 0 : i32
    %c0_i32_0 = arith.constant 0 : i32
    %c0_i32_1 = arith.constant 0 : i32
    return %c0_i32, %c0_i32_0 : i32, i32
  }
  func.func @transform_2(%arg0: i32) -> (i32, i32) {
    %c0_i32 = arith.constant 0 : i32
    %c0_i32_0 = arith.constant 0 : i32
    %c0_i32_1 = arith.constant 0 : i32
    return %c0_i32, %c0_i32_0 : i32, i32
  }
  func.func @transform_3(%arg0: i32) -> (i32, i32) {
    %c0_i32 = arith.constant 0 : i32
    %c0_i32_0 = arith.constant 0 : i32
    return %arg0, %c0_i32 : i32, i32
  }
  func.func @transform_4(%arg0: i32) -> (i32, i32) {
    %c0_i32 = arith.constant 0 : i32
    %c0_i32_0 = arith.constant 0 : i32
    return %arg0, %c0_i32 : i32, i32
  }
}

module attributes {stable_mosaic.version = 11 : i64} {
  func.func @_conv_stats_kernel(%arg0: i32, %arg1: memref<16x288xbf16, #tpu.memory_space<vmem>>, %arg2: memref<288x64xbf16, #tpu.memory_space<vmem>>, %arg3: memref<16x64xbf16, #tpu.memory_space<vmem>>, %arg4: memref<1x2x64xf32, #tpu.memory_space<vmem>>) attributes {dimension_semantics = [#tpu.dimension_semantics<parallel>], iteration_bounds = array<i64: 2>, scalar_prefetch = 0 : i64, scratch_operands = 0 : i64, tpu.core_type = #tpu.core_type<tc>, window_params = [{transform_indices = @transform_0, window_bounds = array<i64: 16, 288>}, {pipeline_mode = #tpu.pipeline_mode<synchronous>, transform_indices = @transform_1, window_bounds = array<i64: 288, 64>}, {transform_indices = @transform_2, window_bounds = array<i64: 16, 64>}, {transform_indices = @transform_3, window_bounds = array<i64: 1, 2, 64>}]} {
    %c0 = arith.constant 0 : index
    %c0_0 = arith.constant 0 : index
    %0 = vector.load %arg1[%c0, %c0_0] : memref<16x288xbf16, #tpu.memory_space<vmem>>, vector<16x288xbf16>
    %c0_1 = arith.constant 0 : index
    %c0_2 = arith.constant 0 : index
    %1 = vector.load %arg2[%c0_1, %c0_2] : memref<288x64xbf16, #tpu.memory_space<vmem>>, vector<288x64xbf16>
    %cst = arith.constant dense<0.000000e+00> : vector<16x64xf32>
    %2 = tpu.matmul %0, %1, %cst {dimension_numbers = #tpu.dot_dimension_numbers<[1], [0], [0], [1], [0, 0, 1, 1], [], []>} : vector<16x288xbf16>, vector<288x64xbf16>, vector<16x64xf32> -> vector<16x64xf32>
    %3 = arith.truncf %2 : vector<16x64xf32> to vector<16x64xbf16>
    %c0_3 = arith.constant 0 : index
    %c0_4 = arith.constant 0 : index
    %4 = vector.load %arg3[%c0_3, %c0_4] : memref<16x64xbf16, #tpu.memory_space<vmem>>, vector<16x64xbf16>
    tpu.vector_store %arg3[%c0_3, %c0_4], %3 {strides = array<i32>} : memref<16x64xbf16, #tpu.memory_space<vmem>>, vector<16x64xbf16>,
    %cst_5 = arith.constant dense<0.000000e+00> : vector<64xf32>
    %5 = vector.multi_reduction <add>, %2, %cst_5 [0] : vector<16x64xf32> to vector<64xf32>
    %6 = vector.shape_cast %5 : vector<64xf32> to vector<1x64xf32>
    %c0_6 = arith.constant 0 : index
    %c0_7 = arith.constant 0 : index
    %c0_8 = arith.constant 0 : index
    %7 = vector.load %arg4[%c0_6, %c0_7, %c0_8] : memref<1x2x64xf32, #tpu.memory_space<vmem>>, vector<1x1x64xf32>
    %8 = vector.shape_cast %7 : vector<1x1x64xf32> to vector<1x64xf32>
    %9 = vector.shape_cast %6 : vector<1x64xf32> to vector<1x1x64xf32>
    tpu.vector_store %arg4[%c0_6, %c0_7, %c0_8], %9 {strides = array<i32>} : memref<1x2x64xf32, #tpu.memory_space<vmem>>, vector<1x1x64xf32>,
    %10 = arith.mulf %2, %2 : vector<16x64xf32>
    %cst_9 = arith.constant dense<0.000000e+00> : vector<64xf32>
    %11 = vector.multi_reduction <add>, %10, %cst_9 [0] : vector<16x64xf32> to vector<64xf32>
    %12 = vector.shape_cast %11 : vector<64xf32> to vector<1x64xf32>
    %c0_10 = arith.constant 0 : index
    %c1 = arith.constant 1 : index
    %c0_11 = arith.constant 0 : index
    %13 = vector.load %arg4[%c0_10, %c1, %c0_11] : memref<1x2x64xf32, #tpu.memory_space<vmem>>, vector<1x1x64xf32>
    %14 = vector.shape_cast %13 : vector<1x1x64xf32> to vector<1x64xf32>
    %15 = vector.shape_cast %12 : vector<1x64xf32> to vector<1x1x64xf32>
    tpu.vector_store %arg4[%c0_10, %c1, %c0_11], %15 {strides = array<i32>} : memref<1x2x64xf32, #tpu.memory_space<vmem>>, vector<1x1x64xf32>,
    return
  }
  func.func @transform_0(%arg0: i32) -> (i32, i32) {
    %c0_i32 = arith.constant 0 : i32
    %c0_i32_0 = arith.constant 0 : i32
    return %arg0, %c0_i32 : i32, i32
  }
  func.func @transform_1(%arg0: i32) -> (i32, i32) {
    %c0_i32 = arith.constant 0 : i32
    %c0_i32_0 = arith.constant 0 : i32
    %c0_i32_1 = arith.constant 0 : i32
    return %c0_i32, %c0_i32_0 : i32, i32
  }
  func.func @transform_2(%arg0: i32) -> (i32, i32) {
    %c0_i32 = arith.constant 0 : i32
    %c0_i32_0 = arith.constant 0 : i32
    return %arg0, %c0_i32 : i32, i32
  }
  func.func @transform_3(%arg0: i32) -> (i32, i32, i32) {
    %c0_i32 = arith.constant 0 : i32
    %c0_i32_0 = arith.constant 0 : i32
    %c0_i32_1 = arith.constant 0 : i32
    return %arg0, %c0_i32, %c0_i32_0 : i32, i32, i32
  }
}

module attributes {stable_mosaic.version = 11 : i64} {
  func.func @_affine_relu_kernel(%arg0: i32, %arg1: memref<8x128xbf16, #tpu.memory_space<vmem>>, %arg2: memref<1x128xf32, #tpu.memory_space<vmem>>, %arg3: memref<1x128xf32, #tpu.memory_space<vmem>>, %arg4: memref<8x128xbf16, #tpu.memory_space<vmem>>) attributes {dimension_semantics = [#tpu.dimension_semantics<parallel>], iteration_bounds = array<i64: 2>, scalar_prefetch = 0 : i64, scratch_operands = 0 : i64, tpu.core_type = #tpu.core_type<tc>, window_params = [{transform_indices = @transform_0, window_bounds = array<i64: 8, 128>}, {pipeline_mode = #tpu.pipeline_mode<synchronous>, transform_indices = @transform_1, window_bounds = array<i64: 1, 128>}, {pipeline_mode = #tpu.pipeline_mode<synchronous>, transform_indices = @transform_2, window_bounds = array<i64: 1, 128>}, {transform_indices = @transform_3, window_bounds = array<i64: 8, 128>}]} {
    %c0 = arith.constant 0 : index
    %c0_0 = arith.constant 0 : index
    %0 = vector.load %arg1[%c0, %c0_0] : memref<8x128xbf16, #tpu.memory_space<vmem>>, vector<8x128xbf16>
    %1 = arith.extf %0 : vector<8x128xbf16> to vector<8x128xf32>
    %c0_1 = arith.constant 0 : index
    %c0_2 = arith.constant 0 : index
    %2 = vector.load %arg2[%c0_1, %c0_2] : memref<1x128xf32, #tpu.memory_space<vmem>>, vector<1x128xf32>
    %3 = vector.broadcast %2 : vector<1x128xf32> to vector<8x128xf32>
    %4 = arith.mulf %1, %3 : vector<8x128xf32>
    %c0_3 = arith.constant 0 : index
    %c0_4 = arith.constant 0 : index
    %5 = vector.load %arg3[%c0_3, %c0_4] : memref<1x128xf32, #tpu.memory_space<vmem>>, vector<1x128xf32>
    %6 = vector.broadcast %5 : vector<1x128xf32> to vector<8x128xf32>
    %7 = arith.addf %4, %6 : vector<8x128xf32>
    %cst = arith.constant 0.000000e+00 : f32
    %8 = vector.broadcast %cst : f32 to vector<8x128xf32>
    %9 = arith.maximumf %7, %8 : vector<8x128xf32>
    %10 = arith.truncf %9 : vector<8x128xf32> to vector<8x128xbf16>
    %c0_5 = arith.constant 0 : index
    %c0_6 = arith.constant 0 : index
    %11 = vector.load %arg4[%c0_5, %c0_6] : memref<8x128xbf16, #tpu.memory_space<vmem>>, vector<8x128xbf16>
    tpu.vector_store %arg4[%c0_5, %c0_6], %10 {strides = array<i32>} : memref<8x128xbf16, #tpu.memory_space<vmem>>, vector<8x128xbf16>,
    return
  }
  func.func @transform_0(%arg0: i32) -> (i32, i32) {
    %c0_i32 = arith.constant 0 : i32
    %c0_i32_0 = arith.constant 0 : i32
    return %arg0, %c0_i32 : i32, i32
  }
  func.func @transform_1(%arg0: i32) -> (i32, i32) {
    %c0_i32 = arith.constant 0 : i32
    %c0_i32_0 = arith.constant 0 : i32
    %c0_i32_1 = arith.constant 0 : i32
    return %c0_i32, %c0_i32_0 : i32, i32
  }
  func.func @transform_2(%arg0: i32) -> (i32, i32) {
    %c0_i32 = arith.constant 0 : i32
    %c0_i32_0 = arith.constant 0 : i32
    %c0_i32_1 = arith.constant 0 : i32
    return %c0_i32, %c0_i32_0 : i32, i32
  }
  func.func @transform_3(%arg0: i32) -> (i32, i32) {
    %c0_i32 = arith.constant 0 : i32
    %c0_i32_0 = arith.constant 0 : i32
    return %arg0, %c0_i32 : i32, i32
  }
}

module attributes {stable_mosaic.version = 11 : i64} {
  func.func @_conv_stats_kernel(%arg0: i32, %arg1: memref<16x576xbf16, #tpu.memory_space<vmem>>, %arg2: memref<576x64xbf16, #tpu.memory_space<vmem>>, %arg3: memref<16x64xbf16, #tpu.memory_space<vmem>>, %arg4: memref<1x2x64xf32, #tpu.memory_space<vmem>>) attributes {dimension_semantics = [#tpu.dimension_semantics<parallel>], iteration_bounds = array<i64: 2>, scalar_prefetch = 0 : i64, scratch_operands = 0 : i64, tpu.core_type = #tpu.core_type<tc>, window_params = [{transform_indices = @transform_0, window_bounds = array<i64: 16, 576>}, {pipeline_mode = #tpu.pipeline_mode<synchronous>, transform_indices = @transform_1, window_bounds = array<i64: 576, 64>}, {transform_indices = @transform_2, window_bounds = array<i64: 16, 64>}, {transform_indices = @transform_3, window_bounds = array<i64: 1, 2, 64>}]} {
    %c0 = arith.constant 0 : index
    %c0_0 = arith.constant 0 : index
    %0 = vector.load %arg1[%c0, %c0_0] : memref<16x576xbf16, #tpu.memory_space<vmem>>, vector<16x576xbf16>
    %c0_1 = arith.constant 0 : index
    %c0_2 = arith.constant 0 : index
    %1 = vector.load %arg2[%c0_1, %c0_2] : memref<576x64xbf16, #tpu.memory_space<vmem>>, vector<576x64xbf16>
    %cst = arith.constant dense<0.000000e+00> : vector<16x64xf32>
    %2 = tpu.matmul %0, %1, %cst {dimension_numbers = #tpu.dot_dimension_numbers<[1], [0], [0], [1], [0, 0, 1, 1], [], []>} : vector<16x576xbf16>, vector<576x64xbf16>, vector<16x64xf32> -> vector<16x64xf32>
    %3 = arith.truncf %2 : vector<16x64xf32> to vector<16x64xbf16>
    %c0_3 = arith.constant 0 : index
    %c0_4 = arith.constant 0 : index
    %4 = vector.load %arg3[%c0_3, %c0_4] : memref<16x64xbf16, #tpu.memory_space<vmem>>, vector<16x64xbf16>
    tpu.vector_store %arg3[%c0_3, %c0_4], %3 {strides = array<i32>} : memref<16x64xbf16, #tpu.memory_space<vmem>>, vector<16x64xbf16>,
    %cst_5 = arith.constant dense<0.000000e+00> : vector<64xf32>
    %5 = vector.multi_reduction <add>, %2, %cst_5 [0] : vector<16x64xf32> to vector<64xf32>
    %6 = vector.shape_cast %5 : vector<64xf32> to vector<1x64xf32>
    %c0_6 = arith.constant 0 : index
    %c0_7 = arith.constant 0 : index
    %c0_8 = arith.constant 0 : index
    %7 = vector.load %arg4[%c0_6, %c0_7, %c0_8] : memref<1x2x64xf32, #tpu.memory_space<vmem>>, vector<1x1x64xf32>
    %8 = vector.shape_cast %7 : vector<1x1x64xf32> to vector<1x64xf32>
    %9 = vector.shape_cast %6 : vector<1x64xf32> to vector<1x1x64xf32>
    tpu.vector_store %arg4[%c0_6, %c0_7, %c0_8], %9 {strides = array<i32>} : memref<1x2x64xf32, #tpu.memory_space<vmem>>, vector<1x1x64xf32>,
    %10 = arith.mulf %2, %2 : vector<16x64xf32>
    %cst_9 = arith.constant dense<0.000000e+00> : vector<64xf32>
    %11 = vector.multi_reduction <add>, %10, %cst_9 [0] : vector<16x64xf32> to vector<64xf32>
    %12 = vector.shape_cast %11 : vector<64xf32> to vector<1x64xf32>
    %c0_10 = arith.constant 0 : index
    %c1 = arith.constant 1 : index
    %c0_11 = arith.constant 0 : index
    %13 = vector.load %arg4[%c0_10, %c1, %c0_11] : memref<1x2x64xf32, #tpu.memory_space<vmem>>, vector<1x1x64xf32>
    %14 = vector.shape_cast %13 : vector<1x1x64xf32> to vector<1x64xf32>
    %15 = vector.shape_cast %12 : vector<1x64xf32> to vector<1x1x64xf32>
    tpu.vector_store %arg4[%c0_10, %c1, %c0_11], %15 {strides = array<i32>} : memref<1x2x64xf32, #tpu.memory_space<vmem>>, vector<1x1x64xf32>,
    return
  }
  func.func @transform_0(%arg0: i32) -> (i32, i32) {
    %c0_i32 = arith.constant 0 : i32
    %c0_i32_0 = arith.constant 0 : i32
    return %arg0, %c0_i32 : i32, i32
  }
  func.func @transform_1(%arg0: i32) -> (i32, i32) {
    %c0_i32 = arith.constant 0 : i32
    %c0_i32_0 = arith.constant 0 : i32
    %c0_i32_1 = arith.constant 0 : i32
    return %c0_i32, %c0_i32_0 : i32, i32
  }
  func.func @transform_2(%arg0: i32) -> (i32, i32) {
    %c0_i32 = arith.constant 0 : i32
    %c0_i32_0 = arith.constant 0 : i32
    return %arg0, %c0_i32 : i32, i32
  }
  func.func @transform_3(%arg0: i32) -> (i32, i32, i32) {
    %c0_i32 = arith.constant 0 : i32
    %c0_i32_0 = arith.constant 0 : i32
    %c0_i32_1 = arith.constant 0 : i32
    return %arg0, %c0_i32, %c0_i32_0 : i32, i32, i32
  }
}

module attributes {stable_mosaic.version = 11 : i64} {
  func.func @_affine_res_relu_kernel(%arg0: i32, %arg1: memref<8x128xbf16, #tpu.memory_space<vmem>>, %arg2: memref<1x128xf32, #tpu.memory_space<vmem>>, %arg3: memref<1x128xf32, #tpu.memory_space<vmem>>, %arg4: memref<8x128xbf16, #tpu.memory_space<vmem>>, %arg5: memref<8x128xbf16, #tpu.memory_space<vmem>>) attributes {dimension_semantics = [#tpu.dimension_semantics<parallel>], iteration_bounds = array<i64: 2>, scalar_prefetch = 0 : i64, scratch_operands = 0 : i64, tpu.core_type = #tpu.core_type<tc>, window_params = [{transform_indices = @transform_0, window_bounds = array<i64: 8, 128>}, {pipeline_mode = #tpu.pipeline_mode<synchronous>, transform_indices = @transform_1, window_bounds = array<i64: 1, 128>}, {pipeline_mode = #tpu.pipeline_mode<synchronous>, transform_indices = @transform_2, window_bounds = array<i64: 1, 128>}, {transform_indices = @transform_3, window_bounds = array<i64: 8, 128>}, {transform_indices = @transform_4, window_bounds = array<i64: 8, 128>}]} {
    %c0 = arith.constant 0 : index
    %c0_0 = arith.constant 0 : index
    %0 = vector.load %arg1[%c0, %c0_0] : memref<8x128xbf16, #tpu.memory_space<vmem>>, vector<8x128xbf16>
    %1 = arith.extf %0 : vector<8x128xbf16> to vector<8x128xf32>
    %c0_1 = arith.constant 0 : index
    %c0_2 = arith.constant 0 : index
    %2 = vector.load %arg2[%c0_1, %c0_2] : memref<1x128xf32, #tpu.memory_space<vmem>>, vector<1x128xf32>
    %3 = vector.broadcast %2 : vector<1x128xf32> to vector<8x128xf32>
    %4 = arith.mulf %1, %3 : vector<8x128xf32>
    %c0_3 = arith.constant 0 : index
    %c0_4 = arith.constant 0 : index
    %5 = vector.load %arg3[%c0_3, %c0_4] : memref<1x128xf32, #tpu.memory_space<vmem>>, vector<1x128xf32>
    %6 = vector.broadcast %5 : vector<1x128xf32> to vector<8x128xf32>
    %7 = arith.addf %4, %6 : vector<8x128xf32>
    %c0_5 = arith.constant 0 : index
    %c0_6 = arith.constant 0 : index
    %8 = vector.load %arg4[%c0_5, %c0_6] : memref<8x128xbf16, #tpu.memory_space<vmem>>, vector<8x128xbf16>
    %9 = arith.extf %8 : vector<8x128xbf16> to vector<8x128xf32>
    %10 = arith.addf %7, %9 : vector<8x128xf32>
    %cst = arith.constant 0.000000e+00 : f32
    %11 = vector.broadcast %cst : f32 to vector<8x128xf32>
    %12 = arith.maximumf %10, %11 : vector<8x128xf32>
    %13 = arith.truncf %12 : vector<8x128xf32> to vector<8x128xbf16>
    %c0_7 = arith.constant 0 : index
    %c0_8 = arith.constant 0 : index
    %14 = vector.load %arg5[%c0_7, %c0_8] : memref<8x128xbf16, #tpu.memory_space<vmem>>, vector<8x128xbf16>
    tpu.vector_store %arg5[%c0_7, %c0_8], %13 {strides = array<i32>} : memref<8x128xbf16, #tpu.memory_space<vmem>>, vector<8x128xbf16>,
    return
  }
  func.func @transform_0(%arg0: i32) -> (i32, i32) {
    %c0_i32 = arith.constant 0 : i32
    %c0_i32_0 = arith.constant 0 : i32
    return %arg0, %c0_i32 : i32, i32
  }
  func.func @transform_1(%arg0: i32) -> (i32, i32) {
    %c0_i32 = arith.constant 0 : i32
    %c0_i32_0 = arith.constant 0 : i32
    %c0_i32_1 = arith.constant 0 : i32
    return %c0_i32, %c0_i32_0 : i32, i32
  }
  func.func @transform_2(%arg0: i32) -> (i32, i32) {
    %c0_i32 = arith.constant 0 : i32
    %c0_i32_0 = arith.constant 0 : i32
    %c0_i32_1 = arith.constant 0 : i32
    return %c0_i32, %c0_i32_0 : i32, i32
  }
  func.func @transform_3(%arg0: i32) -> (i32, i32) {
    %c0_i32 = arith.constant 0 : i32
    %c0_i32_0 = arith.constant 0 : i32
    return %arg0, %c0_i32 : i32, i32
  }
  func.func @transform_4(%arg0: i32) -> (i32, i32) {
    %c0_i32 = arith.constant 0 : i32
    %c0_i32_0 = arith.constant 0 : i32
    return %arg0, %c0_i32 : i32, i32
  }
}

module attributes {stable_mosaic.version = 11 : i64} {
  func.func @_pool_fc_kernel(%arg0: i32, %arg1: memref<2x16x64xbf16, #tpu.memory_space<vmem>>, %arg2: memref<64x10xf32, #tpu.memory_space<vmem>>, %arg3: memref<1x10xf32, #tpu.memory_space<vmem>>, %arg4: memref<2x10xf32, #tpu.memory_space<vmem>>) attributes {dimension_semantics = [#tpu.dimension_semantics<arbitrary>], iteration_bounds = array<i64: 1>, scalar_prefetch = 0 : i64, scratch_operands = 0 : i64, tpu.core_type = #tpu.core_type<tc>, window_params = [{pipeline_mode = #tpu.pipeline_mode<synchronous>, transform_indices = @transform_0, window_bounds = array<i64: 2, 16, 64>}, {pipeline_mode = #tpu.pipeline_mode<synchronous>, transform_indices = @transform_1, window_bounds = array<i64: 64, 10>}, {pipeline_mode = #tpu.pipeline_mode<synchronous>, transform_indices = @transform_2, window_bounds = array<i64: 1, 10>}, {pipeline_mode = #tpu.pipeline_mode<synchronous>, transform_indices = @transform_3, window_bounds = array<i64: 2, 10>}]} {
    %c0 = arith.constant 0 : index
    %c0_0 = arith.constant 0 : index
    %c0_1 = arith.constant 0 : index
    %0 = vector.load %arg1[%c0, %c0_0, %c0_1] : memref<2x16x64xbf16, #tpu.memory_space<vmem>>, vector<2x16x64xbf16>
    %1 = arith.extf %0 : vector<2x16x64xbf16> to vector<2x16x64xf32>
    %cst = arith.constant dense<0.000000e+00> : vector<2x64xf32>
    %2 = vector.multi_reduction <add>, %1, %cst [1] : vector<2x16x64xf32> to vector<2x64xf32>
    %cst_2 = arith.constant 1.600000e+01 : f32
    %3 = vector.broadcast %cst_2 : f32 to vector<2x64xf32>
    %4 = arith.divf %2, %3 : vector<2x64xf32>
    %c0_3 = arith.constant 0 : index
    %c0_4 = arith.constant 0 : index
    %5 = vector.load %arg2[%c0_3, %c0_4] : memref<64x10xf32, #tpu.memory_space<vmem>>, vector<64x10xf32>
    %cst_5 = arith.constant dense<0.000000e+00> : vector<2x10xf32>
    %6 = tpu.matmul %4, %5, %cst_5 {dimension_numbers = #tpu.dot_dimension_numbers<[1], [0], [0], [1], [0, 0, 1, 1], [], []>} : vector<2x64xf32>, vector<64x10xf32>, vector<2x10xf32> -> vector<2x10xf32>
    %c0_6 = arith.constant 0 : index
    %c0_7 = arith.constant 0 : index
    %7 = vector.load %arg3[%c0_6, %c0_7] : memref<1x10xf32, #tpu.memory_space<vmem>>, vector<1x10xf32>
    %8 = vector.broadcast %7 : vector<1x10xf32> to vector<2x10xf32>
    %9 = arith.addf %6, %8 : vector<2x10xf32>
    %c0_8 = arith.constant 0 : index
    %c0_9 = arith.constant 0 : index
    %10 = vector.load %arg4[%c0_8, %c0_9] : memref<2x10xf32, #tpu.memory_space<vmem>>, vector<2x10xf32>
    tpu.vector_store %arg4[%c0_8, %c0_9], %9 {strides = array<i32>} : memref<2x10xf32, #tpu.memory_space<vmem>>, vector<2x10xf32>,
    return
  }
  func.func @transform_0(%arg0: i32) -> (i32, i32, i32) {
    %c0_i32 = arith.constant 0 : i32
    %c0_i32_0 = arith.constant 0 : i32
    %c0_i32_1 = arith.constant 0 : i32
    %c0_i32_2 = arith.constant 0 : i32
    return %c0_i32, %c0_i32_0, %c0_i32_1 : i32, i32, i32
  }
  func.func @transform_1(%arg0: i32) -> (i32, i32) {
    %c0_i32 = arith.constant 0 : i32
    %c0_i32_0 = arith.constant 0 : i32
    %c0_i32_1 = arith.constant 0 : i32
    return %c0_i32, %c0_i32_0 : i32, i32
  }
  func.func @transform_2(%arg0: i32) -> (i32, i32) {
    %c0_i32 = arith.constant 0 : i32
    %c0_i32_0 = arith.constant 0 : i32
    %c0_i32_1 = arith.constant 0 : i32
    return %c0_i32, %c0_i32_0 : i32, i32
  }
  func.func @transform_3(%arg0: i32) -> (i32, i32) {
    %c0_i32 = arith.constant 0 : i32
    %c0_i32_0 = arith.constant 0 : i32
    %c0_i32_1 = arith.constant 0 : i32
    return %c0_i32, %c0_i32_0 : i32, i32
  }
}

</mosaic_0001>

<bundles_post_ra>
// kernel: mul.53
= control target key start
LH: loop header
LB: loop body
LE: loop exit
PB: predicated region body
PF: predicated region fallthrough
CT: control target
= control target key end

     0   :  { %s34_s0 = inlined_call_operand.vmem [shape: f32[16], index: 0, kind: input, shape index: {}]   ;;  %s35_s1 = inlined_call_operand.vmem [shape: f32[16], index: 1, kind: input, shape index: {}]   ;;  %s36_s2 = inlined_call_operand.vmem [shape: f32[16], index: 2, kind: output, shape index: {}]  }
   0x1   :  { %v3_v0 = vld [vmem:[%s34_s0] sm:$0x1] }
   0x2   :  { %v4_v1 = vld [vmem:[%s35_s1] sm:$0x1] }
   0x3   :  { %v7_v2 = vmul.f32 %v4_v1, %v3_v0 }
   0x5   :  { %9 = vst [vmem:[%s36_s2] sm:$0x1] %v7_v2 }

// kernel: tile.133
= control target key start
LH: loop header
LB: loop body
LE: loop exit
PB: predicated region body
PF: predicated region fallthrough
CT: control target
= control target key end

     0   :  { %s22_s0 = inlined_call_operand.vmem [shape: f32[16], index: 0, kind: input, shape index: {}]   ;;  %s23_s1 = inlined_call_operand.vmem [shape: f32[8,16], index: 1, kind: output, shape index: {}]  }
   0x1   :  { %v4_v0 = vld [vmem:[%s22_s0] ss:$0 sm:$0xff] }
   0x2   :  { %5 = vst [vmem:[%s23_s1] sm:$0xff] %v4_v0 }

// kernel: tile.134
= control target key start
LH: loop header
LB: loop body
LE: loop exit
PB: predicated region body
PF: predicated region fallthrough
CT: control target
= control target key end

     0   :  { %s67_s10 = smov 112   ;;  %s68_s11 = smov 80   ;;  %vm3_vm0 = vcmask 130048   ;;  %vm9_vm1 = vcmask 1048448   ;;  %vm15_vm2 = vcmask 917248   ;;  %vm21_vm3 = vcmask 786048   ;;  %s111_s0 = inlined_call_operand.vmem [shape: f32[8,16], index: 0, kind: input, shape index: {}]   ;;  %s112_s1 = inlined_call_operand.vmem [shape: f32[1,128], index: 1, kind: output, shape index: {}]  }
   0x1   :  { %v53_v0 = vld [vmem:[%s111_s0 + $0x7] sm:$0x1]   ;;  %v55_v1 = vld [vmem:[%s111_s0 + $0x5] sm:$0x1]   ;;  %v54_v2 = vld [vmem:[%s111_s0 + $0x6] sm:$0x1]  }
   0x2   :  { %7 = vrot.lane.b32.xlu0 %v53_v0, %s67_s10  ;;  %19 = vrot.lane.b32.xlu1 %v55_v1, %s68_s11  ;;  %v56_v3 = vld [vmem:[%s111_s0 + $0x4] sm:$0x1]   ;;  %v2_v4 = vld [vmem:[%s111_s0] sm:$0x1]   ;;  %s69_s18 = smov 96   ;;  %s70_s19 = smov 64  }
   0x3   :  { %4 = vst.msk [vmem:[#allocation0] sm:$0x1] %vm3_vm0, %v2_v4   ;;  %v57_v5 = vld [vmem:[%s111_s0 + $0x3] sm:$0x1]   ;;  %v58_v6 = vld [vmem:[%s111_s0 + $0x2] sm:$0x1]  }
   0x4   :  { %s71_s24 = smov 48   ;;  %s72_s25 = smov 32   ;;  %v59_v7 = vld [vmem:[%s111_s0 + $0x1] sm:$0x1]   ;;  %vm27_vm4 = vcmask 654848   ;;  %vm33_vm5 = vcmask 523648  }
   0x5   :  { %s73_s0 = smov 16   ;;  %vm39_vm6 = vcmask 392448   ;;  %vm45_vm7 = vcmask 261248  }
   0x6   :  { %13 = vrot.lane.b32.xlu0 %v54_v2, %s69_s18  ;;  %25 = vrot.lane.b32.xlu1 %v56_v3, %s70_s19 }
   0xa   :  { %31 = vrot.lane.b32.xlu0 %v57_v5, %s71_s24  ;;  %37 = vrot.lane.b32.xlu1 %v58_v6, %s72_s25 }
   0xe   :  { %43 = vrot.lane.b32.xlu0 %v59_v7, %s73_s0 }
  0x74   :  { %v8_v8 = vpop.permute.xlu0 %7   ;;  %v20_v9 = vpop.permute.xlu1 %19  }
  0x75   :  { %10 = vst.msk [vmem:[#allocation0] sm:$0x1] %vm9_vm1, %v8_v8  }
  0x78   :  { %v14_v10 = vpop.permute.xlu0 %13   ;;  %v26_v11 = vpop.permute.xlu1 %25  }
  0x79   :  { %16 = vst.msk [vmem:[#allocation0] sm:$0x1] %vm15_vm2, %v14_v10  }
  0x7a   :  { %22 = vst.msk [vmem:[#allocation0] sm:$0x1] %vm21_vm3, %v20_v9  }
  0x7b   :  { %28 = vst.msk [vmem:[#allocation0] sm:$0x1] %vm27_vm4, %v26_v11  }
  0x7c   :  { %v32_v12 = vpop.permute.xlu0 %31   ;;  %v38_v13 = vpop.permute.xlu1 %37  }
  0x7d   :  { %34 = vst.msk [vmem:[#allocation0] sm:$0x1] %vm33_vm5, %v32_v12  }
  0x7e   :  { %40 = vst.msk [vmem:[#allocation0] sm:$0x1] %vm39_vm6, %v38_v13  }
  0x80   :  { %v44_v14 = vpop.permute.xlu0 %43  }
  0x81   :  { %46 = vst.msk [vmem:[#allocation0] sm:$0x1] %vm45_vm7, %v44_v14  }
  0x88   :  { %v50_v15 = vld [vmem:[#allocation0] sm:$0x1] }
  0x89   :  { %52 = vst [vmem:[%s112_s1] sm:$0x1] %v50_v15 }

// kernel: resnet_forward.28
= control target key start
LH: loop header
LB: loop body
LE: loop exit
PB: predicated region body
PF: predicated region fallthrough
CT: control target
= control target key end

     0   :  { %s361_s12 = smov 0   ;;  %s384_s0 = inlined_call_operand.vmem [shape: bf16[64,128], index: 0, kind: input, shape index: {}]   ;;  %s385_s1 = inlined_call_operand.vmem [shape: f32[1,128], index: 1, kind: input, shape index: {}]   ;;  %s386_s2 = inlined_call_operand.vmem [shape: f32[1,128], index: 2, kind: input, shape index: {}]   ;;  %s387_s3 = inlined_call_operand.vmem [shape: bf16[64,128], index: 3, kind: output, shape index: {}]  }
   0x1 LB: > { %s284_s13 = sadd.s32 4294967295, %s339_s12   ;;  %p288_p0 = scmp.ge.s32.totalorder %s339_s12, 1  ;;  %s339_s12 = sphi %s361_s12, %s13_s12  }
   0x2   : > { %p138_p1 = scmp.lt.s32.totalorder %s339_s12, 3 }
   0x4   : > { %p139_p2 = pnand %p288_p0, %p138_p1 }
   0x5   : > { %s289_s14 = sshll.u32 (!%p139_p2), %s284_s13, 2  ;;  %v293_v2 = vld [vmem:[%s385_s1] ss:$0 sm:$0xff] (!%p139_p2) }
   0x6   : > { %142 = sbr.rel (%p139_p2) target bundleno = 28 (0x1c), region = 32  ;;  %p163_p3 = scmp.lt.s32.totalorder (!%p139_p2), %s289_s14, 7  ;;  %v294_v7 = vld [vmem:[%s386_s2] ss:$0 sm:$0xff] (!%p139_p2) }
   0xd   : > { %s389_s14 = smov (!%p163_p3, %s289_s14), 7 }
   0xe   : > { %s290_s15 = sshll.u32 %s389_s14, 2 }
   0xf   : > { %s166_s18 = scalar_lea.vmem %s384_s0, %s290_s15  ;;  %s172_s25 = scalar_lea.vmem %s387_s3, %s290_s15 }
  0x10   : > { %v306_v0 = vld [vmem:[%s166_s18] sm:$0xff]   ;;  %v323_v1 = vld [vmem:[%s166_s18 + $0x8] sm:$0xff]  }
  0x11   : > { %v307_v3 = vunpack.c.l.bf16 %v306_v0  ;;  %v308_v4 = vunpack.c.h.bf16 %v306_v0  ;;  %v311_v5 = vunpack.c.l.bf16 %v323_v1  ;;  %v312_v6 = vunpack.c.h.bf16 %v323_v1 }
  0x13   : > { %v189_v8 = vmul.f32 %v307_v3, %v293_v2  ;;  %v190_v9 = vmul.f32 %v308_v4, %v293_v2  ;;  %v191_v10 = vmul.f32 %v311_v5, %v293_v2  ;;  %v192_v11 = vmul.f32 %v312_v6, %v293_v2 }
  0x15   : > { %v200_v12 = vadd.f32 %v294_v7, %v189_v8  ;;  %v201_v13 = vadd.f32 %v294_v7, %v190_v9  ;;  %v202_v14 = vadd.f32 %v294_v7, %v191_v10  ;;  %v203_v15 = vadd.f32 %v294_v7, %v192_v11 }
  0x17   : > { %v204_v16 = vmax.f32 %v200_v12, 0.0  ;;  %v205_v17 = vmax.f32 %v201_v13, 0.0  ;;  %v206_v18 = vmax.f32 %v202_v14, 0.0  ;;  %v207_v19 = vmax.f32 %v203_v15, 0.0 }
  0x19   : > { %v316_v20 = vpack.c.bf16 %v205_v17, %v204_v16  ;;  %v321_v21 = vpack.c.bf16 %v207_v19, %v206_v18 }
  0x1b   : > { %317 = vst [vmem:[%s172_s25] sm:$0xff] %v316_v20   ;;  %324 = vst [vmem:[%s172_s25 + $0x8] sm:$0xff] %v321_v21  }
  0x1c PF: > { %s13_s12 = sadd.s32 1, %s339_s12  }
  0x1d   : > { %p10_p4 = scmp.ge.s32.totalorder %s13_s12, 4  }
  0x1f   :  { %12 = sbr.rel (!%p10_p4) target bundleno = 1 (0x1), region = 62 }

// kernel: resnet_forward.27
= control target key start
LH: loop header
LB: loop body
LE: loop exit
PB: predicated region body
PF: predicated region fallthrough
CT: control target
= control target key end

     0   :  { %s1176_s12 = smov 0   ;;  %s1490_s0 = inlined_call_operand.vmem [shape: bf16[512,27], index: 0, kind: input, shape index: {}]   ;;  %s1491_s1 = inlined_call_operand.vmem [shape: bf16[27,16], index: 1, kind: input, shape index: {}]   ;;  %s1492_s2 = inlined_call_operand.vmem [shape: bf16[512,16], index: 2, kind: output, shape index: {0}]   ;;  %s1493_s3 = inlined_call_operand.vmem [shape: f32[2,2,16], index: 3, kind: output, shape index: {1}]  }
   0x1 LB: > { %s1182_s13 = sadd.s32 4294967295, %s1153_s12   ;;  %p956_p0 = scmp.ge.s32.totalorder %s1153_s12, 1  ;;  %s1153_s12 = sphi %s1176_s12, %s14_s12  }
   0x2   : > { %p141_p1 = scmp.lt.s32.totalorder %s1153_s12, 3 }
   0x4   : > { %p142_p2 = pnand %p956_p0, %p141_p1 }
   0x5   : > { %v1129_v0 = vld [vmem:[%s1491_s1] sm:$0xff] (!%p142_p2)   ;;  %vm362_vm0 = vcmask (!%p142_p2), 1044480   ;;  %v1130_v1 = vld [vmem:[%s1491_s1 + $0x8] sm:$0x3f] (!%p142_p2)   ;;  %vm363_vm1 = vcmask (!%p142_p2), 1045504   ;;  %s957_s18 = sshll.u32 (!%p142_p2), %s1182_s13, 5 }
   0x6   : > { %145 = sbr.rel (%p142_p2) target bundleno = 311 (0x137), region = 28  ;;  %1080 = vmatprep.subr.bf16.mxu0 (!%p142_p2), %v1129_v0  ;;  %1116 = vmatprep.subr.bf16.mxu1 (!%p142_p2), %v1129_v0  ;;  %v1155_v2 = vmov (!%p142_p2), 65535   ;;  %p170_p3 = scmp.lt.s32.totalorder (!%p142_p2), %s957_s18, 63  ;;  %vm313_vm2 = vcmask (!%p142_p2), 220160   ;;  %vm658_vm3 = vcmask (!%p142_p2), 125952   ;;  %vm691_vm4 = vcmask (!%p142_p2), 130048  }
   0x7   : > { %1081 = vmatpush3.bf16.msra.mxu0 (!%p142_p2), %v1129_v0  ;;  %v364_v3 = vsel (!%p142_p2), %vm362_vm0, 4294967295, %v1155_v2  ;;  %1118 = vmatpush3.bf16.msra.mxu1 (!%p142_p2), %v1129_v0  ;;  %p181_p4 = scmp.lt.s32.totalorder (!%p142_p2), %s1182_s13, 1  ;;  %vm761_vm5 = vcmask (!%p142_p2), 122880  }
   0x8   : > { %v365_v4 = vsel (!%p142_p2), %vm363_vm1, %v364_v3, 0 }
   0x9   : > { %v367_v5 = vand.u32 (!%p142_p2), %v1130_v1, %v365_v4 }
   0xb   : > { %1082 = vmatprep.subr.bf16.mxu0 (!%p142_p2), %v367_v5  ;;  %1117 = vmatprep.subr.bf16.mxu1 (!%p142_p2), %v367_v5 }
   0xc   : > { %1083 = vmatpush3.bf16.msra.mxu0 (!%p142_p2), %v367_v5  ;;  %1119 = vmatpush3.bf16.msra.mxu1 (!%p142_p2), %v367_v5 }
   0xd   : > { %s1495_s18 = smov (!%p170_p3, %s957_s18), 63  ;;  %s1497_s13 = smov (!%p181_p4, %s1182_s13), 1 }
   0xe   : > { %s958_s19 = sshll.u32 %s1495_s18, 2  ;;  %s961_s26 = sshll.u32 %s1497_s13, 1 }
   0xf   : > { %s1201_s22 = scalar_lea.vmem %s1490_s0, %s958_s19  ;;  %s1240_s25 = scalar_lea.vmem %s1492_s2, %s958_s19 }
  0x10   : > { %v1131_v6 = vld [vmem:[%s1201_s22] sm:$0xff]   ;;  %v1132_v7 = vld [vmem:[%s1201_s22 + $0x8] sm:$0xff]   ;;  %v1133_v8 = vld [vmem:[%s1201_s22 + $0x10] sm:$0xff]   ;;  %s184_s29 = scalar_lea.vmem %s1493_s3, %s961_s26 }
  0x11   : > { %1084 = vmatprep.mubr.msk.bf16.mxu0 %vm313_vm2, %v1131_v6  ;;  %v1134_v9 = vld [vmem:[%s1201_s22 + $0x18] sm:$0xff]   ;;  %v1135_v10 = vld [vmem:[%s1201_s22 + $0x20] sm:$0xff]   ;;  %v1140_v12 = vld [vmem:[%s1201_s22 + $0x48] sm:$0xff]  }
  0x12   : > { %1085 = vmatmul.mubr.msk.bf16.vlgmr.msra.gmra.mrb[0].mxu0 %vm313_vm2, %v1132_v7  ;;  %v1139_v11 = vld [vmem:[%s1201_s22 + $0x40] sm:$0xff]   ;;  %v1141_v13 = vld [vmem:[%s1201_s22 + $0x50] sm:$0xff]   ;;  %v1136_v14 = vld [vmem:[%s1201_s22 + $0x28] sm:$0xff]  }
  0x13   : > { %1088 = vmatprep.mubr.msk.bf16.mxu0 %vm313_vm2, %v1133_v8  ;;  %1100 = vmatprep.mubr.msk.bf16.mxu1 %vm313_vm2, %v1139_v11  ;;  %v1142_v15 = vld [vmem:[%s1201_s22 + $0x58] sm:$0xff]   ;;  %v1137_v16 = vld [vmem:[%s1201_s22 + $0x30] sm:$0xff]   ;;  %v1143_v17 = vld [vmem:[%s1201_s22 + $0x60] sm:$0xff]  }
  0x14   : > { %1101 = vmatmul.mubr.msk.bf16.vlgmr.msra.gmra.mrb[0].mxu1 %vm313_vm2, %v1140_v12  ;;  %v1138_v18 = vld [vmem:[%s1201_s22 + $0x38] sm:$0xff]   ;;  %v1144_v19 = vld [vmem:[%s1201_s22 + $0x68] sm:$0xff]   ;;  %v1145_v20 = vld [vmem:[%s1201_s22 + $0x70] sm:$0xff]  }
  0x15   : > { %1104 = vmatprep.mubr.msk.bf16.mxu1 %vm313_vm2, %v1141_v13  ;;  %v1146_v21 = vld [vmem:[%s1201_s22 + $0x78] sm:$0xff]  }
  0x1a   : > { %1089 = vmatmul.mubr.msk.bf16.gmra.mrb[4].mxu0 %vm313_vm2, %v1134_v9 }
  0x1b   : > { %1092 = vmatprep.mubr.msk.bf16.mxu0 %vm313_vm2, %v1135_v10 }
  0x1c   : > { %1105 = vmatmul.mubr.msk.bf16.gmra.mrb[4].mxu1 %vm313_vm2, %v1142_v15 }
  0x1d   : > { %1108 = vmatprep.mubr.msk.bf16.mxu1 %vm313_vm2, %v1143_v17 }
  0x22   : > { %1093 = vmatmul.mubr.msk.bf16.gmra.mrb[8].mxu0 %vm313_vm2, %v1136_v14 }
  0x23   : > { %1096 = vmatprep.mubr.msk.bf16.mxu0 %vm313_vm2, %v1137_v16 }
  0x24   : > { %1109 = vmatmul.mubr.msk.bf16.gmra.mrb[8].mxu1 %vm313_vm2, %v1144_v19 }
  0x25   : > { %1112 = vmatprep.mubr.msk.bf16.mxu1 %vm313_vm2, %v1145_v20 }
  0x2a   : > { %1097 = vmatmul.mubr.msk.bf16.gmra.mrb[12].mxu0 %vm313_vm2, %v1138_v18 }
  0x2c   : > { %1113 = vmatmul.mubr.msk.bf16.gmra.mrb[12].mxu1 %vm313_vm2, %v1146_v21 }
  0xe5   : > { %v1086_v22 = vpop.f32.mrb[0].mxu0 }
  0xe6   : > { %v1032_v23 = vpack.c.bf16 %v1086_v22, %v1086_v22  ;;  %v403_v24 = vpop.f32.mrb[1].mxu0  ;;  %v765_v28 = vmul.f32 %v1086_v22, %v1086_v22  ;;  %v695_v37 = vsel %vm691_vm4, %v1086_v22, 0.0 }
  0xe7   : > { %v1030_v25 = vpack.c.bf16 %v403_v24, %v403_v24  ;;  %v763_v26 = vmul.f32 %v403_v24, %v403_v24  ;;  %v1087_v27 = vpop.f32.mrb[2].mxu0  ;;  %v692_v31 = vsel %vm691_vm4, %v403_v24, 0.0  ;;  %v1256_v44 = vpop.f32.mrb[0].mxu1 }
  0xe8   : > { %661 = vst.msk [vmem:[%s1240_s25 + $0x8] sm:$0xf] %vm658_vm3, %v1032_v23  ;;  %v1033_v29 = vpack.c.bf16 %v1087_v27, %v1087_v27  ;;  %v406_v30 = vpop.f32.mrb[3].mxu0  ;;  %v766_v35 = vmul.f32 %v1087_v27, %v1087_v27  ;;  %v798_v42 = vsel %vm691_vm4, %v765_v28, 0.0  ;;  %v697_v45 = vsel %vm691_vm4, %v1087_v27, 0.0  ;;  %v1260_v50 = vpop.f32.mrb[1].mxu1 }
  0xe9   : > { %659 = vst.msk [vmem:[%s1240_s25] sm:$0xf] %vm658_vm3, %v1030_v25  ;;  %v1031_v32 = vpack.c.bf16 %v406_v30, %v406_v30  ;;  %v693_v33 = vsel %vm691_vm4, %v406_v30, 0.0  ;;  %v764_v34 = vmul.f32 %v406_v30, %v406_v30  ;;  %v795_v38 = vsel %vm691_vm4, %v763_v26, 0.0  ;;  %v1263_v56 = vpop.f32.mrb[2].mxu1 }
  0xea   : > { %662 = vst.msk [vmem:[%s1240_s25 + $0xc] sm:$0xf] %vm658_vm3, %v1033_v29  ;;  %v694_v36 = vadd.f32 %v693_v33, %v692_v31  ;;  %v800_v46 = vsel %vm691_vm4, %v766_v35, 0.0  ;;  %v1267_v60 = vpop.f32.mrb[3].mxu1  ;;  %v1048_v4 = vpack.c.bf16 %v1256_v44, %v1256_v44  ;;  %v1046_v9 = vpack.c.bf16 %v1260_v50, %v1260_v50 }
  0xeb   : > { %660 = vst.msk [vmem:[%s1240_s25 + $0x4] sm:$0xf] %vm658_vm3, %v1031_v32  ;;  %v796_v39 = vsel %vm691_vm4, %v764_v34, 0.0  ;;  %v1049_v13 = vpack.c.bf16 %v1263_v56, %v1263_v56 }
  0xec   : > { %v696_v40 = vadd.f32 %v695_v37, %v694_v36  ;;  %v797_v41 = vadd.f32 %v796_v39, %v795_v38  ;;  %677 = vst.msk [vmem:[%s1240_s25 + $0x48] sm:$0xf] %vm658_vm3, %v1048_v4  ;;  %675 = vst.msk [vmem:[%s1240_s25 + $0x40] sm:$0xf] %vm658_vm3, %v1046_v9 }
  0xed   : > { %v1090_v43 = vpop.f32.mrb[4].mxu0  ;;  %678 = vst.msk [vmem:[%s1240_s25 + $0x4c] sm:$0xf] %vm658_vm3, %v1049_v13 }
  0xee   : > { %v799_v47 = vadd.f32 %v798_v42, %v797_v41  ;;  %v1036_v48 = vpack.c.bf16 %v1090_v43, %v1090_v43  ;;  %v419_v49 = vpop.f32.mrb[5].mxu0  ;;  %v698_v52 = vadd.f32 %v697_v45, %v696_v40  ;;  %v769_v61 = vmul.f32 %v1090_v43, %v1090_v43 }
  0xef   : > { %v1034_v51 = vpack.c.bf16 %v419_v49, %v419_v49  ;;  %v699_v53 = vsel %vm691_vm4, %v419_v49, 0.0  ;;  %v767_v54 = vmul.f32 %v419_v49, %v419_v49  ;;  %v1091_v55 = vpop.f32.mrb[6].mxu0  ;;  %v703_v6 = vsel %vm691_vm4, %v1090_v43, 0.0  ;;  %v1287_v14 = vpop.f32.mrb[4].mxu1 }
  0xf0   : > { %665 = vst.msk [vmem:[%s1240_s25 + $0x18] sm:$0xf] %vm658_vm3, %v1036_v48  ;;  %v801_v57 = vadd.f32 %v800_v46, %v799_v47  ;;  %v1037_v58 = vpack.c.bf16 %v1091_v55, %v1091_v55  ;;  %v422_v59 = vpop.f32.mrb[7].mxu0  ;;  %v700_v62 = vadd.f32 %v699_v53, %v698_v52  ;;  %v770_v7 = vmul.f32 %v1091_v55, %v1091_v55  ;;  %v1293_v19 = vpop.f32.mrb[5].mxu1 }
  0xf1   : > { %663 = vst.msk [vmem:[%s1240_s25 + $0x10] sm:$0xf] %vm658_vm3, %v1034_v51  ;;  %v802_v63 = vsel %vm691_vm4, %v767_v54, 0.0  ;;  %v1035_v0 = vpack.c.bf16 %v422_v59, %v422_v59  ;;  %v701_v2 = vsel %vm691_vm4, %v422_v59, 0.0  ;;  %v768_v3 = vmul.f32 %v422_v59, %v422_v59  ;;  %v1298_v25 = vpop.f32.mrb[6].mxu1 }
  0xf2   : > { %v803_v1 = vadd.f32 %v802_v63, %v801_v57  ;;  %666 = vst.msk [vmem:[%s1240_s25 + $0x1c] sm:$0xf] %vm658_vm3, %v1037_v58  ;;  %v702_v5 = vadd.f32 %v701_v2, %v700_v62  ;;  %v806_v15 = vsel %vm691_vm4, %v769_v61, 0.0  ;;  %v705_v16 = vsel %vm691_vm4, %v1091_v55, 0.0  ;;  %v1303_v30 = vpop.f32.mrb[7].mxu1 }
  0xf3   : > { %664 = vst.msk [vmem:[%s1240_s25 + $0x14] sm:$0xf] %vm658_vm3, %v1035_v0  ;;  %v804_v8 = vsel %vm691_vm4, %v768_v3, 0.0  ;;  %v808_v26 = vsel %vm691_vm4, %v770_v7, 0.0  ;;  %v1047_v43 = vpack.c.bf16 %v1267_v60, %v1267_v60  ;;  %v1052_v48 = vpack.c.bf16 %v1287_v14, %v1287_v14 }
  0xf4   : > { %v704_v10 = vadd.f32 %v703_v6, %v702_v5  ;;  %v805_v11 = vadd.f32 %v804_v8, %v803_v1 }
  0xf5   : > { %v1094_v12 = vpop.f32.mrb[8].mxu0  ;;  %676 = vst.msk [vmem:[%s1240_s25 + $0x44] sm:$0xf] %vm658_vm3, %v1047_v43  ;;  %681 = vst.msk [vmem:[%s1240_s25 + $0x58] sm:$0xf] %vm658_vm3, %v1052_v48  ;;  %v725_v43 = vsel %vm691_vm4, %v1267_v60, 0.0 }
  0xf6   : > { %v1040_v17 = vpack.c.bf16 %v1094_v12, %v1094_v12  ;;  %v435_v18 = vpop.f32.mrb[9].mxu0  ;;  %v807_v20 = vadd.f32 %v806_v15, %v805_v11  ;;  %v706_v22 = vadd.f32 %v705_v16, %v704_v10  ;;  %v773_v34 = vmul.f32 %v1094_v12, %v1094_v12 }
  0xf7   : > { %v1038_v21 = vpack.c.bf16 %v435_v18, %v435_v18  ;;  %v707_v23 = vsel %vm691_vm4, %v435_v18, 0.0  ;;  %v1095_v24 = vpop.f32.mrb[10].mxu0  ;;  %v771_v27 = vmul.f32 %v435_v18, %v435_v18  ;;  %v711_v40 = vsel %vm691_vm4, %v1094_v12, 0.0  ;;  %v1319_v49 = vpop.f32.mrb[8].mxu1 }
  0xf8   : > { %669 = vst.msk [vmem:[%s1240_s25 + $0x28] sm:$0xf] %vm658_vm3, %v1040_v17  ;;  %v1041_v28 = vpack.c.bf16 %v1095_v24, %v1095_v24  ;;  %v438_v29 = vpop.f32.mrb[11].mxu0  ;;  %v708_v31 = vadd.f32 %v707_v23, %v706_v22  ;;  %v809_v32 = vadd.f32 %v808_v26, %v807_v20  ;;  %v774_v41 = vmul.f32 %v1095_v24, %v1095_v24  ;;  %v1325_v55 = vpop.f32.mrb[9].mxu1 }
  0xf9   : > { %667 = vst.msk [vmem:[%s1240_s25 + $0x20] sm:$0xf] %vm658_vm3, %v1038_v21  ;;  %v1039_v33 = vpack.c.bf16 %v438_v29, %v438_v29  ;;  %v810_v35 = vsel %vm691_vm4, %v771_v27, 0.0  ;;  %v709_v36 = vsel %vm691_vm4, %v438_v29, 0.0  ;;  %v772_v37 = vmul.f32 %v438_v29, %v438_v29  ;;  %v1330_v63 = vpop.f32.mrb[10].mxu1 }
  0xfa   : > { %670 = vst.msk [vmem:[%s1240_s25 + $0x2c] sm:$0xf] %vm658_vm3, %v1041_v28  ;;  %v811_v38 = vadd.f32 %v810_v35, %v809_v32  ;;  %v710_v39 = vadd.f32 %v709_v36, %v708_v31  ;;  %v814_v51 = vsel %vm691_vm4, %v773_v34, 0.0  ;;  %v713_v52 = vsel %vm691_vm4, %v1095_v24, 0.0  ;;  %v1335_v4 = vpop.f32.mrb[11].mxu1 }
  0xfb   : > { %668 = vst.msk [vmem:[%s1240_s25 + $0x24] sm:$0xf] %vm658_vm3, %v1039_v33  ;;  %v812_v42 = vsel %vm691_vm4, %v772_v37, 0.0  ;;  %v816_v0 = vsel %vm691_vm4, %v774_v41, 0.0  ;;  %v779_v15 = vmul.f32 %v1260_v50, %v1260_v50  ;;  %v1050_v20 = vpack.c.bf16 %v1293_v19, %v1293_v19 }
  0xfc   : > { %v712_v45 = vadd.f32 %v711_v40, %v710_v39  ;;  %v813_v46 = vadd.f32 %v812_v42, %v811_v38  ;;  %v1053_v23 = vpack.c.bf16 %v1298_v25, %v1298_v25  ;;  %v723_v28 = vsel %vm691_vm4, %v1260_v50, 0.0 }
  0xfd   : > { %v1098_v47 = vpop.f32.mrb[12].mxu0  ;;  %679 = vst.msk [vmem:[%s1240_s25 + $0x50] sm:$0xf] %vm658_vm3, %v1050_v20  ;;  %v1051_v29 = vpack.c.bf16 %v1303_v30, %v1303_v30  ;;  %v826_v36 = vsel %vm691_vm4, %v779_v15, 0.0  ;;  %v780_v50 = vmul.f32 %v1267_v60, %v1267_v60  ;;  %v1056_v37 = vpack.c.bf16 %v1319_v49, %v1319_v49 }
  0xfe   : > { %v1044_v53 = vpack.c.bf16 %v1098_v47, %v1098_v47  ;;  %v451_v54 = vpop.f32.mrb[13].mxu0  ;;  %v815_v57 = vadd.f32 %v814_v51, %v813_v46  ;;  %v714_v59 = vadd.f32 %v713_v52, %v712_v45  ;;  %v777_v8 = vmul.f32 %v1098_v47, %v1098_v47  ;;  %682 = vst.msk [vmem:[%s1240_s25 + $0x5c] sm:$0xf] %vm658_vm3, %v1053_v23 }
  0xff   : > { %v1042_v58 = vpack.c.bf16 %v451_v54, %v451_v54  ;;  %v715_v61 = vsel %vm691_vm4, %v451_v54, 0.0  ;;  %v1099_v62 = vpop.f32.mrb[14].mxu0  ;;  %v775_v1 = vmul.f32 %v451_v54, %v451_v54  ;;  %v719_v16 = vsel %vm691_vm4, %v1098_v47, 0.0  ;;  %v1353_v24 = vpop.f32.mrb[12].mxu1  ;;  %680 = vst.msk [vmem:[%s1240_s25 + $0x54] sm:$0xf] %vm658_vm3, %v1051_v29 }
 0x100   : > { %673 = vst.msk [vmem:[%s1240_s25 + $0x38] sm:$0xf] %vm658_vm3, %v1044_v53  ;;  %v1045_v2 = vpack.c.bf16 %v1099_v62, %v1099_v62  ;;  %v454_v3 = vpop.f32.mrb[15].mxu0  ;;  %v716_v5 = vadd.f32 %v715_v61, %v714_v59  ;;  %v817_v6 = vadd.f32 %v816_v0, %v815_v57  ;;  %v778_v17 = vmul.f32 %v1099_v62, %v1099_v62  ;;  %v1363_v31 = vpop.f32.mrb[13].mxu1 }
 0x101   : > { %671 = vst.msk [vmem:[%s1240_s25 + $0x30] sm:$0xf] %vm658_vm3, %v1042_v58  ;;  %v1043_v7 = vpack.c.bf16 %v454_v3, %v454_v3  ;;  %v818_v9 = vsel %vm691_vm4, %v775_v1, 0.0  ;;  %v717_v10 = vsel %vm691_vm4, %v454_v3, 0.0  ;;  %v776_v11 = vmul.f32 %v454_v3, %v454_v3  ;;  %v1367_v34 = vpop.f32.mrb[14].mxu1 }
 0x102   : > { %674 = vst.msk [vmem:[%s1240_s25 + $0x3c] sm:$0xf] %vm658_vm3, %v1045_v2  ;;  %v819_v12 = vadd.f32 %v818_v9, %v817_v6  ;;  %v718_v13 = vadd.f32 %v717_v10, %v716_v5  ;;  %v822_v26 = vsel %vm691_vm4, %v777_v8, 0.0  ;;  %v721_v27 = vsel %vm691_vm4, %v1099_v62, 0.0  ;;  %v1377_v38 = vpop.f32.mrb[15].mxu1 }
 0x103   : > { %672 = vst.msk [vmem:[%s1240_s25 + $0x34] sm:$0xf] %vm658_vm3, %v1043_v7  ;;  %v820_v18 = vsel %vm691_vm4, %v776_v11, 0.0  ;;  %v824_v35 = vsel %vm691_vm4, %v778_v17, 0.0  ;;  %v1054_v41 = vpack.c.bf16 %v1325_v55, %v1325_v55  ;;  %v781_v42 = vmul.f32 %v1256_v44, %v1256_v44  ;;  %685 = vst.msk [vmem:[%s1240_s25 + $0x68] sm:$0xf] %vm658_vm3, %v1056_v37 }
 0x104   : > { %v720_v21 = vadd.f32 %v719_v16, %v718_v13  ;;  %v821_v22 = vadd.f32 %v820_v18, %v819_v12  ;;  %v1057_v45 = vpack.c.bf16 %v1330_v63, %v1330_v63  ;;  %v727_v46 = vsel %vm691_vm4, %v1256_v44, 0.0 }
 0x105   : > { %683 = vst.msk [vmem:[%s1240_s25 + $0x60] sm:$0xf] %vm658_vm3, %v1054_v41  ;;  %v782_v51 = vmul.f32 %v1263_v56, %v1263_v56  ;;  %v828_v52 = vsel %vm691_vm4, %v780_v50, 0.0  ;;  %v783_v60 = vmul.f32 %v1293_v19, %v1293_v19  ;;  %v1055_v53 = vpack.c.bf16 %v1335_v4, %v1335_v4 }
 0x106   : > { %v823_v32 = vadd.f32 %v822_v26, %v821_v22  ;;  %v722_v33 = vadd.f32 %v721_v27, %v720_v21  ;;  %686 = vst.msk [vmem:[%s1240_s25 + $0x6c] sm:$0xf] %vm658_vm3, %v1057_v45  ;;  %v1060_v57 = vpack.c.bf16 %v1353_v24, %v1353_v24  ;;  %v830_v58 = vsel %vm691_vm4, %v781_v42, 0.0 }
 0x107   : > { %v729_v59 = vsel %vm691_vm4, %v1263_v56, 0.0  ;;  %v731_v61 = vsel %vm691_vm4, %v1293_v19, 0.0  ;;  %684 = vst.msk [vmem:[%s1240_s25 + $0x64] sm:$0xf] %vm658_vm3, %v1055_v53  ;;  %v1058_v62 = vpack.c.bf16 %v1363_v31, %v1363_v31  ;;  %v832_v2 = vsel %vm691_vm4, %v782_v51, 0.0 }
 0x108   : > { %v724_v39 = vadd.f32 %v723_v28, %v722_v33  ;;  %v825_v40 = vadd.f32 %v824_v35, %v823_v32  ;;  %689 = vst.msk [vmem:[%s1240_s25 + $0x78] sm:$0xf] %vm658_vm3, %v1060_v57  ;;  %v834_v3 = vsel %vm691_vm4, %v783_v60, 0.0  ;;  %v784_v56 = vmul.f32 %v1303_v30, %v1303_v30 }
 0x109   : > { %687 = vst.msk [vmem:[%s1240_s25 + $0x70] sm:$0xf] %vm658_vm3, %v1058_v62  ;;  %v1061_v19 = vpack.c.bf16 %v1367_v34, %v1367_v34  ;;  %v1059_v7 = vpack.c.bf16 %v1377_v38, %v1377_v38  ;;  %v785_v8 = vmul.f32 %v1287_v14, %v1287_v14  ;;  %v733_v9 = vsel %vm691_vm4, %v1303_v30, 0.0 }
 0x10a   : > { %v827_v47 = vadd.f32 %v826_v36, %v825_v40  ;;  %v726_v48 = vadd.f32 %v725_v43, %v724_v39  ;;  %v735_v12 = vsel %vm691_vm4, %v1287_v14, 0.0  ;;  %v786_v13 = vmul.f32 %v1298_v25, %v1298_v25 }
 0x10b   : > { %690 = vst.msk [vmem:[%s1240_s25 + $0x7c] sm:$0xf] %vm658_vm3, %v1061_v19  ;;  %688 = vst.msk [vmem:[%s1240_s25 + $0x74] sm:$0xf] %vm658_vm3, %v1059_v7  ;;  %v836_v15 = vsel %vm691_vm4, %v784_v56, 0.0  ;;  %v787_v16 = vmul.f32 %v1325_v55, %v1325_v55  ;;  %v838_v30 = vsel %vm691_vm4, %v785_v8, 0.0  ;;  %v788_v27 = vmul.f32 %v1335_v4, %v1335_v4 }
 0x10c   : > { %v728_v44 = vadd.f32 %v727_v46, %v726_v48  ;;  %v829_v54 = vadd.f32 %v828_v52, %v827_v47  ;;  %v737_v20 = vsel %vm691_vm4, %v1298_v25, 0.0  ;;  %v739_v21 = vsel %vm691_vm4, %v1325_v55, 0.0 }
 0x10d   : > { %v840_v23 = vsel %vm691_vm4, %v786_v13, 0.0  ;;  %v842_v26 = vsel %vm691_vm4, %v787_v16, 0.0  ;;  %v789_v32 = vmul.f32 %v1319_v49, %v1319_v49  ;;  %v741_v25 = vsel %vm691_vm4, %v1335_v4, 0.0 }
 0x10e   : > { %v831_v0 = vadd.f32 %v830_v58, %v829_v54  ;;  %v730_v1 = vadd.f32 %v729_v59, %v728_v44  ;;  %v743_v55 = vsel %vm691_vm4, %v1319_v49, 0.0  ;;  %v790_v36 = vmul.f32 %v1330_v63, %v1330_v63 }
 0x10f   : > { %v844_v50 = vsel %vm691_vm4, %v788_v27, 0.0  ;;  %v791_v37 = vmul.f32 %v1363_v31, %v1363_v31  ;;  %v846_v41 = vsel %vm691_vm4, %v789_v32, 0.0  ;;  %v745_v4 = vsel %vm691_vm4, %v1330_v63, 0.0 }
 0x110   : > { %v732_v5 = vadd.f32 %v731_v61, %v730_v1  ;;  %v833_v6 = vadd.f32 %v832_v2, %v831_v0  ;;  %v747_v42 = vsel %vm691_vm4, %v1363_v31, 0.0  ;;  %v848_v45 = vsel %vm691_vm4, %v790_v36, 0.0 }
 0x111   : > { %v850_v46 = vsel %vm691_vm4, %v791_v37, 0.0  ;;  %v792_v47 = vmul.f32 %v1377_v38, %v1377_v38  ;;  %v793_v52 = vmul.f32 %v1353_v24, %v1353_v24  ;;  %v749_v63 = vsel %vm691_vm4, %v1377_v38, 0.0 }
 0x112   : > { %v835_v10 = vadd.f32 %v834_v3, %v833_v6  ;;  %v734_v11 = vadd.f32 %v733_v9, %v732_v5  ;;  %v751_v53 = vsel %vm691_vm4, %v1353_v24, 0.0  ;;  %v794_v44 = vmul.f32 %v1367_v34, %v1367_v34 }
 0x113   : > { %v852_v54 = vsel %vm691_vm4, %v792_v47, 0.0  ;;  %v854_v59 = vsel %vm691_vm4, %v793_v52, 0.0  ;;  %v753_v61 = vsel %vm691_vm4, %v1367_v34, 0.0 }
 0x114   : > { %v736_v17 = vadd.f32 %v735_v12, %v734_v11  ;;  %v837_v18 = vadd.f32 %v836_v15, %v835_v10  ;;  %v856_v0 = vsel %vm691_vm4, %v794_v44, 0.0 }
 0x116   : > { %v839_v22 = vadd.f32 %v838_v30, %v837_v18  ;;  %v738_v14 = vadd.f32 %v737_v20, %v736_v17 }
 0x118   : > { %v740_v28 = vadd.f32 %v739_v21, %v738_v14  ;;  %v841_v29 = vadd.f32 %v840_v23, %v839_v22 }
 0x11a   : > { %v843_v33 = vadd.f32 %v842_v26, %v841_v29  ;;  %v742_v35 = vadd.f32 %v741_v25, %v740_v28 }
 0x11c   : > { %v744_v39 = vadd.f32 %v743_v55, %v742_v35  ;;  %v845_v40 = vadd.f32 %v844_v50, %v843_v33 }
 0x11e   : > { %v847_v43 = vadd.f32 %v846_v41, %v845_v40  ;;  %v746_v49 = vadd.f32 %v745_v4, %v744_v39 }
 0x120   : > { %v748_v48 = vadd.f32 %v747_v42, %v746_v49  ;;  %v849_v51 = vadd.f32 %v848_v45, %v847_v43 }
 0x122   : > { %v851_v31 = vadd.f32 %v850_v46, %v849_v51  ;;  %v750_v60 = vadd.f32 %v749_v63, %v748_v48 }
 0x124   : > { %v752_v57 = vadd.f32 %v751_v53, %v750_v60  ;;  %v853_v58 = vadd.f32 %v852_v54, %v851_v31 }
 0x126   : > { %v754_v38 = vadd.f32 %v753_v61, %v752_v57  ;;  %v855_v62 = vadd.f32 %v854_v59, %v853_v58 }
 0x128   : > { %v755_v1 = vrot.slane %v754_v38, 4  ;;  %v857_v2 = vadd.f32 %v856_v0, %v855_v62 }
 0x12a   : > { %v756_v24 = vadd.f32 %v755_v1, %v754_v38  ;;  %v858_v3 = vrot.slane %v857_v2, 4 }
 0x12c   : > { %v757_v56 = vrot.slane %v756_v24, 2  ;;  %v859_v19 = vadd.f32 %v858_v3, %v857_v2 }
 0x12e   : > { %v758_v5 = vadd.f32 %v757_v56, %v756_v24  ;;  %v860_v6 = vrot.slane %v859_v19, 2 }
 0x130   : > { %v759_v7 = vrot.slane %v758_v5, 1  ;;  %v861_v8 = vadd.f32 %v860_v6, %v859_v19 }
 0x132   : > { %v760_v34 = vadd.f32 %v759_v7, %v758_v5  ;;  %v862_v9 = vrot.slane %v861_v8, 1 }
 0x134   : > { %762 = vst.msk [vmem:[%s184_s29] sm:$0x1] %vm761_vm5, %v760_v34  ;;  %v863_v10 = vadd.f32 %v862_v9, %v861_v8 }
 0x136   : > { %864 = vst.msk [vmem:[%s184_s29 + $0x1] sm:$0x1] %vm761_vm5, %v863_v10 }
 0x137 PF: > { %s14_s12 = sadd.s32 1, %s1153_s12  }
 0x138   : > { %p11_p5 = scmp.ge.s32.totalorder %s14_s12, 4  }
 0x13a   :  { %13 = sbr.rel (!%p11_p5) target bundleno = 1 (0x1), region = 70 }

// kernel: resnet_forward.32
= control target key start
LH: loop header
LB: loop body
LE: loop exit
PB: predicated region body
PF: predicated region fallthrough
CT: control target
= control target key end

     0   :  { %s450_s15 = smov 0   ;;  %s481_s0 = inlined_call_operand.vmem [shape: bf16[64,128], index: 0, kind: input, shape index: {}]   ;;  %s482_s1 = inlined_call_operand.vmem [shape: f32[1,128], index: 1, kind: input, shape index: {}]   ;;  %s483_s2 = inlined_call_operand.vmem [shape: f32[1,128], index: 2, kind: input, shape index: {}]   ;;  %s484_s3 = inlined_call_operand.vmem [shape: bf16[64,128], index: 3, kind: input, shape index: {}]   ;;  %s485_s4 = inlined_call_operand.vmem [shape: bf16[64,128], index: 4, kind: output, shape index: {}]  }
   0x1 LB: > { %s357_s16 = sadd.s32 4294967295, %s423_s15   ;;  %p361_p0 = scmp.ge.s32.totalorder %s423_s15, 1  ;;  %s423_s15 = sphi %s450_s15, %s14_s15  }
   0x2   : > { %p174_p1 = scmp.lt.s32.totalorder %s423_s15, 3 }
   0x4   : > { %p175_p2 = pnand %p361_p0, %p174_p1 }
   0x5   : > { %s362_s17 = sshll.u32 (!%p175_p2), %s357_s16, 2  ;;  %v368_v0 = vld [vmem:[%s482_s1] ss:$0 sm:$0xff] (!%p175_p2) }
   0x6   : > { %178 = sbr.rel (%p175_p2) target bundleno = 30 (0x1e), region = 36  ;;  %p206_p3 = scmp.lt.s32.totalorder (!%p175_p2), %s362_s17, 7  ;;  %v369_v9 = vld [vmem:[%s483_s2] ss:$0 sm:$0xff] (!%p175_p2) }
   0xd   : > { %s487_s17 = smov (!%p206_p3, %s362_s17), 7 }
   0xe   : > { %s458_s18 = sshll.u32 %s487_s17, 2 }
   0xf   : > { %s209_s21 = scalar_lea.vmem %s481_s0, %s458_s18  ;;  %s215_s24 = scalar_lea.vmem %s484_s3, %s458_s18 }
  0x10   : > { %v381_v1 = vld [vmem:[%s209_s21] sm:$0xff]   ;;  %v406_v2 = vld [vmem:[%s209_s21 + $0x8] sm:$0xff]   ;;  %s221_s5 = scalar_lea.vmem %s485_s4, %s458_s18 }
  0x11   : > { %v389_v3 = vld [vmem:[%s215_s24] sm:$0xff]   ;;  %v382_v4 = vunpack.c.l.bf16 %v381_v1  ;;  %v383_v5 = vunpack.c.h.bf16 %v381_v1  ;;  %v386_v6 = vunpack.c.l.bf16 %v406_v2  ;;  %v387_v7 = vunpack.c.h.bf16 %v406_v2  ;;  %v407_v8 = vld [vmem:[%s215_s24 + $0x8] sm:$0xff]  }
  0x12   : > { %v390_v10 = vunpack.c.l.bf16 %v389_v3  ;;  %v391_v11 = vunpack.c.h.bf16 %v389_v3  ;;  %v394_v12 = vunpack.c.l.bf16 %v407_v8  ;;  %v395_v13 = vunpack.c.h.bf16 %v407_v8 }
  0x13   : > { %v238_v14 = vmul.f32 %v382_v4, %v368_v0  ;;  %v239_v15 = vmul.f32 %v383_v5, %v368_v0  ;;  %v240_v16 = vmul.f32 %v386_v6, %v368_v0  ;;  %v241_v17 = vmul.f32 %v387_v7, %v368_v0 }
  0x15   : > { %v249_v18 = vadd.f32 %v369_v9, %v238_v14  ;;  %v250_v19 = vadd.f32 %v369_v9, %v239_v15  ;;  %v251_v20 = vadd.f32 %v369_v9, %v240_v16  ;;  %v252_v21 = vadd.f32 %v369_v9, %v241_v17 }
  0x17   : > { %v261_v22 = vadd.f32 %v390_v10, %v249_v18  ;;  %v262_v23 = vadd.f32 %v391_v11, %v250_v19  ;;  %v263_v24 = vadd.f32 %v394_v12, %v251_v20  ;;  %v264_v25 = vadd.f32 %v395_v13, %v252_v21 }
  0x19   : > { %v265_v26 = vmax.f32 %v261_v22, 0.0  ;;  %v266_v27 = vmax.f32 %v262_v23, 0.0  ;;  %v267_v28 = vmax.f32 %v263_v24, 0.0  ;;  %v268_v29 = vmax.f32 %v264_v25, 0.0 }
  0x1b   : > { %v399_v30 = vpack.c.bf16 %v266_v27, %v265_v26  ;;  %v404_v31 = vpack.c.bf16 %v268_v29, %v267_v28 }
  0x1d   : > { %400 = vst [vmem:[%s221_s5] sm:$0xff] %v399_v30   ;;  %408 = vst [vmem:[%s221_s5 + $0x8] sm:$0xff] %v404_v31  }
  0x1e PF: > { %s14_s15 = sadd.s32 1, %s423_s15  }
  0x1f   : > { %p11_p4 = scmp.ge.s32.totalorder %s14_s15, 4  }
  0x21   :  { %13 = sbr.rel (!%p11_p4) target bundleno = 1 (0x1), region = 69 }

// kernel: resnet_forward.29
= control target key start
LH: loop header
LB: loop body
LE: loop exit
PB: predicated region body
PF: predicated region fallthrough
CT: control target
= control target key end

     0   :  { %s1316_s12 = smov 0   ;;  %s1664_s0 = inlined_call_operand.vmem [shape: bf16[512,144], index: 0, kind: input, shape index: {}]   ;;  %s1665_s1 = inlined_call_operand.vmem [shape: bf16[144,16], index: 1, kind: input, shape index: {}]   ;;  %s1666_s2 = inlined_call_operand.vmem [shape: bf16[512,16], index: 2, kind: output, shape index: {0}]   ;;  %s1667_s3 = inlined_call_operand.vmem [shape: f32[2,2,16], index: 3, kind: output, shape index: {1}]  }
   0x1 LB: > { %s1322_s13 = sadd.s32 4294967295, %s1293_s12   ;;  %p1072_p0 = scmp.ge.s32.totalorder %s1293_s12, 1  ;;  %s1293_s12 = sphi %s1316_s12, %s14_s12  }
   0x2   : > { %p142_p1 = scmp.lt.s32.totalorder %s1293_s12, 3 }
   0x4   : > { %p143_p2 = pnand %p1072_p0, %p142_p1 }
   0x5   : > { %v1230_v0 = vld [vmem:[%s1665_s1] sm:$0xff] (!%p143_p2)   ;;  %v1295_v1 = vmov (!%p143_p2), 0   ;;  %s1073_s16 = sshll.u32 (!%p143_p2), %s1322_s13, 5  ;;  %v1231_v2 = vld [vmem:[%s1665_s1 + $0x8] sm:$0xff] (!%p143_p2)   ;;  %v1232_v3 = vld [vmem:[%s1665_s1 + $0x10] sm:$0xff] (!%p143_p2)   ;;  %vm437_vm0 = vcmask (!%p143_p2), 130048  }
   0x6   : > { %146 = sbr.rel (%p143_p2) target bundleno = 362 (0x16a), region = 28  ;;  %486 = vmatprep.subr.bf16.mxu0 (!%p143_p2), %v1295_v1  ;;  %1203 = vmatprep.subr.bf16.mxu1 (!%p143_p2), %v1295_v1  ;;  %p172_p3 = scmp.lt.s32.totalorder (!%p143_p2), %s1073_s16, 63  ;;  %v1233_v4 = vld [vmem:[%s1665_s1 + $0x18] sm:$0xff] (!%p143_p2)   ;;  %v1234_v6 = vld [vmem:[%s1665_s1 + $0x20] sm:$0xff] (!%p143_p2)   ;;  %v1235_v8 = vld [vmem:[%s1665_s1 + $0x28] sm:$0xff] (!%p143_p2)   ;;  %vm775_vm1 = vcmask (!%p143_p2), 125952  }
   0x7   : > { %487 = vmatpush1.bf16.msra.mxu0 (!%p143_p2), %v1230_v0  ;;  %1212 = vmatpush1.bf16.msra.mxu1 (!%p143_p2), %v1230_v0  ;;  %v1236_v9 = vld [vmem:[%s1665_s1 + $0x30] sm:$0xff] (!%p143_p2)   ;;  %v1237_v10 = vld [vmem:[%s1665_s1 + $0x38] sm:$0xff] (!%p143_p2)   ;;  %v1238_v11 = vld [vmem:[%s1665_s1 + $0x40] sm:$0xff] (!%p143_p2)   ;;  %p184_p4 = scmp.lt.s32.totalorder (!%p143_p2), %s1322_s13, 1  ;;  %vm877_vm2 = vcmask (!%p143_p2), 122880  }
   0x8   : > { %488 = vmatprep.subr.bf16.mxu0 (!%p143_p2), %v1295_v1  ;;  %1204 = vmatprep.subr.bf16.mxu1 (!%p143_p2), %v1295_v1 }
   0xb   : > { %489 = vmatpush1.bf16.msra.mxu0 (!%p143_p2), %v1231_v2  ;;  %1213 = vmatpush1.bf16.msra.mxu1 (!%p143_p2), %v1231_v2 }
   0xc   : > { %490 = vmatprep.subr.bf16.mxu0 (!%p143_p2), %v1295_v1  ;;  %1205 = vmatprep.subr.bf16.mxu1 (!%p143_p2), %v1295_v1 }
   0xd   : > { %s1669_s16 = smov (!%p172_p3, %s1073_s16), 63  ;;  %s1671_s13 = smov (!%p184_p4, %s1322_s13), 1 }
   0xe   : > { %s1170_s21 = sshll.u32 %s1669_s16, 3  ;;  %s1077_s10 = sshll.u32 %s1669_s16, 2 }
   0xf   : > { %s1342_s24 = scalar_lea.vmem %s1664_s0, %s1170_s21  ;;  %491 = vmatpush1.bf16.msra.mxu0 %v1232_v3  ;;  %1214 = vmatpush1.bf16.msra.mxu1 %v1232_v3  ;;  %s1414_s15 = scalar_lea.vmem %s1666_s2, %s1077_s10 }
  0x10   : > { %v1241_v5 = vld [vmem:[%s1342_s24 + $0x4] ss:$8 sps:$4 sm:$0xff]   ;;  %492 = vmatprep.subr.bf16.mxu0 %v1295_v1  ;;  %1206 = vmatprep.subr.bf16.mxu1 %v1295_v1  ;;  %v1239_v12 = vld [vmem:[%s1342_s24] ss:$8 sps:$4 sm:$0xff]   ;;  %v1242_v14 = vld [vmem:[%s1342_s24 + $0x14] ss:$8 sps:$4 sm:$0xff]  }
  0x11   : > { %1120 = vmatprep.mubr.msk.bf16.mxu0 %vm437_vm0, %v1241_v5  ;;  %v1253_v7 = vld [vmem:[%s1342_s24 + $0x84] ss:$8 sps:$4 sm:$0xff]   ;;  %v1251_v13 = vld [vmem:[%s1342_s24 + $0x80] ss:$8 sps:$4 sm:$0xff]   ;;  %v1257_v15 = vld [vmem:[%s1342_s24 + $0x94] ss:$8 sps:$4 sm:$0xff]  }
  0x12   : > { %1128 = vmatprep.mubr.msk.bf16.mxu1 %vm437_vm0, %v1253_v7  ;;  %v1244_v16 = vld [vmem:[%s1342_s24 + $0x10] ss:$8 sps:$4 sm:$0xff]   ;;  %v1245_v18 = vld [vmem:[%s1342_s24 + $0x24] ss:$8 sps:$4 sm:$0xff]   ;;  %v1247_v20 = vld [vmem:[%s1342_s24 + $0x20] ss:$8 sps:$4 sm:$0xff]  }
  0x13   : > { %493 = vmatpush1.bf16.msra.mxu0 %v1233_v4  ;;  %1215 = vmatpush1.bf16.msra.mxu1 %v1233_v4  ;;  %v1259_v17 = vld [vmem:[%s1342_s24 + $0x90] ss:$8 sps:$4 sm:$0xff]   ;;  %v1263_v19 = vld [vmem:[%s1342_s24 + $0xa4] ss:$8 sps:$4 sm:$0xff]   ;;  %v1265_v21 = vld [vmem:[%s1342_s24 + $0xa0] ss:$8 sps:$4 sm:$0xff]  }
  0x14   : > { %494 = vmatprep.subr.bf16.mxu0 %v1295_v1  ;;  %1207 = vmatprep.subr.bf16.mxu1 %v1295_v1  ;;  %v1248_v22 = vld [vmem:[%s1342_s24 + $0x34] ss:$8 sps:$4 sm:$0xff]   ;;  %v1250_v24 = vld [vmem:[%s1342_s24 + $0x30] ss:$8 sps:$4 sm:$0xff]   ;;  %v1254_v26 = vld [vmem:[%s1342_s24 + $0x44] ss:$8 sps:$4 sm:$0xff]  }
  0x15   : > { %v1269_v23 = vld [vmem:[%s1342_s24 + $0xb4] ss:$8 sps:$4 sm:$0xff]   ;;  %v1271_v25 = vld [vmem:[%s1342_s24 + $0xb0] ss:$8 sps:$4 sm:$0xff]   ;;  %v1275_v27 = vld [vmem:[%s1342_s24 + $0xc4] ss:$8 sps:$4 sm:$0xff]  }
  0x16   : > { %v1256_v28 = vld [vmem:[%s1342_s24 + $0x40] ss:$8 sps:$4 sm:$0xff]   ;;  %v1260_v30 = vld [vmem:[%s1342_s24 + $0x54] ss:$8 sps:$4 sm:$0xff]   ;;  %v1262_v32 = vld [vmem:[%s1342_s24 + $0x50] ss:$8 sps:$4 sm:$0xff]  }
  0x17   : > { %495 = vmatpush1.bf16.msra.mxu0 %v1234_v6  ;;  %1216 = vmatpush1.bf16.msra.mxu1 %v1234_v6  ;;  %v1277_v29 = vld [vmem:[%s1342_s24 + $0xc0] ss:$8 sps:$4 sm:$0xff]   ;;  %v1278_v31 = vld [vmem:[%s1342_s24 + $0xd4] ss:$8 sps:$4 sm:$0xff]   ;;  %v1280_v33 = vld [vmem:[%s1342_s24 + $0xd0] ss:$8 sps:$4 sm:$0xff]  }
  0x18   : > { %496 = vmatprep.subr.bf16.mxu0 %v1295_v1  ;;  %1208 = vmatprep.subr.bf16.mxu1 %v1295_v1  ;;  %v1266_v34 = vld [vmem:[%s1342_s24 + $0x64] ss:$8 sps:$4 sm:$0xff]   ;;  %v1268_v36 = vld [vmem:[%s1342_s24 + $0x60] ss:$8 sps:$4 sm:$0xff]   ;;  %v1272_v38 = vld [vmem:[%s1342_s24 + $0x74] ss:$8 sps:$4 sm:$0xff]  }
  0x19   : > { %v1281_v35 = vld [vmem:[%s1342_s24 + $0xe4] ss:$8 sps:$4 sm:$0xff]   ;;  %v1283_v37 = vld [vmem:[%s1342_s24 + $0xe0] ss:$8 sps:$4 sm:$0xff]   ;;  %v1284_v39 = vld [vmem:[%s1342_s24 + $0xf4] ss:$8 sps:$4 sm:$0xff]  }
  0x1a   : > { %v1274_v40 = vld [vmem:[%s1342_s24 + $0x70] ss:$8 sps:$4 sm:$0xff]   ;;  %s1078_s16 = sshll.u32 %s1671_s13, 1 }
  0x1b   : > { %497 = vmatpush1.bf16.msra.mxu0 %v1235_v8  ;;  %1217 = vmatpush1.bf16.msra.mxu1 %v1235_v8  ;;  %v1286_v41 = vld [vmem:[%s1342_s24 + $0xf0] ss:$8 sps:$4 sm:$0xff]   ;;  %s187_s19 = scalar_lea.vmem %s1667_s3, %s1078_s16 }
  0x1c   : > { %498 = vmatprep.subr.bf16.mxu0 %v1295_v1  ;;  %1209 = vmatprep.subr.bf16.mxu1 %v1295_v1 }
  0x1f   : > { %499 = vmatpush1.bf16.msra.mxu0 %v1236_v9  ;;  %1218 = vmatpush1.bf16.msra.mxu1 %v1236_v9 }
  0x20   : > { %500 = vmatprep.subr.bf16.mxu0 %v1295_v1  ;;  %1210 = vmatprep.subr.bf16.mxu1 %v1295_v1 }
  0x23   : > { %501 = vmatpush1.bf16.msra.mxu0 %v1237_v10  ;;  %1219 = vmatpush1.bf16.msra.mxu1 %v1237_v10 }
  0x24   : > { %502 = vmatprep.subr.bf16.mxu0 %v1295_v1  ;;  %1211 = vmatprep.subr.bf16.mxu1 %v1295_v1 }
  0x27   : > { %503 = vmatpush1.bf16.msra.mxu0 %v1238_v11  ;;  %1220 = vmatpush1.bf16.msra.mxu1 %v1238_v11 }
  0x2a   : > { %519 = vmatmul.mubr.bf16.vlgmr.msra.gmra.mrb[0].mxu0 %v1239_v12  ;;  %583 = vmatmul.mubr.bf16.vlgmr.msra.gmra.mrb[0].mxu1 %v1251_v13 }
  0x2b   : > { %1121 = vmatprep.mubr.msk.bf16.mxu0 %vm437_vm0, %v1242_v14  ;;  %1129 = vmatprep.mubr.msk.bf16.mxu1 %vm437_vm0, %v1257_v15 }
  0x32   : > { %527 = vmatmul.mubr.bf16.gmra.mrb[4].mxu0 %v1244_v16  ;;  %591 = vmatmul.mubr.bf16.gmra.mrb[4].mxu1 %v1259_v17 }
  0x33   : > { %1122 = vmatprep.mubr.msk.bf16.mxu0 %vm437_vm0, %v1245_v18  ;;  %1130 = vmatprep.mubr.msk.bf16.mxu1 %vm437_vm0, %v1263_v19 }
  0x3a   : > { %535 = vmatmul.mubr.bf16.gmra.mrb[8].mxu0 %v1247_v20  ;;  %599 = vmatmul.mubr.bf16.gmra.mrb[8].mxu1 %v1265_v21 }
  0x3b   : > { %1123 = vmatprep.mubr.msk.bf16.mxu0 %vm437_vm0, %v1248_v22  ;;  %1131 = vmatprep.mubr.msk.bf16.mxu1 %vm437_vm0, %v1269_v23 }
  0x42   : > { %543 = vmatmul.mubr.bf16.gmra.mrb[12].mxu0 %v1250_v24  ;;  %607 = vmatmul.mubr.bf16.gmra.mrb[12].mxu1 %v1271_v25 }
  0x43   : > { %1124 = vmatprep.mubr.msk.bf16.mxu0 %vm437_vm0, %v1254_v26  ;;  %1132 = vmatprep.mubr.msk.bf16.mxu1 %vm437_vm0, %v1275_v27 }
  0x4a   : > { %551 = vmatmul.mubr.bf16.gmra.mrb[16].mxu0 %v1256_v28  ;;  %615 = vmatmul.mubr.bf16.gmra.mrb[16].mxu1 %v1277_v29 }
  0x4b   : > { %1125 = vmatprep.mubr.msk.bf16.mxu0 %vm437_vm0, %v1260_v30  ;;  %1133 = vmatprep.mubr.msk.bf16.mxu1 %vm437_vm0, %v1278_v31 }
  0x52   : > { %559 = vmatmul.mubr.bf16.gmra.mrb[20].mxu0 %v1262_v32  ;;  %623 = vmatmul.mubr.bf16.gmra.mrb[20].mxu1 %v1280_v33 }
  0x53   : > { %1126 = vmatprep.mubr.msk.bf16.mxu0 %vm437_vm0, %v1266_v34  ;;  %1134 = vmatprep.mubr.msk.bf16.mxu1 %vm437_vm0, %v1281_v35 }
  0x5a   : > { %567 = vmatmul.mubr.bf16.gmra.mrb[24].mxu0 %v1268_v36  ;;  %631 = vmatmul.mubr.bf16.gmra.mrb[24].mxu1 %v1283_v37 }
  0x5b   : > { %1127 = vmatprep.mubr.msk.bf16.mxu0 %vm437_vm0, %v1272_v38  ;;  %1135 = vmatprep.mubr.msk.bf16.mxu1 %vm437_vm0, %v1284_v39 }
  0x62   : > { %575 = vmatmul.mubr.bf16.gmra.mrb[28].mxu0 %v1274_v40  ;;  %639 = vmatmul.mubr.bf16.gmra.mrb[28].mxu1 %v1286_v41 }
  0xfd   : > { %v520_v42 = vpop.f32.mrb[0].mxu0  ;;  %v1416_v43 = vpop.f32.mrb[0].mxu1 }
  0xfe   : > { %v1171_v44 = vpack.c.bf16 %v520_v42, %v520_v42  ;;  %v879_v45 = vmul.f32 %v520_v42, %v520_v42  ;;  %v522_v46 = vpop.f32.mrb[1].mxu0  ;;  %v1187_v47 = vpack.c.bf16 %v1416_v43, %v1416_v43  ;;  %v586_v48 = vpop.f32.mrb[1].mxu1  ;;  %v808_v51 = vsel %vm437_vm0, %v520_v42, 0.0 }
  0xff   : > { %v523_v49 = vpop.f32.mrb[2].mxu0  ;;  %v1420_v50 = vpop.f32.mrb[2].mxu1 }
 0x100   : > { %776 = vst.msk [vmem:[%s1414_s15] sm:$0xf] %vm775_vm1, %v1171_v44  ;;  %v1172_v52 = vpack.c.bf16 %v523_v49, %v523_v49  ;;  %v809_v53 = vsel %vm437_vm0, %v523_v49, 0.0  ;;  %v880_v54 = vmul.f32 %v523_v49, %v523_v49  ;;  %v525_v55 = vpop.f32.mrb[3].mxu0  ;;  %792 = vst.msk [vmem:[%s1414_s15 + $0x40] sm:$0xf] %vm775_vm1, %v1187_v47  ;;  %v1188_v58 = vpack.c.bf16 %v1420_v50, %v1420_v50 }
 0x101   : > { %v589_v56 = vpop.f32.mrb[3].mxu1  ;;  %v810_v57 = vadd.f32 %v809_v53, %v808_v51  ;;  %v911_v59 = vsel %vm437_vm0, %v879_v45, 0.0 }
 0x102   : > { %777 = vst.msk [vmem:[%s1414_s15 + $0x4] sm:$0xf] %vm775_vm1, %v1172_v52  ;;  %v912_v60 = vsel %vm437_vm0, %v880_v54, 0.0  ;;  %793 = vst.msk [vmem:[%s1414_s15 + $0x44] sm:$0xf] %vm775_vm1, %v1188_v58 }
 0x103   : > { %v913_v61 = vadd.f32 %v912_v60, %v911_v59 }
 0x105   : > { %v528_v62 = vpop.f32.mrb[4].mxu0  ;;  %v1436_v63 = vpop.f32.mrb[4].mxu1 }
 0x106   : > { %v1173_v0 = vpack.c.bf16 %v528_v62, %v528_v62  ;;  %v811_v1 = vsel %vm437_vm0, %v528_v62, 0.0  ;;  %v881_v2 = vmul.f32 %v528_v62, %v528_v62  ;;  %v530_v3 = vpop.f32.mrb[5].mxu0  ;;  %v1189_v4 = vpack.c.bf16 %v1436_v63, %v1436_v63  ;;  %v594_v5 = vpop.f32.mrb[5].mxu1 }
 0x107   : > { %v812_v6 = vadd.f32 %v811_v1, %v810_v57  ;;  %v531_v7 = vpop.f32.mrb[6].mxu0  ;;  %v1441_v8 = vpop.f32.mrb[6].mxu1 }
 0x108   : > { %778 = vst.msk [vmem:[%s1414_s15 + $0x8] sm:$0xf] %vm775_vm1, %v1173_v0  ;;  %v914_v9 = vsel %vm437_vm0, %v881_v2, 0.0  ;;  %v1174_v10 = vpack.c.bf16 %v531_v7, %v531_v7  ;;  %v813_v11 = vsel %vm437_vm0, %v531_v7, 0.0  ;;  %v882_v12 = vmul.f32 %v531_v7, %v531_v7  ;;  %v533_v13 = vpop.f32.mrb[7].mxu0  ;;  %v597_v14 = vpop.f32.mrb[7].mxu1 }
 0x109   : > { %794 = vst.msk [vmem:[%s1414_s15 + $0x48] sm:$0xf] %vm775_vm1, %v1189_v4  ;;  %v915_v15 = vadd.f32 %v914_v9, %v913_v61  ;;  %v814_v16 = vadd.f32 %v813_v11, %v812_v6  ;;  %v1190_v17 = vpack.c.bf16 %v1441_v8, %v1441_v8 }
 0x10a   : > { %779 = vst.msk [vmem:[%s1414_s15 + $0xc] sm:$0xf] %vm775_vm1, %v1174_v10  ;;  %v916_v18 = vsel %vm437_vm0, %v882_v12, 0.0 }
 0x10b   : > { %v917_v19 = vadd.f32 %v916_v18, %v915_v15  ;;  %795 = vst.msk [vmem:[%s1414_s15 + $0x4c] sm:$0xf] %vm775_vm1, %v1190_v17 }
 0x10d   : > { %v536_v20 = vpop.f32.mrb[8].mxu0  ;;  %v1456_v21 = vpop.f32.mrb[8].mxu1 }
 0x10e   : > { %v1175_v22 = vpack.c.bf16 %v536_v20, %v536_v20  ;;  %v815_v23 = vsel %vm437_vm0, %v536_v20, 0.0  ;;  %v883_v24 = vmul.f32 %v536_v20, %v536_v20  ;;  %v538_v25 = vpop.f32.mrb[9].mxu0  ;;  %v1191_v26 = vpack.c.bf16 %v1456_v21, %v1456_v21  ;;  %v602_v27 = vpop.f32.mrb[9].mxu1 }
 0x10f   : > { %v816_v28 = vadd.f32 %v815_v23, %v814_v16  ;;  %v539_v29 = vpop.f32.mrb[10].mxu0  ;;  %v1461_v30 = vpop.f32.mrb[10].mxu1 }
 0x110   : > { %780 = vst.msk [vmem:[%s1414_s15 + $0x10] sm:$0xf] %vm775_vm1, %v1175_v22  ;;  %v918_v31 = vsel %vm437_vm0, %v883_v24, 0.0  ;;  %v1176_v32 = vpack.c.bf16 %v539_v29, %v539_v29  ;;  %v817_v33 = vsel %vm437_vm0, %v539_v29, 0.0  ;;  %v884_v34 = vmul.f32 %v539_v29, %v539_v29  ;;  %v541_v35 = vpop.f32.mrb[11].mxu0  ;;  %v605_v36 = vpop.f32.mrb[11].mxu1 }
 0x111   : > { %796 = vst.msk [vmem:[%s1414_s15 + $0x50] sm:$0xf] %vm775_vm1, %v1191_v26  ;;  %v919_v37 = vadd.f32 %v918_v31, %v917_v19  ;;  %v818_v38 = vadd.f32 %v817_v33, %v816_v28  ;;  %v1192_v39 = vpack.c.bf16 %v1461_v30, %v1461_v30 }
 0x112   : > { %781 = vst.msk [vmem:[%s1414_s15 + $0x14] sm:$0xf] %vm775_vm1, %v1176_v32  ;;  %v920_v40 = vsel %vm437_vm0, %v884_v34, 0.0 }
 0x113   : > { %v921_v41 = vadd.f32 %v920_v40, %v919_v37  ;;  %797 = vst.msk [vmem:[%s1414_s15 + $0x54] sm:$0xf] %vm775_vm1, %v1192_v39 }
 0x115   : > { %v544_v42 = vpop.f32.mrb[12].mxu0  ;;  %v1476_v44 = vpop.f32.mrb[12].mxu1 }
 0x116   : > { %v1177_v45 = vpack.c.bf16 %v544_v42, %v544_v42  ;;  %v819_v46 = vsel %vm437_vm0, %v544_v42, 0.0  ;;  %v885_v47 = vmul.f32 %v544_v42, %v544_v42  ;;  %v546_v48 = vpop.f32.mrb[13].mxu0  ;;  %v1193_v49 = vpack.c.bf16 %v1476_v44, %v1476_v44  ;;  %v610_v51 = vpop.f32.mrb[13].mxu1 }
 0x117   : > { %v820_v52 = vadd.f32 %v819_v46, %v818_v38  ;;  %v547_v53 = vpop.f32.mrb[14].mxu0  ;;  %v1481_v54 = vpop.f32.mrb[14].mxu1 }
 0x118   : > { %782 = vst.msk [vmem:[%s1414_s15 + $0x18] sm:$0xf] %vm775_vm1, %v1177_v45  ;;  %v922_v55 = vsel %vm437_vm0, %v885_v47, 0.0  ;;  %v1178_v56 = vpack.c.bf16 %v547_v53, %v547_v53  ;;  %v821_v57 = vsel %vm437_vm0, %v547_v53, 0.0  ;;  %v886_v58 = vmul.f32 %v547_v53, %v547_v53  ;;  %v549_v59 = vpop.f32.mrb[15].mxu0  ;;  %v613_v60 = vpop.f32.mrb[15].mxu1 }
 0x119   : > { %798 = vst.msk [vmem:[%s1414_s15 + $0x58] sm:$0xf] %vm775_vm1, %v1193_v49  ;;  %v923_v61 = vadd.f32 %v922_v55, %v921_v41  ;;  %v822_v62 = vadd.f32 %v821_v57, %v820_v52  ;;  %v1194_v0 = vpack.c.bf16 %v1481_v54, %v1481_v54 }
 0x11a   : > { %783 = vst.msk [vmem:[%s1414_s15 + $0x1c] sm:$0xf] %vm775_vm1, %v1178_v56  ;;  %v924_v1 = vsel %vm437_vm0, %v886_v58, 0.0 }
 0x11b   : > { %v925_v2 = vadd.f32 %v924_v1, %v923_v61  ;;  %799 = vst.msk [vmem:[%s1414_s15 + $0x5c] sm:$0xf] %vm775_vm1, %v1194_v0 }
 0x11d   : > { %v552_v3 = vpop.f32.mrb[16].mxu0  ;;  %v1496_v4 = vpop.f32.mrb[16].mxu1 }
 0x11e   : > { %v1179_v5 = vpack.c.bf16 %v552_v3, %v552_v3  ;;  %v823_v6 = vsel %vm437_vm0, %v552_v3, 0.0  ;;  %v887_v7 = vmul.f32 %v552_v3, %v552_v3  ;;  %v554_v9 = vpop.f32.mrb[17].mxu0  ;;  %v1195_v10 = vpack.c.bf16 %v1496_v4, %v1496_v4  ;;  %v618_v11 = vpop.f32.mrb[17].mxu1 }
 0x11f   : > { %v824_v12 = vadd.f32 %v823_v6, %v822_v62  ;;  %v555_v13 = vpop.f32.mrb[18].mxu0  ;;  %v1501_v14 = vpop.f32.mrb[18].mxu1 }
 0x120   : > { %784 = vst.msk [vmem:[%s1414_s15 + $0x20] sm:$0xf] %vm775_vm1, %v1179_v5  ;;  %v926_v15 = vsel %vm437_vm0, %v887_v7, 0.0  ;;  %v1180_v16 = vpack.c.bf16 %v555_v13, %v555_v13  ;;  %v825_v17 = vsel %vm437_vm0, %v555_v13, 0.0  ;;  %v888_v18 = vmul.f32 %v555_v13, %v555_v13  ;;  %v557_v19 = vpop.f32.mrb[19].mxu0  ;;  %v621_v20 = vpop.f32.mrb[19].mxu1 }
 0x121   : > { %800 = vst.msk [vmem:[%s1414_s15 + $0x60] sm:$0xf] %vm775_vm1, %v1195_v10  ;;  %v927_v22 = vadd.f32 %v926_v15, %v925_v2  ;;  %v826_v23 = vadd.f32 %v825_v17, %v824_v12  ;;  %v1196_v24 = vpack.c.bf16 %v1501_v14, %v1501_v14 }
 0x122   : > { %785 = vst.msk [vmem:[%s1414_s15 + $0x24] sm:$0xf] %vm775_vm1, %v1180_v16  ;;  %v928_v25 = vsel %vm437_vm0, %v888_v18, 0.0 }
 0x123   : > { %v929_v26 = vadd.f32 %v928_v25, %v927_v22  ;;  %801 = vst.msk [vmem:[%s1414_s15 + $0x64] sm:$0xf] %vm775_vm1, %v1196_v24  ;;  %v895_v25 = vmul.f32 %v1416_v43, %v1416_v43 }
 0x125   : > { %v560_v27 = vpop.f32.mrb[20].mxu0  ;;  %v1516_v28 = vpop.f32.mrb[20].mxu1 }
 0x126   : > { %v1181_v29 = vpack.c.bf16 %v560_v27, %v560_v27  ;;  %v827_v31 = vsel %vm437_vm0, %v560_v27, 0.0  ;;  %v889_v32 = vmul.f32 %v560_v27, %v560_v27  ;;  %v562_v33 = vpop.f32.mrb[21].mxu0  ;;  %v1197_v34 = vpack.c.bf16 %v1516_v28, %v1516_v28  ;;  %v626_v35 = vpop.f32.mrb[21].mxu1 }
 0x127   : > { %v828_v36 = vadd.f32 %v827_v31, %v826_v23  ;;  %v563_v37 = vpop.f32.mrb[22].mxu0  ;;  %v1521_v38 = vpop.f32.mrb[22].mxu1 }
 0x128   : > { %786 = vst.msk [vmem:[%s1414_s15 + $0x28] sm:$0xf] %vm775_vm1, %v1181_v29  ;;  %v930_v39 = vsel %vm437_vm0, %v889_v32, 0.0  ;;  %v1182_v40 = vpack.c.bf16 %v563_v37, %v563_v37  ;;  %v829_v41 = vsel %vm437_vm0, %v563_v37, 0.0  ;;  %v890_v42 = vmul.f32 %v563_v37, %v563_v37  ;;  %v565_v45 = vpop.f32.mrb[23].mxu0  ;;  %v629_v46 = vpop.f32.mrb[23].mxu1 }
 0x129   : > { %802 = vst.msk [vmem:[%s1414_s15 + $0x68] sm:$0xf] %vm775_vm1, %v1197_v34  ;;  %v931_v47 = vadd.f32 %v930_v39, %v929_v26  ;;  %v830_v48 = vadd.f32 %v829_v41, %v828_v36  ;;  %v1198_v49 = vpack.c.bf16 %v1521_v38, %v1521_v38  ;;  %v839_v41 = vsel %vm437_vm0, %v1416_v43, 0.0 }
 0x12a   : > { %787 = vst.msk [vmem:[%s1414_s15 + $0x2c] sm:$0xf] %vm775_vm1, %v1182_v40  ;;  %v932_v51 = vsel %vm437_vm0, %v890_v42, 0.0  ;;  %v896_v42 = vmul.f32 %v1420_v50, %v1420_v50 }
 0x12b   : > { %v933_v52 = vadd.f32 %v932_v51, %v931_v47  ;;  %803 = vst.msk [vmem:[%s1414_s15 + $0x6c] sm:$0xf] %vm775_vm1, %v1198_v49  ;;  %v841_v49 = vsel %vm437_vm0, %v1420_v50, 0.0  ;;  %v897_v51 = vmul.f32 %v1436_v63, %v1436_v63  ;;  %v845_v50 = vsel %vm437_vm0, %v1441_v8, 0.0 }
 0x12d   : > { %v568_v53 = vpop.f32.mrb[24].mxu0  ;;  %v1536_v55 = vpop.f32.mrb[24].mxu1 }
 0x12e   : > { %v1183_v56 = vpack.c.bf16 %v568_v53, %v568_v53  ;;  %v831_v57 = vsel %vm437_vm0, %v568_v53, 0.0  ;;  %v891_v58 = vmul.f32 %v568_v53, %v568_v53  ;;  %v570_v59 = vpop.f32.mrb[25].mxu0  ;;  %v1199_v60 = vpack.c.bf16 %v1536_v55, %v1536_v55  ;;  %v634_v61 = vpop.f32.mrb[25].mxu1 }
 0x12f   : > { %v832_v62 = vadd.f32 %v831_v57, %v830_v48  ;;  %v571_v0 = vpop.f32.mrb[26].mxu0  ;;  %v1541_v1 = vpop.f32.mrb[26].mxu1  ;;  %v942_v48 = vsel %vm437_vm0, %v895_v25, 0.0  ;;  %v944_v53 = vsel %vm437_vm0, %v896_v42, 0.0  ;;  %v898_v57 = vmul.f32 %v1441_v8, %v1441_v8 }
 0x130   : > { %788 = vst.msk [vmem:[%s1414_s15 + $0x30] sm:$0xf] %vm775_vm1, %v1183_v56  ;;  %v934_v2 = vsel %vm437_vm0, %v891_v58, 0.0  ;;  %v1184_v3 = vpack.c.bf16 %v571_v0, %v571_v0  ;;  %v833_v5 = vsel %vm437_vm0, %v571_v0, 0.0  ;;  %v892_v6 = vmul.f32 %v571_v0, %v571_v0  ;;  %v573_v7 = vpop.f32.mrb[27].mxu0  ;;  %v637_v9 = vpop.f32.mrb[27].mxu1 }
 0x131   : > { %804 = vst.msk [vmem:[%s1414_s15 + $0x70] sm:$0xf] %vm775_vm1, %v1199_v60  ;;  %v935_v10 = vadd.f32 %v934_v2, %v933_v52  ;;  %v834_v11 = vadd.f32 %v833_v5, %v832_v62  ;;  %v1200_v12 = vpack.c.bf16 %v1541_v1, %v1541_v1  ;;  %v843_v56 = vsel %vm437_vm0, %v1436_v63, 0.0 }
 0x132   : > { %789 = vst.msk [vmem:[%s1414_s15 + $0x34] sm:$0xf] %vm775_vm1, %v1184_v3  ;;  %v936_v13 = vsel %vm437_vm0, %v892_v6, 0.0  ;;  %v946_v60 = vsel %vm437_vm0, %v897_v51, 0.0  ;;  %v899_v61 = vmul.f32 %v1456_v21, %v1456_v21  ;;  %v948_v2 = vsel %vm437_vm0, %v898_v57, 0.0 }
 0x133   : > { %v937_v15 = vadd.f32 %v936_v13, %v935_v10  ;;  %805 = vst.msk [vmem:[%s1414_s15 + $0x74] sm:$0xf] %vm775_vm1, %v1200_v12  ;;  %v847_v63 = vsel %vm437_vm0, %v1456_v21, 0.0  ;;  %v900_v3 = vmul.f32 %v1461_v30, %v1461_v30  ;;  %v849_v8 = vsel %vm437_vm0, %v1461_v30, 0.0 }
 0x134   : > { %v950_v7 = vsel %vm437_vm0, %v899_v61, 0.0  ;;  %v901_v9 = vmul.f32 %v1476_v44, %v1476_v44  ;;  %v851_v21 = vsel %vm437_vm0, %v1476_v44, 0.0  ;;  %v902_v13 = vmul.f32 %v1481_v54, %v1481_v54 }
 0x135   : > { %v576_v16 = vpop.f32.mrb[28].mxu0  ;;  %v1556_v17 = vpop.f32.mrb[28].mxu1  ;;  %v952_v12 = vsel %vm437_vm0, %v900_v3, 0.0  ;;  %v853_v30 = vsel %vm437_vm0, %v1481_v54, 0.0  ;;  %v855_v44 = vsel %vm437_vm0, %v1496_v4, 0.0  ;;  %v857_v54 = vsel %vm437_vm0, %v1501_v14, 0.0 }
 0x136   : > { %v1185_v18 = vpack.c.bf16 %v576_v16, %v576_v16  ;;  %v835_v19 = vsel %vm437_vm0, %v576_v16, 0.0  ;;  %v893_v20 = vmul.f32 %v576_v16, %v576_v16  ;;  %v578_v22 = vpop.f32.mrb[29].mxu0  ;;  %v1201_v23 = vpack.c.bf16 %v1556_v17, %v1556_v17  ;;  %v642_v24 = vpop.f32.mrb[29].mxu1 }
 0x137   : > { %v836_v26 = vadd.f32 %v835_v19, %v834_v11  ;;  %v579_v27 = vpop.f32.mrb[30].mxu0  ;;  %v1563_v29 = vpop.f32.mrb[30].mxu1  ;;  %v903_v19 = vmul.f32 %v1496_v4, %v1496_v4  ;;  %v904_v24 = vmul.f32 %v1501_v14, %v1501_v14  ;;  %v859_v4 = vsel %vm437_vm0, %v1516_v28, 0.0 }
 0x138   : > { %790 = vst.msk [vmem:[%s1414_s15 + $0x38] sm:$0xf] %vm775_vm1, %v1185_v18  ;;  %v938_v31 = vsel %vm437_vm0, %v893_v20, 0.0  ;;  %v1186_v32 = vpack.c.bf16 %v579_v27, %v579_v27  ;;  %v837_v33 = vsel %vm437_vm0, %v579_v27, 0.0  ;;  %v894_v34 = vmul.f32 %v579_v27, %v579_v27  ;;  %v581_v35 = vpop.f32.mrb[31].mxu0  ;;  %v645_v36 = vpop.f32.mrb[31].mxu1 }
 0x139   : > { %806 = vst.msk [vmem:[%s1414_s15 + $0x78] sm:$0xf] %vm775_vm1, %v1201_v23  ;;  %v939_v37 = vadd.f32 %v938_v31, %v937_v15  ;;  %v838_v39 = vadd.f32 %v837_v33, %v836_v26  ;;  %v1202_v40 = vpack.c.bf16 %v1563_v29, %v1563_v29  ;;  %v954_v18 = vsel %vm437_vm0, %v901_v9, 0.0 }
 0x13a   : > { %791 = vst.msk [vmem:[%s1414_s15 + $0x3c] sm:$0xf] %vm775_vm1, %v1186_v32  ;;  %v940_v45 = vsel %vm437_vm0, %v894_v34, 0.0  ;;  %v956_v23 = vsel %vm437_vm0, %v902_v13, 0.0  ;;  %v958_v27 = vsel %vm437_vm0, %v903_v19, 0.0  ;;  %v905_v31 = vmul.f32 %v1516_v28, %v1516_v28 }
 0x13b   : > { %v840_v46 = vadd.f32 %v839_v41, %v838_v39  ;;  %v941_v47 = vadd.f32 %v940_v45, %v939_v37  ;;  %807 = vst.msk [vmem:[%s1414_s15 + $0x7c] sm:$0xf] %vm775_vm1, %v1202_v40  ;;  %v960_v34 = vsel %vm437_vm0, %v904_v24, 0.0  ;;  %v906_v35 = vmul.f32 %v1521_v38, %v1521_v38 }
 0x13c   : > { %v962_v39 = vsel %vm437_vm0, %v905_v31, 0.0  ;;  %v861_v14 = vsel %vm437_vm0, %v1521_v38, 0.0  ;;  %v907_v40 = vmul.f32 %v1536_v55, %v1536_v55  ;;  %v863_v28 = vsel %vm437_vm0, %v1536_v55, 0.0 }
 0x13d   : > { %v842_v43 = vadd.f32 %v841_v49, %v840_v46  ;;  %v943_v52 = vadd.f32 %v942_v48, %v941_v47  ;;  %v964_v45 = vsel %vm437_vm0, %v906_v35, 0.0  ;;  %v908_v46 = vmul.f32 %v1541_v1, %v1541_v1 }
 0x13e   : > { %v909_v47 = vmul.f32 %v1556_v17, %v1556_v17  ;;  %v966_v38 = vsel %vm437_vm0, %v907_v40, 0.0  ;;  %v865_v51 = vsel %vm437_vm0, %v1541_v1, 0.0  ;;  %v910_v57 = vmul.f32 %v1563_v29, %v1563_v29 }
 0x13f   : > { %v844_v58 = vadd.f32 %v843_v56, %v842_v43  ;;  %v945_v59 = vadd.f32 %v944_v53, %v943_v52  ;;  %v867_v43 = vsel %vm437_vm0, %v1556_v17, 0.0  ;;  %v968_v53 = vsel %vm437_vm0, %v908_v46, 0.0 }
 0x140   : > { %v970_v56 = vsel %vm437_vm0, %v909_v47, 0.0  ;;  %v972_v61 = vsel %vm437_vm0, %v910_v57, 0.0 }
 0x141   : > { %v846_v62 = vadd.f32 %v845_v50, %v844_v58  ;;  %v947_v0 = vadd.f32 %v946_v60, %v945_v59  ;;  %v869_v60 = vsel %vm437_vm0, %v1563_v29, 0.0 }
 0x143   : > { %v949_v5 = vadd.f32 %v948_v2, %v947_v0  ;;  %v848_v6 = vadd.f32 %v847_v63, %v846_v62 }
 0x145   : > { %v850_v10 = vadd.f32 %v849_v8, %v848_v6  ;;  %v951_v11 = vadd.f32 %v950_v7, %v949_v5 }
 0x147   : > { %v852_v15 = vadd.f32 %v851_v21, %v850_v10  ;;  %v953_v16 = vadd.f32 %v952_v12, %v951_v11 }
 0x149   : > { %v854_v20 = vadd.f32 %v853_v30, %v852_v15  ;;  %v955_v22 = vadd.f32 %v954_v18, %v953_v16 }
 0x14b   : > { %v856_v25 = vadd.f32 %v855_v44, %v854_v20  ;;  %v957_v26 = vadd.f32 %v956_v23, %v955_v22 }
 0x14d   : > { %v959_v32 = vadd.f32 %v958_v27, %v957_v26  ;;  %v858_v33 = vadd.f32 %v857_v54, %v856_v25 }
 0x14f   : > { %v961_v36 = vadd.f32 %v960_v34, %v959_v32  ;;  %v860_v37 = vadd.f32 %v859_v4, %v858_v33 }
 0x151   : > { %v963_v41 = vadd.f32 %v962_v39, %v961_v36  ;;  %v862_v42 = vadd.f32 %v861_v14, %v860_v37 }
 0x153   : > { %v965_v48 = vadd.f32 %v964_v45, %v963_v41  ;;  %v864_v49 = vadd.f32 %v863_v28, %v862_v42 }
 0x155   : > { %v967_v52 = vadd.f32 %v966_v38, %v965_v48  ;;  %v866_v55 = vadd.f32 %v865_v51, %v864_v49 }
 0x157   : > { %v969_v58 = vadd.f32 %v968_v53, %v967_v52  ;;  %v868_v59 = vadd.f32 %v867_v43, %v866_v55 }
 0x159   : > { %v971_v50 = vadd.f32 %v970_v56, %v969_v58  ;;  %v870_v1 = vadd.f32 %v869_v60, %v868_v59 }
 0x15b   : > { %v871_v17 = vrot.slane %v870_v1, 4  ;;  %v973_v62 = vadd.f32 %v972_v61, %v971_v50 }
 0x15d   : > { %v872_v0 = vadd.f32 %v871_v17, %v870_v1  ;;  %v974_v2 = vrot.slane %v973_v62, 4 }
 0x15f   : > { %v873_v63 = vrot.slane %v872_v0, 2  ;;  %v975_v3 = vadd.f32 %v974_v2, %v973_v62 }
 0x161   : > { %v874_v5 = vadd.f32 %v873_v63, %v872_v0  ;;  %v976_v6 = vrot.slane %v975_v3, 2 }
 0x163   : > { %v875_v7 = vrot.slane %v874_v5, 1  ;;  %v977_v8 = vadd.f32 %v976_v6, %v975_v3 }
 0x165   : > { %v876_v29 = vadd.f32 %v875_v7, %v874_v5  ;;  %v978_v9 = vrot.slane %v977_v8, 1 }
 0x167   : > { %878 = vst.msk [vmem:[%s187_s19] sm:$0x1] %vm877_vm2, %v876_v29  ;;  %v979_v10 = vadd.f32 %v978_v9, %v977_v8 }
 0x169   : > { %980 = vst.msk [vmem:[%s187_s19 + $0x1] sm:$0x1] %vm877_vm2, %v979_v10 }
 0x16a PF: > { %s14_s12 = sadd.s32 1, %s1293_s12  }
 0x16b   : > { %p11_p5 = scmp.ge.s32.totalorder %s14_s12, 4  }
 0x16d   :  { %13 = sbr.rel (!%p11_p5) target bundleno = 1 (0x1), region = 70 }

// kernel: mul.73
= control target key start
LH: loop header
LB: loop body
LE: loop exit
PB: predicated region body
PF: predicated region fallthrough
CT: control target
= control target key end

     0   :  { %s34_s0 = inlined_call_operand.vmem [shape: f32[32], index: 0, kind: input, shape index: {}]   ;;  %s35_s1 = inlined_call_operand.vmem [shape: f32[32], index: 1, kind: input, shape index: {}]   ;;  %s36_s2 = inlined_call_operand.vmem [shape: f32[32], index: 2, kind: output, shape index: {}]  }
   0x1   :  { %v3_v0 = vld [vmem:[%s34_s0] sm:$0x1] }
   0x2   :  { %v4_v1 = vld [vmem:[%s35_s1] sm:$0x1] }
   0x3   :  { %v7_v2 = vmul.f32 %v4_v1, %v3_v0 }
   0x5   :  { %9 = vst [vmem:[%s36_s2] sm:$0x1] %v7_v2 }

// kernel: tile.183
= control target key start
LH: loop header
LB: loop body
LE: loop exit
PB: predicated region body
PF: predicated region fallthrough
CT: control target
= control target key end

     0   :  { %s22_s0 = inlined_call_operand.vmem [shape: f32[32], index: 0, kind: input, shape index: {}]   ;;  %s23_s1 = inlined_call_operand.vmem [shape: f32[4,32], index: 1, kind: output, shape index: {}]  }
   0x1   :  { %v4_v0 = vld [vmem:[%s22_s0] ss:$0 sm:$0xff] }
   0x2   :  { %5 = vst [vmem:[%s23_s1] sm:$0xf] %v4_v0 }

// kernel: tile.184
= control target key start
LH: loop header
LB: loop body
LE: loop exit
PB: predicated region body
PF: predicated region fallthrough
CT: control target
= control target key end

     0   :  { %vm7_vm0 = vcmask 261120   ;;  %s37_s8 = smov 32   ;;  %s38_s9 = smov 64   ;;  %vm13_vm1 = vcmask 1048320   ;;  %vm19_vm2 = vcmask 785920   ;;  %vm25_vm3 = vcmask 523520   ;;  %s55_s0 = inlined_call_operand.vmem [shape: f32[4,32], index: 0, kind: input, shape index: {}]   ;;  %s56_s1 = inlined_call_operand.vmem [shape: f32[1,128], index: 1, kind: output, shape index: {}]  }
   0x1   :  { %v4_v0 = vld [vmem:[%s55_s0] sm:$0xf]  ;;  %s36_s0 = smov 96  }
   0x2   :  { %5 = vst [vmem:[#allocation1] sm:$0xf] %v4_v0 }
   0x9   :  { %v10_v1 = vld [vmem:[#allocation1 + $0x3] sm:$0x1]   ;;  %v22_v2 = vld [vmem:[#allocation1 + $0x1] sm:$0x1]   ;;  %v6_v3 = vld [vmem:[#allocation1] sm:$0x1]  }
   0xa   :  { %11 = vrot.lane.b32.xlu0 %v10_v1, %s36_s0  ;;  %23 = vrot.lane.b32.xlu1 %v22_v2, %s37_s8  ;;  %v16_v4 = vld [vmem:[#allocation1 + $0x2] sm:$0x1]   ;;  %8 = vst.msk [vmem:[#allocation0] sm:$0x1] %vm7_vm0, %v6_v3  }
   0xe   :  { %17 = vrot.lane.b32.xlu0 %v16_v4, %s38_s9 }
  0x7c   :  { %v12_v5 = vpop.permute.xlu0 %11   ;;  %v24_v6 = vpop.permute.xlu1 %23  }
  0x7d   :  { %14 = vst.msk [vmem:[#allocation0] sm:$0x1] %vm13_vm1, %v12_v5  }
  0x80   :  { %v18_v7 = vpop.permute.xlu0 %17  }
  0x81   :  { %20 = vst.msk [vmem:[#allocation0] sm:$0x1] %vm19_vm2, %v18_v7  }
  0x82   :  { %26 = vst.msk [vmem:[#allocation0] sm:$0x1] %vm25_vm3, %v24_v6  }
  0x89   :  { %v30_v8 = vld [vmem:[#allocation0] sm:$0x1] }
  0x8a   :  { %32 = vst [vmem:[%s56_s1] sm:$0x1] %v30_v8 }

// kernel: resnet_forward.37
= control target key start
LH: loop header
LB: loop body
LE: loop exit
PB: predicated region body
PF: predicated region fallthrough
CT: control target
= control target key end

     0   :  { %s693_s12 = smov 0   ;;  %s797_s0 = inlined_call_operand.vmem [shape: bf16[128,144], index: 0, kind: input, shape index: {}]   ;;  %s798_s1 = inlined_call_operand.vmem [shape: bf16[144,32], index: 1, kind: input, shape index: {}]   ;;  %s799_s2 = inlined_call_operand.vmem [shape: bf16[128,32], index: 2, kind: output, shape index: {0}]   ;;  %s800_s3 = inlined_call_operand.vmem [shape: f32[2,2,32], index: 3, kind: output, shape index: {1}]  }
   0x1 LB: > { %s699_s13 = sadd.s32 4294967295, %s670_s12   ;;  %p569_p0 = scmp.ge.s32.totalorder %s670_s12, 1  ;;  %s670_s12 = sphi %s693_s12, %s14_s12  }
   0x2   : > { %p142_p1 = scmp.lt.s32.totalorder %s670_s12, 3 }
   0x4   : > { %p143_p2 = pnand %p569_p0, %p142_p1 }
   0x5   : > { %v643_v0 = vld [vmem:[%s798_s1] sm:$0xff] (!%p143_p2)   ;;  %v672_v1 = vmov (!%p143_p2), 0   ;;  %s570_s16 = sshll.u32 (!%p143_p2), %s699_s13, 3  ;;  %v644_v2 = vld [vmem:[%s798_s1 + $0x8] sm:$0xff] (!%p143_p2)   ;;  %v645_v3 = vld [vmem:[%s798_s1 + $0x10] sm:$0xff] (!%p143_p2)   ;;  %vm305_vm0 = vcmask (!%p143_p2), 130048  }
   0x6   : > { %146 = sbr.rel (%p143_p2) target bundleno = 290 (0x122), region = 28  ;;  %318 = vmatprep.subr.bf16.mxu0 (!%p143_p2), %v672_v1  ;;  %616 = vmatprep.subr.bf16.mxu1 (!%p143_p2), %v672_v1  ;;  %p172_p3 = scmp.lt.s32.totalorder (!%p143_p2), %s570_s16, 15  ;;  %v646_v4 = vld [vmem:[%s798_s1 + $0x18] sm:$0xff] (!%p143_p2)   ;;  %v647_v7 = vld [vmem:[%s798_s1 + $0x20] sm:$0xff] (!%p143_p2)   ;;  %v648_v8 = vld [vmem:[%s798_s1 + $0x28] sm:$0xff] (!%p143_p2)   ;;  %vm415_vm1 = vcmask (!%p143_p2), 257024  }
   0x7   : > { %319 = vmatpush1.bf16.msra.mxu0 (!%p143_p2), %v643_v0  ;;  %625 = vmatpush1.bf16.msra.mxu1 (!%p143_p2), %v643_v0  ;;  %v649_v9 = vld [vmem:[%s798_s1 + $0x30] sm:$0xff] (!%p143_p2)   ;;  %v650_v10 = vld [vmem:[%s798_s1 + $0x38] sm:$0xff] (!%p143_p2)   ;;  %v651_v11 = vld [vmem:[%s798_s1 + $0x40] sm:$0xff] (!%p143_p2)   ;;  %vm424_vm2 = vcmask (!%p143_p2), 261120   ;;  %p184_p4 = scmp.lt.s32.totalorder (!%p143_p2), %s699_s13, 1  ;;  %vm446_vm3 = vcmask (!%p143_p2), 253952  }
   0x8   : > { %320 = vmatprep.subr.bf16.mxu0 (!%p143_p2), %v672_v1  ;;  %617 = vmatprep.subr.bf16.mxu1 (!%p143_p2), %v672_v1 }
   0xb   : > { %321 = vmatpush1.bf16.msra.mxu0 (!%p143_p2), %v644_v2  ;;  %626 = vmatpush1.bf16.msra.mxu1 (!%p143_p2), %v644_v2 }
   0xc   : > { %322 = vmatprep.subr.bf16.mxu0 (!%p143_p2), %v672_v1  ;;  %618 = vmatprep.subr.bf16.mxu1 (!%p143_p2), %v672_v1 }
   0xd   : > { %s802_s16 = smov (!%p172_p3, %s570_s16), 15  ;;  %s804_s13 = smov (!%p184_p4, %s699_s13), 1 }
   0xe   : > { %s607_s21 = sshll.u32 %s802_s16, 3  ;;  %s574_s10 = sshll.u32 %s802_s16, 2 }
   0xf   : > { %s719_s24 = scalar_lea.vmem %s797_s0, %s607_s21  ;;  %323 = vmatpush1.bf16.msra.mxu0 %v645_v3  ;;  %627 = vmatpush1.bf16.msra.mxu1 %v645_v3  ;;  %s755_s15 = scalar_lea.vmem %s799_s2, %s574_s10 }
  0x10   : > { %v654_v5 = vld [vmem:[%s719_s24 + $0x4] ss:$8 sps:$4 sm:$0xff]   ;;  %324 = vmatprep.subr.bf16.mxu0 %v672_v1  ;;  %619 = vmatprep.subr.bf16.mxu1 %v672_v1  ;;  %v652_v12 = vld [vmem:[%s719_s24] ss:$8 sps:$4 sm:$0xff]   ;;  %v658_v14 = vld [vmem:[%s719_s24 + $0x14] ss:$8 sps:$4 sm:$0xff]  }
  0x11   : > { %v657_v6 = vld [vmem:[%s719_s24 + $0x24] ss:$8 sps:$4 sm:$0xff]   ;;  %593 = vmatprep.mubr.msk.bf16.mxu0 %vm305_vm0, %v654_v5  ;;  %v655_v13 = vld [vmem:[%s719_s24 + $0x20] ss:$8 sps:$4 sm:$0xff]   ;;  %v661_v15 = vld [vmem:[%s719_s24 + $0x34] ss:$8 sps:$4 sm:$0xff]  }
  0x12   : > { %595 = vmatprep.mubr.msk.bf16.mxu1 %vm305_vm0, %v657_v6  ;;  %v660_v16 = vld [vmem:[%s719_s24 + $0x10] ss:$8 sps:$4 sm:$0xff]   ;;  %s575_s16 = sshll.u32 %s804_s13, 1 }
  0x13   : > { %325 = vmatpush1.bf16.msra.mxu0 %v646_v4  ;;  %628 = vmatpush1.bf16.msra.mxu1 %v646_v4  ;;  %v663_v17 = vld [vmem:[%s719_s24 + $0x30] ss:$8 sps:$4 sm:$0xff]   ;;  %s187_s19 = scalar_lea.vmem %s800_s3, %s575_s16 }
  0x14   : > { %326 = vmatprep.subr.bf16.mxu0 %v672_v1  ;;  %620 = vmatprep.subr.bf16.mxu1 %v672_v1 }
  0x17   : > { %327 = vmatpush1.bf16.msra.mxu0 %v647_v7  ;;  %629 = vmatpush1.bf16.msra.mxu1 %v647_v7 }
  0x18   : > { %328 = vmatprep.subr.bf16.mxu0 %v672_v1  ;;  %621 = vmatprep.subr.bf16.mxu1 %v672_v1 }
  0x1b   : > { %329 = vmatpush1.bf16.msra.mxu0 %v648_v8  ;;  %630 = vmatpush1.bf16.msra.mxu1 %v648_v8 }
  0x1c   : > { %330 = vmatprep.subr.bf16.mxu0 %v672_v1  ;;  %622 = vmatprep.subr.bf16.mxu1 %v672_v1 }
  0x1f   : > { %331 = vmatpush1.bf16.msra.mxu0 %v649_v9  ;;  %631 = vmatpush1.bf16.msra.mxu1 %v649_v9 }
  0x20   : > { %332 = vmatprep.subr.bf16.mxu0 %v672_v1  ;;  %623 = vmatprep.subr.bf16.mxu1 %v672_v1 }
  0x23   : > { %333 = vmatpush1.bf16.msra.mxu0 %v650_v10  ;;  %632 = vmatpush1.bf16.msra.mxu1 %v650_v10 }
  0x24   : > { %334 = vmatprep.subr.bf16.mxu0 %v672_v1  ;;  %624 = vmatprep.subr.bf16.mxu1 %v672_v1 }
  0x27   : > { %335 = vmatpush1.bf16.msra.mxu0 %v651_v11  ;;  %633 = vmatpush1.bf16.msra.mxu1 %v651_v11 }
  0x2a   : > { %351 = vmatmul.mubr.bf16.vlgmr.msra.gmra.mrb[0].mxu0 %v652_v12  ;;  %367 = vmatmul.mubr.bf16.vlgmr.msra.gmra.mrb[0].mxu1 %v655_v13 }
  0x2b   : > { %594 = vmatprep.mubr.msk.bf16.mxu0 %vm305_vm0, %v658_v14  ;;  %596 = vmatprep.mubr.msk.bf16.mxu1 %vm305_vm0, %v661_v15 }
  0x32   : > { %359 = vmatmul.mubr.bf16.gmra.mrb[4].mxu0 %v660_v16  ;;  %375 = vmatmul.mubr.bf16.gmra.mrb[4].mxu1 %v663_v17 }
  0xfd   : > { %v352_v18 = vpop.f32.mrb[0].mxu0  ;;  %v368_v19 = vpop.f32.mrb[0].mxu1 }
  0xfe   : > { %v608_v20 = vpack.c.bf16 %v352_v18, %v352_v18  ;;  %v448_v21 = vmul.f32 %v352_v18, %v352_v18  ;;  %v354_v22 = vpop.f32.mrb[1].mxu0  ;;  %v612_v23 = vpack.c.bf16 %v368_v19, %v368_v19  ;;  %v370_v24 = vpop.f32.mrb[1].mxu1  ;;  %v425_v27 = vsel %vm424_vm2, %v352_v18, 0.0 }
  0xff   : > { %v355_v25 = vpop.f32.mrb[2].mxu0  ;;  %v371_v26 = vpop.f32.mrb[2].mxu1  ;;  %v452_v46 = vmul.f32 %v368_v19, %v368_v19  ;;  %v432_v59 = vsel %vm424_vm2, %v368_v19, 0.0 }
 0x100   : > { %416 = vst.msk [vmem:[%s755_s15] sm:$0xf] %vm415_vm1, %v608_v20  ;;  %v609_v28 = vpack.c.bf16 %v355_v25, %v355_v25  ;;  %v426_v29 = vsel %vm424_vm2, %v355_v25, 0.0  ;;  %v449_v30 = vmul.f32 %v355_v25, %v355_v25  ;;  %v357_v31 = vpop.f32.mrb[3].mxu0  ;;  %420 = vst.msk [vmem:[%s755_s15 + $0x10] sm:$0xf] %vm415_vm1, %v612_v23  ;;  %v613_v34 = vpack.c.bf16 %v371_v26, %v371_v26 }
 0x101   : > { %v373_v32 = vpop.f32.mrb[3].mxu1  ;;  %v427_v33 = vadd.f32 %v426_v29, %v425_v27  ;;  %v456_v35 = vsel %vm424_vm2, %v448_v21, 0.0  ;;  %v453_v60 = vmul.f32 %v371_v26, %v371_v26  ;;  %v463_v1 = vsel %vm424_vm2, %v452_v46, 0.0 }
 0x102   : > { %417 = vst.msk [vmem:[%s755_s15 + $0x4] sm:$0xf] %vm415_vm1, %v609_v28  ;;  %v457_v36 = vsel %vm424_vm2, %v449_v30, 0.0  ;;  %421 = vst.msk [vmem:[%s755_s15 + $0x14] sm:$0xf] %vm415_vm1, %v613_v34  ;;  %v434_v2 = vsel %vm424_vm2, %v371_v26, 0.0 }
 0x103   : > { %v458_v37 = vadd.f32 %v457_v36, %v456_v35  ;;  %v465_v6 = vsel %vm424_vm2, %v453_v60, 0.0 }
 0x105   : > { %v360_v38 = vpop.f32.mrb[4].mxu0  ;;  %v376_v39 = vpop.f32.mrb[4].mxu1 }
 0x106   : > { %v610_v40 = vpack.c.bf16 %v360_v38, %v360_v38  ;;  %v428_v41 = vsel %vm424_vm2, %v360_v38, 0.0  ;;  %v450_v42 = vmul.f32 %v360_v38, %v360_v38  ;;  %v362_v43 = vpop.f32.mrb[5].mxu0  ;;  %v614_v44 = vpack.c.bf16 %v376_v39, %v376_v39  ;;  %v378_v45 = vpop.f32.mrb[5].mxu1 }
 0x107   : > { %v429_v47 = vadd.f32 %v428_v41, %v427_v33  ;;  %v363_v48 = vpop.f32.mrb[6].mxu0  ;;  %v379_v49 = vpop.f32.mrb[6].mxu1  ;;  %v454_v62 = vmul.f32 %v376_v39, %v376_v39  ;;  %v436_v3 = vsel %vm424_vm2, %v376_v39, 0.0 }
 0x108   : > { %418 = vst.msk [vmem:[%s755_s15 + $0x8] sm:$0xf] %vm415_vm1, %v610_v40  ;;  %v459_v50 = vsel %vm424_vm2, %v450_v42, 0.0  ;;  %v611_v51 = vpack.c.bf16 %v363_v48, %v363_v48  ;;  %v430_v52 = vsel %vm424_vm2, %v363_v48, 0.0  ;;  %v451_v53 = vmul.f32 %v363_v48, %v363_v48  ;;  %v365_v54 = vpop.f32.mrb[7].mxu0  ;;  %v381_v55 = vpop.f32.mrb[7].mxu1 }
 0x109   : > { %422 = vst.msk [vmem:[%s755_s15 + $0x18] sm:$0xf] %vm415_vm1, %v614_v44  ;;  %v460_v56 = vadd.f32 %v459_v50, %v458_v37  ;;  %v431_v57 = vadd.f32 %v430_v52, %v429_v47  ;;  %v615_v58 = vpack.c.bf16 %v379_v49, %v379_v49  ;;  %v467_v7 = vsel %vm424_vm2, %v454_v62, 0.0 }
 0x10a   : > { %419 = vst.msk [vmem:[%s755_s15 + $0xc] sm:$0xf] %vm415_vm1, %v611_v51  ;;  %v461_v61 = vsel %vm424_vm2, %v451_v53, 0.0  ;;  %v455_v8 = vmul.f32 %v379_v49, %v379_v49  ;;  %v438_v11 = vsel %vm424_vm2, %v379_v49, 0.0 }
 0x10b   : > { %v433_v63 = vadd.f32 %v432_v59, %v431_v57  ;;  %v462_v0 = vadd.f32 %v461_v61, %v460_v56  ;;  %423 = vst.msk [vmem:[%s755_s15 + $0x1c] sm:$0xf] %vm415_vm1, %v615_v58 }
 0x10c   : > { %v469_v14 = vsel %vm424_vm2, %v455_v8, 0.0 }
 0x10d   : > { %v464_v4 = vadd.f32 %v463_v1, %v462_v0  ;;  %v435_v5 = vadd.f32 %v434_v2, %v433_v63 }
 0x10f   : > { %v437_v9 = vadd.f32 %v436_v3, %v435_v5  ;;  %v466_v10 = vadd.f32 %v465_v6, %v464_v4 }
 0x111   : > { %v468_v12 = vadd.f32 %v467_v7, %v466_v10  ;;  %v439_v13 = vadd.f32 %v438_v11, %v437_v9 }
 0x113   : > { %v440_v15 = vrot.slane %v439_v13, 4  ;;  %v470_v16 = vadd.f32 %v469_v14, %v468_v12 }
 0x115   : > { %v441_v17 = vadd.f32 %v440_v15, %v439_v13  ;;  %v471_v18 = vrot.slane %v470_v16, 4 }
 0x117   : > { %v442_v19 = vrot.slane %v441_v17, 2  ;;  %v472_v20 = vadd.f32 %v471_v18, %v470_v16 }
 0x119   : > { %v443_v21 = vadd.f32 %v442_v19, %v441_v17  ;;  %v473_v22 = vrot.slane %v472_v20, 2 }
 0x11b   : > { %v444_v23 = vrot.slane %v443_v21, 1  ;;  %v474_v24 = vadd.f32 %v473_v22, %v472_v20 }
 0x11d   : > { %v445_v25 = vadd.f32 %v444_v23, %v443_v21  ;;  %v475_v26 = vrot.slane %v474_v24, 1 }
 0x11f   : > { %447 = vst.msk [vmem:[%s187_s19] sm:$0x1] %vm446_vm3, %v445_v25  ;;  %v476_v27 = vadd.f32 %v475_v26, %v474_v24 }
 0x121   : > { %477 = vst.msk [vmem:[%s187_s19 + $0x1] sm:$0x1] %vm446_vm3, %v476_v27 }
 0x122 PF: > { %s14_s12 = sadd.s32 1, %s670_s12  }
 0x123   : > { %p11_p5 = scmp.ge.s32.totalorder %s14_s12, 4  }
 0x125   :  { %13 = sbr.rel (!%p11_p5) target bundleno = 1 (0x1), region = 70 }

// kernel: resnet_forward.38
= control target key start
LH: loop header
LB: loop body
LE: loop exit
PB: predicated region body
PF: predicated region fallthrough
CT: control target
= control target key end

     0   :  { %s326_s12 = smov 0   ;;  %s343_s0 = inlined_call_operand.vmem [shape: bf16[32,128], index: 0, kind: input, shape index: {}]   ;;  %s344_s1 = inlined_call_operand.vmem [shape: f32[1,128], index: 1, kind: input, shape index: {}]   ;;  %s345_s2 = inlined_call_operand.vmem [shape: f32[1,128], index: 2, kind: input, shape index: {}]   ;;  %s346_s3 = inlined_call_operand.vmem [shape: bf16[32,128], index: 3, kind: output, shape index: {}]  }
   0x1 LB: > { %s264_s13 = sadd.s32 4294967295, %s304_s12   ;;  %p268_p0 = scmp.ge.s32.totalorder %s304_s12, 1  ;;  %s304_s12 = sphi %s326_s12, %s13_s12  }
   0x2   : > { %p138_p1 = scmp.lt.s32.totalorder %s304_s12, 3 }
   0x4   : > { %p139_p2 = pnand %p268_p0, %p138_p1 }
   0x5   : > { %s269_s14 = sshll.u32 (!%p139_p2), %s264_s13, 1  ;;  %v273_v1 = vld [vmem:[%s344_s1] ss:$0 sm:$0xff] (!%p139_p2) }
   0x6   : > { %142 = sbr.rel (%p139_p2) target bundleno = 28 (0x1c), region = 32  ;;  %p163_p3 = scmp.lt.s32.totalorder (!%p139_p2), %s269_s14, 3  ;;  %v274_v4 = vld [vmem:[%s345_s2] ss:$0 sm:$0xff] (!%p139_p2) }
   0xd   : > { %s348_s14 = smov (!%p163_p3, %s269_s14), 3 }
   0xe   : > { %s270_s15 = sshll.u32 %s348_s14, 2 }
   0xf   : > { %s166_s18 = scalar_lea.vmem %s343_s0, %s270_s15  ;;  %s172_s25 = scalar_lea.vmem %s346_s3, %s270_s15 }
  0x10   : > { %v282_v0 = vld [vmem:[%s166_s18] sm:$0xff]  }
  0x11   : > { %v283_v2 = vunpack.c.l.bf16 %v282_v0  ;;  %v284_v3 = vunpack.c.h.bf16 %v282_v0 }
  0x13   : > { %v185_v5 = vmul.f32 %v283_v2, %v273_v1  ;;  %v186_v6 = vmul.f32 %v284_v3, %v273_v1 }
  0x15   : > { %v194_v7 = vadd.f32 %v274_v4, %v185_v5  ;;  %v195_v8 = vadd.f32 %v274_v4, %v186_v6 }
  0x17   : > { %v196_v9 = vmax.f32 %v194_v7, 0.0  ;;  %v197_v10 = vmax.f32 %v195_v8, 0.0 }
  0x19   : > { %v288_v11 = vpack.c.bf16 %v197_v10, %v196_v9 }
  0x1b   : > { %289 = vst [vmem:[%s172_s25] sm:$0xff] %v288_v11  }
  0x1c PF: > { %s13_s12 = sadd.s32 1, %s304_s12  }
  0x1d   : > { %p10_p4 = scmp.ge.s32.totalorder %s13_s12, 4  }
  0x1f   :  { %12 = sbr.rel (!%p10_p4) target bundleno = 1 (0x1), region = 62 }

// kernel: resnet_forward.39
= control target key start
LH: loop header
LB: loop body
LE: loop exit
PB: predicated region body
PF: predicated region fallthrough
CT: control target
= control target key end

     0   :  { %s940_s12 = smov 0   ;;  %s1075_s0 = inlined_call_operand.vmem [shape: bf16[128,288], index: 0, kind: input, shape index: {}]   ;;  %s1076_s1 = inlined_call_operand.vmem [shape: bf16[288,32], index: 1, kind: input, shape index: {}]   ;;  %s1077_s2 = inlined_call_operand.vmem [shape: bf16[128,32], index: 2, kind: output, shape index: {0}]   ;;  %s1078_s3 = inlined_call_operand.vmem [shape: f32[2,2,32], index: 3, kind: output, shape index: {1}]  }
   0x1 LB: > { %s946_s13 = sadd.s32 4294967295, %s918_s12   ;;  %p737_p0 = scmp.ge.s32.totalorder %s918_s12, 1  ;;  %s918_s12 = sphi %s940_s12, %s14_s12  }
   0x2   : > { %p142_p1 = scmp.lt.s32.totalorder %s918_s12, 3 }
   0x4   : > { %p143_p2 = pnand %p737_p0, %p142_p1 }
   0x5   : > { %v878_v0 = vld [vmem:[%s1076_s1 + $0x40] sm:$0xff] (!%p143_p2)   ;;  %s738_s16 = sshll.u32 (!%p143_p2), %s946_s13, 3  ;;  %v880_v2 = vld [vmem:[%s1076_s1 + $0x48] sm:$0xff] (!%p143_p2)   ;;  %v882_v4 = vld [vmem:[%s1076_s1 + $0x50] sm:$0xff] (!%p143_p2)   ;;  %vm409_vm0 = vcmask (!%p143_p2), 261120   ;;  %vm584_vm1 = vcmask (!%p143_p2), 257024  }
   0x6   : > { %146 = sbr.rel (%p143_p2) target bundleno = 296 (0x128), region = 28  ;;  %v879_v1 = vld [vmem:[%s1076_s1] sm:$0xff] (!%p143_p2)   ;;  %795 = vmatprep.subr.bf16.mxu0 (!%p143_p2), %v878_v0  ;;  %853 = vmatprep.subr.bf16.mxu1 (!%p143_p2), %v878_v0  ;;  %p172_p3 = scmp.lt.s32.totalorder (!%p143_p2), %s738_s16, 15  ;;  %v881_v3 = vld [vmem:[%s1076_s1 + $0x8] sm:$0xff] (!%p143_p2)   ;;  %v883_v5 = vld [vmem:[%s1076_s1 + $0x10] sm:$0xff] (!%p143_p2)   ;;  %vm614_vm2 = vcmask (!%p143_p2), 253952  }
   0x7   : > { %796 = vmatpush3.bf16.msra.mxu0 (!%p143_p2), %v879_v1  ;;  %861 = vmatpush3.bf16.msra.mxu1 (!%p143_p2), %v879_v1  ;;  %v884_v6 = vld [vmem:[%s1076_s1 + $0x58] sm:$0xff] (!%p143_p2)   ;;  %v886_v8 = vld [vmem:[%s1076_s1 + $0x60] sm:$0xff] (!%p143_p2)   ;;  %v888_v10 = vld [vmem:[%s1076_s1 + $0x68] sm:$0xff] (!%p143_p2)   ;;  %p184_p4 = scmp.lt.s32.totalorder (!%p143_p2), %s946_s13, 1 }
   0x8   : > { %797 = vmatprep.subr.bf16.mxu0 (!%p143_p2), %v880_v2  ;;  %854 = vmatprep.subr.bf16.mxu1 (!%p143_p2), %v880_v2  ;;  %v885_v7 = vld [vmem:[%s1076_s1 + $0x18] sm:$0xff] (!%p143_p2)   ;;  %v887_v9 = vld [vmem:[%s1076_s1 + $0x20] sm:$0xff] (!%p143_p2)   ;;  %v889_v13 = vld [vmem:[%s1076_s1 + $0x28] sm:$0xff] (!%p143_p2)  }
   0x9   : > { %v890_v14 = vld [vmem:[%s1076_s1 + $0x70] sm:$0xff] (!%p143_p2)   ;;  %v892_v16 = vld [vmem:[%s1076_s1 + $0x78] sm:$0xff] (!%p143_p2)   ;;  %v900_v18 = vld [vmem:[%s1076_s1 + $0x80] sm:$0xff] (!%p143_p2)  }
   0xa   : > { %v891_v15 = vld [vmem:[%s1076_s1 + $0x30] sm:$0xff] (!%p143_p2)   ;;  %v893_v17 = vld [vmem:[%s1076_s1 + $0x38] sm:$0xff] (!%p143_p2)   ;;  %v901_v22 = vld [vmem:[%s1076_s1 + $0x88] sm:$0xff] (!%p143_p2)  }
   0xb   : > { %798 = vmatpush3.bf16.msra.mxu0 (!%p143_p2), %v881_v3  ;;  %862 = vmatpush3.bf16.msra.mxu1 (!%p143_p2), %v881_v3 }
   0xc   : > { %799 = vmatprep.subr.bf16.mxu0 (!%p143_p2), %v882_v4  ;;  %855 = vmatprep.subr.bf16.mxu1 (!%p143_p2), %v882_v4 }
   0xd   : > { %s1080_s16 = smov (!%p172_p3, %s738_s16), 15  ;;  %s1082_s13 = smov (!%p184_p4, %s946_s13), 1 }
   0xe   : > { %s869_s29 = smul.u32 12, %s1080_s16  ;;  %s741_s4 = sshll.u32 %s1080_s16, 2 }
   0xf   : > { %800 = vmatpush3.bf16.msra.mxu0 %v883_v5  ;;  %863 = vmatpush3.bf16.msra.mxu1 %v883_v5  ;;  %s1033_s7 = scalar_lea.vmem %s1077_s2, %s741_s4  ;;  %s742_s16 = sshll.u32 %s1082_s13, 1 }
  0x10   : > { %801 = vmatprep.subr.bf16.mxu0 %v884_v6  ;;  %856 = vmatprep.subr.bf16.mxu1 %v884_v6  ;;  %s984_s9 = scalar_lea.vmem %s1075_s0, %s869_s29  ;;  %s187_s10 = scalar_lea.vmem %s1078_s3, %s742_s16 }
  0x11   : > { %v896_v11 = vld [vmem:[%s984_s9 + $0x4] ss:$12 sps:$4 sm:$0xff]   ;;  %v899_v12 = vld [vmem:[%s984_s9 + $0x4c] ss:$12 sps:$4 sm:$0xff]   ;;  %v897_v20 = vld [vmem:[%s984_s9 + $0x48] ss:$12 sps:$4 sm:$0xff]  }
  0x12   : > { %454 = vmatprep.mubr.bf16.mxu0 %v896_v11  ;;  %478 = vmatprep.mubr.bf16.mxu1 %v899_v12  ;;  %v894_v19 = vld [vmem:[%s984_s9] ss:$12 sps:$4 sm:$0xff]   ;;  %v902_v21 = vld [vmem:[%s984_s9 + $0x1c] ss:$12 sps:$4 sm:$0xff]   ;;  %v905_v24 = vld [vmem:[%s984_s9 + $0x18] ss:$12 sps:$4 sm:$0xff]  }
  0x13   : > { %802 = vmatpush3.bf16.msra.mxu0 %v885_v7  ;;  %864 = vmatpush3.bf16.msra.mxu1 %v885_v7  ;;  %v904_v23 = vld [vmem:[%s984_s9 + $0x8] ss:$12 sps:$4 sm:$0xff]   ;;  %v906_v25 = vld [vmem:[%s984_s9 + $0x20] ss:$12 sps:$4 sm:$0xff]   ;;  %v909_v27 = vld [vmem:[%s984_s9 + $0x38] ss:$12 sps:$4 sm:$0xff]  }
  0x14   : > { %803 = vmatprep.subr.bf16.mxu0 %v886_v8  ;;  %857 = vmatprep.subr.bf16.mxu1 %v886_v8  ;;  %v907_v26 = vld [vmem:[%s984_s9 + $0x34] ss:$12 sps:$4 sm:$0xff]   ;;  %v910_v28 = vld [vmem:[%s984_s9 + $0x30] ss:$12 sps:$4 sm:$0xff]  }
  0x15   : > { %v911_v29 = vld [vmem:[%s984_s9 + $0x50] ss:$12 sps:$4 sm:$0xff]  }
  0x17   : > { %804 = vmatpush3.bf16.msra.mxu0 %v887_v9  ;;  %865 = vmatpush3.bf16.msra.mxu1 %v887_v9 }
  0x18   : > { %805 = vmatprep.subr.bf16.mxu0 %v888_v10  ;;  %858 = vmatprep.subr.bf16.mxu1 %v888_v10 }
  0x1b   : > { %806 = vmatpush3.bf16.msra.mxu0 %v889_v13  ;;  %866 = vmatpush3.bf16.msra.mxu1 %v889_v13 }
  0x1c   : > { %807 = vmatprep.subr.bf16.mxu0 %v890_v14  ;;  %859 = vmatprep.subr.bf16.mxu1 %v890_v14 }
  0x1f   : > { %808 = vmatpush3.bf16.msra.mxu0 %v891_v15  ;;  %867 = vmatpush3.bf16.msra.mxu1 %v891_v15 }
  0x20   : > { %809 = vmatprep.subr.bf16.mxu0 %v892_v16  ;;  %860 = vmatprep.subr.bf16.mxu1 %v892_v16 }
  0x23   : > { %810 = vmatpush3.bf16.msra.mxu0 %v893_v17  ;;  %868 = vmatpush3.bf16.msra.mxu1 %v893_v17 }
  0x24   : > { %841 = vmatprep.subr.bf16.mxu1 %v900_v18 }
  0x26   : > { %455 = vmatmul.mubr.bf16.vlgmr.msra.gmra.mrb[0].mxu0 %v894_v19  ;;  %479 = vmatmul.mubr.bf16.vlgmr.msra.gmra.mrb[0].mxu1 %v897_v20 }
  0x27   : > { %842 = vmatpush3.bf16.msra.mxu1 %v900_v18  ;;  %462 = vmatprep.mubr.bf16.mxu0 %v902_v21 }
  0x28   : > { %843 = vmatprep.subr.bf16.mxu1 %v901_v22  ;;  %845 = vmatprep.mubr.msk.bf16.mxu1 %vm409_vm0, %v904_v23 }
  0x2b   : > { %844 = vmatpush3.bf16.msra.mxu1 %v901_v22 }
  0x2e   : > { %463 = vmatmul.mubr.bf16.gmra.mrb[4].mxu0 %v905_v24  ;;  %846 = vmatmul.mubr.msk.bf16.vlgmr.msra.gmra.mrb[4].mxu1 %vm409_vm0, %v906_v25 }
  0x2f   : > { %470 = vmatprep.mubr.bf16.mxu0 %v907_v26  ;;  %849 = vmatprep.mubr.msk.bf16.mxu1 %vm409_vm0, %v909_v27 }
  0x36   : > { %471 = vmatmul.mubr.bf16.gmra.mrb[8].mxu0 %v910_v28  ;;  %850 = vmatmul.mubr.msk.bf16.gmra.mrb[8].mxu1 %vm409_vm0, %v911_v29 }
  0xf9   : > { %v811_v30 = vpop.f32.mrb[0].mxu0  ;;  %v829_v31 = vpop.f32.mrb[0].mxu1 }
  0xfa   : > { %v812_v32 = vpop.f32.mrb[1].mxu0  ;;  %v830_v33 = vpop.f32.mrb[1].mxu1 }
  0xfb   : > { %v813_v34 = vadd.f32 %v812_v32, %v811_v30  ;;  %v831_v35 = vadd.f32 %v830_v33, %v829_v31  ;;  %v814_v36 = vpop.f32.mrb[2].mxu0  ;;  %v832_v37 = vpop.f32.mrb[2].mxu1 }
  0xfc   : > { %v815_v38 = vpop.f32.mrb[3].mxu0  ;;  %v833_v39 = vpop.f32.mrb[3].mxu1 }
  0xfd   : > { %v816_v40 = vadd.f32 %v815_v38, %v814_v36  ;;  %v834_v41 = vadd.f32 %v833_v39, %v832_v37 }
 0x101   : > { %v817_v42 = vpop.f32.mrb[4].mxu0  ;;  %v847_v43 = vpop.f32.mrb[4].mxu1 }
 0x102   : > { %v818_v44 = vpop.f32.mrb[5].mxu0  ;;  %v521_v45 = vpop.f32.mrb[5].mxu1 }
 0x103   : > { %v819_v46 = vadd.f32 %v818_v44, %v817_v42  ;;  %v522_v47 = vadd.f32 %v813_v34, %v521_v45  ;;  %v820_v48 = vpop.f32.mrb[6].mxu0  ;;  %v848_v49 = vpop.f32.mrb[6].mxu1 }
 0x104   : > { %v821_v50 = vpop.f32.mrb[7].mxu0  ;;  %v524_v51 = vpop.f32.mrb[7].mxu1 }
 0x105   : > { %v530_v52 = vadd.f32 %v847_v43, %v819_v46  ;;  %v787_v53 = vpack.c.bf16 %v522_v47, %v522_v47  ;;  %v616_v54 = vmul.f32 %v522_v47, %v522_v47  ;;  %v822_v55 = vadd.f32 %v821_v50, %v820_v48 }
 0x106   : > { %v525_v56 = vadd.f32 %v816_v40, %v524_v51  ;;  %v593_v59 = vsel %vm409_vm0, %v522_v47, 0.0 }
 0x107   : > { %v789_v57 = vpack.c.bf16 %v530_v52, %v530_v52  ;;  %v618_v58 = vmul.f32 %v530_v52, %v530_v52  ;;  %585 = vst.msk [vmem:[%s1033_s7] sm:$0xf] %vm584_vm1, %v787_v53  ;;  %v533_v60 = vadd.f32 %v848_v49, %v822_v55  ;;  %v596_v0 = vsel %vm409_vm0, %v530_v52, 0.0 }
 0x108   : > { %v788_v61 = vpack.c.bf16 %v525_v56, %v525_v56  ;;  %v594_v62 = vsel %vm409_vm0, %v525_v56, 0.0  ;;  %v617_v63 = vmul.f32 %v525_v56, %v525_v56  ;;  %v624_v4 = vsel %vm409_vm0, %v616_v54, 0.0 }
 0x109   : > { %587 = vst.msk [vmem:[%s1033_s7 + $0x8] sm:$0xf] %vm584_vm1, %v789_v57  ;;  %v595_v1 = vadd.f32 %v594_v62, %v593_v59  ;;  %v823_v2 = vpop.f32.mrb[8].mxu0  ;;  %v851_v3 = vpop.f32.mrb[8].mxu1  ;;  %v790_v5 = vpack.c.bf16 %v533_v60, %v533_v60  ;;  %v619_v6 = vmul.f32 %v533_v60, %v533_v60  ;;  %v627_v16 = vsel %vm409_vm0, %v618_v58, 0.0 }
 0x10a   : > { %586 = vst.msk [vmem:[%s1033_s7 + $0x4] sm:$0xf] %vm584_vm1, %v788_v61  ;;  %v625_v7 = vsel %vm409_vm0, %v617_v63, 0.0  ;;  %v824_v8 = vpop.f32.mrb[9].mxu0  ;;  %v537_v9 = vpop.f32.mrb[9].mxu1  ;;  %v546_v12 = vadd.f32 %v851_v3, %v831_v35  ;;  %v598_v20 = vsel %vm409_vm0, %v533_v60, 0.0 }
 0x10b   : > { %v597_v10 = vadd.f32 %v596_v0, %v595_v1  ;;  %v626_v11 = vadd.f32 %v625_v7, %v624_v4  ;;  %v825_v13 = vadd.f32 %v824_v8, %v823_v2  ;;  %v826_v14 = vpop.f32.mrb[10].mxu0  ;;  %v852_v15 = vpop.f32.mrb[10].mxu1  ;;  %588 = vst.msk [vmem:[%s1033_s7 + $0xc] sm:$0xf] %vm584_vm1, %v790_v5  ;;  %v629_v23 = vsel %vm409_vm0, %v619_v6, 0.0 }
 0x10c   : > { %v549_v17 = vadd.f32 %v852_v15, %v834_v41  ;;  %v827_v18 = vpop.f32.mrb[11].mxu0  ;;  %v540_v19 = vpop.f32.mrb[11].mxu1  ;;  %v793_v22 = vpack.c.bf16 %v546_v12, %v546_v12  ;;  %v622_v34 = vmul.f32 %v546_v12, %v546_v12  ;;  %v604_v41 = vsel %vm409_vm0, %v546_v12, 0.0 }
 0x10d   : > { %v628_v21 = vadd.f32 %v627_v16, %v626_v11  ;;  %v538_v24 = vadd.f32 %v825_v13, %v537_v9  ;;  %v599_v25 = vadd.f32 %v598_v20, %v597_v10  ;;  %v828_v28 = vadd.f32 %v827_v18, %v826_v14 }
 0x10e   : > { %v794_v26 = vpack.c.bf16 %v549_v17, %v549_v17  ;;  %591 = vst.msk [vmem:[%s1033_s7 + $0x18] sm:$0xf] %vm584_vm1, %v793_v22  ;;  %v623_v42 = vmul.f32 %v549_v17, %v549_v17  ;;  %v635_v46 = vsel %vm409_vm0, %v622_v34, 0.0  ;;  %v606_v47 = vsel %vm409_vm0, %v549_v17, 0.0 }
 0x10f   : > { %v630_v27 = vadd.f32 %v629_v23, %v628_v21  ;;  %v791_v29 = vpack.c.bf16 %v538_v24, %v538_v24  ;;  %v600_v30 = vsel %vm409_vm0, %v538_v24, 0.0  ;;  %v620_v31 = vmul.f32 %v538_v24, %v538_v24 }
 0x110   : > { %592 = vst.msk [vmem:[%s1033_s7 + $0x1c] sm:$0xf] %vm584_vm1, %v794_v26  ;;  %v601_v32 = vadd.f32 %v600_v30, %v599_v25  ;;  %v541_v33 = vadd.f32 %v828_v28, %v540_v19  ;;  %v637_v50 = vsel %vm409_vm0, %v623_v42, 0.0 }
 0x111   : > { %589 = vst.msk [vmem:[%s1033_s7 + $0x10] sm:$0xf] %vm584_vm1, %v791_v29  ;;  %v631_v35 = vsel %vm409_vm0, %v620_v31, 0.0 }
 0x112   : > { %v632_v36 = vadd.f32 %v631_v35, %v630_v27  ;;  %v792_v37 = vpack.c.bf16 %v541_v33, %v541_v33  ;;  %v602_v38 = vsel %vm409_vm0, %v541_v33, 0.0  ;;  %v621_v39 = vmul.f32 %v541_v33, %v541_v33 }
 0x113   : > { %v603_v40 = vadd.f32 %v602_v38, %v601_v32 }
 0x114   : > { %590 = vst.msk [vmem:[%s1033_s7 + $0x14] sm:$0xf] %vm584_vm1, %v792_v37  ;;  %v633_v43 = vsel %vm409_vm0, %v621_v39, 0.0 }
 0x115   : > { %v605_v44 = vadd.f32 %v604_v41, %v603_v40  ;;  %v634_v45 = vadd.f32 %v633_v43, %v632_v36 }
 0x117   : > { %v607_v48 = vadd.f32 %v606_v47, %v605_v44  ;;  %v636_v49 = vadd.f32 %v635_v46, %v634_v45 }
 0x119   : > { %v608_v51 = vrot.slane %v607_v48, 4  ;;  %v638_v52 = vadd.f32 %v637_v50, %v636_v49 }
 0x11b   : > { %v609_v53 = vadd.f32 %v608_v51, %v607_v48  ;;  %v639_v54 = vrot.slane %v638_v52, 4 }
 0x11d   : > { %v610_v55 = vrot.slane %v609_v53, 2  ;;  %v640_v56 = vadd.f32 %v639_v54, %v638_v52 }
 0x11f   : > { %v611_v57 = vadd.f32 %v610_v55, %v609_v53  ;;  %v641_v58 = vrot.slane %v640_v56, 2 }
 0x121   : > { %v612_v59 = vrot.slane %v611_v57, 1  ;;  %v642_v60 = vadd.f32 %v641_v58, %v640_v56 }
 0x123   : > { %v613_v61 = vadd.f32 %v612_v59, %v611_v57  ;;  %v643_v62 = vrot.slane %v642_v60, 1 }
 0x125   : > { %615 = vst.msk [vmem:[%s187_s10] sm:$0x1] %vm614_vm2, %v613_v61  ;;  %v644_v63 = vadd.f32 %v643_v62, %v642_v60 }
 0x127   : > { %645 = vst.msk [vmem:[%s187_s10 + $0x1] sm:$0x1] %vm614_vm2, %v644_v63 }
 0x128 PF: > { %s14_s12 = sadd.s32 1, %s918_s12  }
 0x129   : > { %p11_p5 = scmp.ge.s32.totalorder %s14_s12, 4  }
 0x12b   :  { %13 = sbr.rel (!%p11_p5) target bundleno = 1 (0x1), region = 70 }

// kernel: resnet_forward.40
= control target key start
LH: loop header
LB: loop body
LE: loop exit
PB: predicated region body
PF: predicated region fallthrough
CT: control target
= control target key end

     0   :  { %s404_s15 = smov 0   ;;  %s430_s0 = inlined_call_operand.vmem [shape: bf16[32,128], index: 0, kind: input, shape index: {}]   ;;  %s431_s1 = inlined_call_operand.vmem [shape: f32[1,128], index: 1, kind: input, shape index: {}]   ;;  %s432_s2 = inlined_call_operand.vmem [shape: f32[1,128], index: 2, kind: input, shape index: {}]   ;;  %s433_s3 = inlined_call_operand.vmem [shape: bf16[32,128], index: 3, kind: input, shape index: {}]   ;;  %s434_s4 = inlined_call_operand.vmem [shape: bf16[32,128], index: 4, kind: output, shape index: {}]  }
   0x1 LB: > { %s331_s16 = sadd.s32 4294967295, %s377_s15   ;;  %p335_p0 = scmp.ge.s32.totalorder %s377_s15, 1  ;;  %s377_s15 = sphi %s404_s15, %s14_s15  }
   0x2   : > { %p174_p1 = scmp.lt.s32.totalorder %s377_s15, 3 }
   0x4   : > { %p175_p2 = pnand %p335_p0, %p174_p1 }
   0x5   : > { %s336_s17 = sshll.u32 (!%p175_p2), %s331_s16, 1  ;;  %v342_v1 = vld [vmem:[%s431_s1] ss:$0 sm:$0xff] (!%p175_p2) }
   0x6   : > { %178 = sbr.rel (%p175_p2) target bundleno = 30 (0x1e), region = 36  ;;  %p206_p3 = scmp.lt.s32.totalorder (!%p175_p2), %s336_s17, 3  ;;  %v343_v5 = vld [vmem:[%s432_s2] ss:$0 sm:$0xff] (!%p175_p2) }
   0xd   : > { %s436_s17 = smov (!%p206_p3, %s336_s17), 3 }
   0xe   : > { %s337_s18 = sshll.u32 %s436_s17, 2 }
   0xf   : > { %s209_s21 = scalar_lea.vmem %s430_s0, %s337_s18  ;;  %s215_s24 = scalar_lea.vmem %s433_s3, %s337_s18 }
  0x10   : > { %v351_v0 = vld [vmem:[%s209_s21] sm:$0xff]   ;;  %s221_s5 = scalar_lea.vmem %s434_s4, %s337_s18 }
  0x11   : > { %v355_v2 = vld [vmem:[%s215_s24] sm:$0xff]   ;;  %v352_v3 = vunpack.c.l.bf16 %v351_v0  ;;  %v353_v4 = vunpack.c.h.bf16 %v351_v0 }
  0x12   : > { %v356_v8 = vunpack.c.l.bf16 %v355_v2  ;;  %v357_v9 = vunpack.c.h.bf16 %v355_v2 }
  0x13   : > { %v234_v6 = vmul.f32 %v352_v3, %v342_v1  ;;  %v235_v7 = vmul.f32 %v353_v4, %v342_v1 }
  0x15   : > { %v243_v10 = vadd.f32 %v343_v5, %v234_v6  ;;  %v244_v11 = vadd.f32 %v343_v5, %v235_v7 }
  0x17   : > { %v249_v12 = vadd.f32 %v356_v8, %v243_v10  ;;  %v250_v13 = vadd.f32 %v357_v9, %v244_v11 }
  0x19   : > { %v251_v14 = vmax.f32 %v249_v12, 0.0  ;;  %v252_v15 = vmax.f32 %v250_v13, 0.0 }
  0x1b   : > { %v361_v16 = vpack.c.bf16 %v252_v15, %v251_v14 }
  0x1d   : > { %362 = vst [vmem:[%s221_s5] sm:$0xff] %v361_v16  }
  0x1e PF: > { %s14_s15 = sadd.s32 1, %s377_s15  }
  0x1f   : > { %p11_p4 = scmp.ge.s32.totalorder %s14_s15, 4  }
  0x21   :  { %13 = sbr.rel (!%p11_p4) target bundleno = 1 (0x1), region = 69 }

// kernel: mul.89
= control target key start
LH: loop header
LB: loop body
LE: loop exit
PB: predicated region body
PF: predicated region fallthrough
CT: control target
= control target key end

     0   :  { %s34_s0 = inlined_call_operand.vmem [shape: f32[64], index: 0, kind: input, shape index: {}]   ;;  %s35_s1 = inlined_call_operand.vmem [shape: f32[64], index: 1, kind: input, shape index: {}]   ;;  %s36_s2 = inlined_call_operand.vmem [shape: f32[64], index: 2, kind: output, shape index: {}]  }
   0x1   :  { %v3_v0 = vld [vmem:[%s34_s0] sm:$0x1] }
   0x2   :  { %v4_v1 = vld [vmem:[%s35_s1] sm:$0x1] }
   0x3   :  { %v7_v2 = vmul.f32 %v4_v1, %v3_v0 }
   0x5   :  { %9 = vst [vmem:[%s36_s2] sm:$0x1] %v7_v2 }

// kernel: tile.223
= control target key start
LH: loop header
LB: loop body
LE: loop exit
PB: predicated region body
PF: predicated region fallthrough
CT: control target
= control target key end

     0   :  { %s22_s0 = inlined_call_operand.vmem [shape: f32[64], index: 0, kind: input, shape index: {}]   ;;  %s23_s1 = inlined_call_operand.vmem [shape: f32[2,64], index: 1, kind: output, shape index: {}]  }
   0x1   :  { %v4_v0 = vld [vmem:[%s22_s0] ss:$0 sm:$0xff] }
   0x2   :  { %5 = vst [vmem:[%s23_s1] sm:$0x3] %v4_v0 }

// kernel: tile.224
= control target key start
LH: loop header
LB: loop body
LE: loop exit
PB: predicated region body
PF: predicated region fallthrough
CT: control target
= control target key end

     0   :  { %vm7_vm0 = vcmask 523264   ;;  %vm13_vm1 = vcmask 1048064   ;;  %s39_s0 = inlined_call_operand.vmem [shape: f32[2,64], index: 0, kind: input, shape index: {}]   ;;  %s40_s1 = inlined_call_operand.vmem [shape: f32[1,128], index: 1, kind: output, shape index: {}]  }
   0x1   :  { %v4_v0 = vld [vmem:[%s39_s0] sm:$0x3]  ;;  %s22_s0 = smov 64  }
   0x2   :  { %5 = vst [vmem:[#allocation1] sm:$0x3] %v4_v0 }
   0x9   :  { %v10_v1 = vld [vmem:[#allocation1 + $0x1] sm:$0x1]   ;;  %v6_v2 = vld [vmem:[#allocation1] sm:$0x1]  }
   0xa   :  { %11 = vrot.lane.b32.xlu0 %v10_v1, %s22_s0  ;;  %8 = vst.msk [vmem:[#allocation0] sm:$0x1] %vm7_vm0, %v6_v2  }
  0x7c   :  { %v12_v3 = vpop.permute.xlu0 %11  }
  0x7d   :  { %14 = vst.msk [vmem:[#allocation0] sm:$0x1] %vm13_vm1, %v12_v3  }
  0x84   :  { %v18_v4 = vld [vmem:[#allocation0] sm:$0x1] }
  0x85   :  { %20 = vst [vmem:[%s40_s1] sm:$0x1] %v18_v4 }

// kernel: resnet_forward.46
= control target key start
LH: loop header
LB: loop body
LE: loop exit
PB: predicated region body
PF: predicated region fallthrough
CT: control target
= control target key end

     0   :  { %s263_s12 = smov 0   ;;  %s299_s0 = inlined_call_operand.vmem [shape: bf16[16,128], index: 0, kind: input, shape index: {}]   ;;  %s300_s1 = inlined_call_operand.vmem [shape: f32[1,128], index: 1, kind: input, shape index: {}]   ;;  %s301_s2 = inlined_call_operand.vmem [shape: f32[1,128], index: 2, kind: input, shape index: {}]   ;;  %s302_s3 = inlined_call_operand.vmem [shape: bf16[16,128], index: 3, kind: output, shape index: {}]  }
   0x1 LB: > { %s240_s13 = sadd.s32 4294967295, %s265_s12   ;;  %p244_p0 = scmp.ge.s32.totalorder %s265_s12, 1  ;;  %s265_s12 = sphi %s263_s12, %s13_s12  }
   0x2   : > { %p136_p1 = scmp.lt.s32.totalorder %s265_s12, 3 }
   0x4   : > { %p137_p2 = pnand %p244_p0, %p136_p1 }
   0x5   : > { %p158_p3 = scmp.lt.s32.totalorder (!%p137_p2), %s240_s13, 1  ;;  %v247_v1 = vld [vmem:[%s300_s1] ss:$0 sm:$0xff] (!%p137_p2) }
   0x6   : > { %140 = sbr.rel (%p137_p2) target bundleno = 28 (0x1c), region = 32  ;;  %v248_v3 = vld [vmem:[%s301_s2] ss:$0 sm:$0xff] (!%p137_p2) }
   0xd   : > { %s304_s13 = smov (!%p158_p3, %s240_s13), 1 }
   0xe   : > { %s245_s14 = sshll.u32 %s304_s13, 2 }
   0xf   : > { %s161_s17 = scalar_lea.vmem %s299_s0, %s245_s14  ;;  %s165_s24 = scalar_lea.vmem %s302_s3, %s245_s14 }
  0x10   : > { %v166_v0 = vld [vmem:[%s161_s17] sm:$0xf] }
  0x11   : > { %v167_v2 = vunpack.c.l.bf16 %v166_v0 }
  0x13   : > { %v175_v4 = vmul.f32 %v247_v1, %v167_v2 }
  0x15   : > { %v183_v5 = vadd.f32 %v248_v3, %v175_v4 }
  0x17   : > { %v184_v6 = vmax.f32 %v183_v5, 0.0 }
  0x19   : > { %v185_v7 = vpack.c.bf16 %v184_v6, %v184_v6 }
  0x1b   : > { %186 = vst [vmem:[%s165_s24] sm:$0xf] %v185_v7 }
  0x1c PF: > { %s13_s12 = sadd.s32 1, %s265_s12  }
  0x1d   : > { %p10_p4 = scmp.ge.s32.totalorder %s13_s12, 4  }
  0x1f   :  { %12 = sbr.rel (!%p10_p4) target bundleno = 1 (0x1), region = 62 }

// kernel: resnet_forward.45
= control target key start
LH: loop header
LB: loop body
LE: loop exit
PB: predicated region body
PF: predicated region fallthrough
CT: control target
= control target key end

     0   :  { %s694_s12 = smov 0   ;;  %s777_s0 = inlined_call_operand.vmem [shape: bf16[32,288], index: 0, kind: input, shape index: {}]   ;;  %s778_s1 = inlined_call_operand.vmem [shape: bf16[288,64], index: 1, kind: input, shape index: {}]   ;;  %s779_s2 = inlined_call_operand.vmem [shape: bf16[32,64], index: 2, kind: output, shape index: {0}]   ;;  %s780_s3 = inlined_call_operand.vmem [shape: f32[2,2,64], index: 3, kind: output, shape index: {1}]  }
   0x1 LB: > { %s700_s13 = sadd.s32 4294967295, %s670_s12   ;;  %p564_p0 = scmp.ge.s32.totalorder %s670_s12, 1  ;;  %s670_s12 = sphi %s694_s12, %s14_s12  }
   0x2   : > { %p142_p1 = scmp.lt.s32.totalorder %s670_s12, 3 }
   0x4   : > { %p143_p2 = pnand %p564_p0, %p142_p1 }
   0x5   : > { %v642_v0 = vld [vmem:[%s778_s1 + $0x40] sm:$0xff] (!%p143_p2)   ;;  %v672_v2 = vmov (!%p143_p2), 0.0   ;;  %s565_s18 = sshll.u32 (!%p143_p2), %s700_s13, 1  ;;  %v644_v3 = vld [vmem:[%s778_s1 + $0x48] sm:$0xff] (!%p143_p2)   ;;  %v646_v5 = vld [vmem:[%s778_s1 + $0x50] sm:$0xff] (!%p143_p2)   ;;  %vm673_vm0 = vmmov (!%p143_p2), 0  }
   0x6   : > { %146 = sbr.rel (%p143_p2) target bundleno = 275 (0x113), region = 28  ;;  %v643_v1 = vld [vmem:[%s778_s1] sm:$0xff] (!%p143_p2)   ;;  %623 = vmatprep.subr.bf16.mxu1 (!%p143_p2), %v672_v2  ;;  %598 = vmatprep.subr.bf16.mxu0 (!%p143_p2), %v642_v0  ;;  %v645_v4 = vld [vmem:[%s778_s1 + $0x8] sm:$0xff] (!%p143_p2)   ;;  %p172_p3 = scmp.lt.s32.totalorder (!%p143_p2), %s565_s18, 3  ;;  %v647_v6 = vld [vmem:[%s778_s1 + $0x10] sm:$0xff] (!%p143_p2)   ;;  %vm352_vm1 = vcmask (!%p143_p2), 261120  }
   0x7   : > { %599 = vmatpush3.bf16.msra.mxu0 (!%p143_p2), %v643_v1  ;;  %627 = vmatprep.mubr.msk.bf16.mxu1 (!%p143_p2), %vm673_vm0, %v672_v2  ;;  %v648_v7 = vld [vmem:[%s778_s1 + $0x58] sm:$0xff] (!%p143_p2)   ;;  %v650_v9 = vld [vmem:[%s778_s1 + $0x60] sm:$0xff] (!%p143_p2)   ;;  %v652_v12 = vld [vmem:[%s778_s1 + $0x68] sm:$0xff] (!%p143_p2)   ;;  %vm446_vm2 = vcmask (!%p143_p2), 519168   ;;  %vm449_vm3 = vcmask (!%p143_p2), 523264   ;;  %p184_p4 = scmp.lt.s32.totalorder (!%p143_p2), %s700_s13, 1 }
   0x8   : > { %600 = vmatprep.subr.bf16.mxu0 (!%p143_p2), %v644_v3  ;;  %v649_v8 = vld [vmem:[%s778_s1 + $0x18] sm:$0xff] (!%p143_p2)   ;;  %v656_v10 = vld [vmem:[%s778_s1 + $0x80] sm:$0xff] (!%p143_p2)   ;;  %v659_v13 = vld [vmem:[%s778_s1 + $0x88] sm:$0xff] (!%p143_p2)   ;;  %vm459_vm4 = vcmask (!%p143_p2), 516096  }
   0x9   : > { %v651_v11 = vld [vmem:[%s778_s1 + $0x20] sm:$0xff] (!%p143_p2)   ;;  %624 = vmatpush3.bf16.msra.mxu1 (!%p143_p2), %v656_v10  ;;  %v653_v14 = vld [vmem:[%s778_s1 + $0x28] sm:$0xff] (!%p143_p2)   ;;  %v654_v16 = vld [vmem:[%s778_s1 + $0x70] sm:$0xff] (!%p143_p2)  }
   0xa   : > { %625 = vmatprep.subr.bf16.mxu1 (!%p143_p2), %v672_v2  ;;  %v655_v18 = vld [vmem:[%s778_s1 + $0x30] sm:$0xff] (!%p143_p2)   ;;  %v657_v19 = vld [vmem:[%s778_s1 + $0x78] sm:$0xff] (!%p143_p2)  }
   0xb   : > { %601 = vmatpush3.bf16.msra.mxu0 (!%p143_p2), %v645_v4  ;;  %v658_v20 = vld [vmem:[%s778_s1 + $0x38] sm:$0xff] (!%p143_p2)  }
   0xc   : > { %602 = vmatprep.subr.bf16.mxu0 (!%p143_p2), %v646_v5 }
   0xd   : > { %s782_s18 = smov (!%p172_p3, %s565_s18), 3  ;;  %626 = vmatpush3.bf16.msra.mxu1 %v659_v13  ;;  %s784_s13 = smov (!%p184_p4, %s700_s13), 1 }
   0xe   : > { %s631_s6 = smul.u32 12, %s782_s18  ;;  %s568_s4 = sshll.u32 %s782_s18, 2 }
   0xf   : > { %603 = vmatpush3.bf16.msra.mxu0 %v647_v6  ;;  %s182_s7 = scalar_lea.vmem %s779_s2, %s568_s4  ;;  %s569_s18 = sshll.u32 %s784_s13, 1 }
  0x10   : > { %604 = vmatprep.subr.bf16.mxu0 %v648_v7  ;;  %s176_s17 = scalar_lea.vmem %s777_s0, %s631_s6  ;;  %s187_s10 = scalar_lea.vmem %s780_s3, %s569_s18 }
  0x11   : > { %v662_v15 = vld [vmem:[%s176_s17 + $0x4] ss:$12 sps:$4 sm:$0xff]   ;;  %v663_v17 = vld [vmem:[%s176_s17 + $0x8] ss:$12 sps:$4 sm:$0xff]   ;;  %v660_v21 = vld [vmem:[%s176_s17] ss:$12 sps:$4 sm:$0xff]  }
  0x12   : > { %388 = vmatprep.mubr.bf16.mxu0 %v662_v15  ;;  %628 = vmatmul.mubr.msk.bf16.vlgmr.msra.gmra.mrb[0].mxu1 %vm352_vm1, %v663_v17 }
  0x13   : > { %605 = vmatpush3.bf16.msra.mxu0 %v649_v8 }
  0x14   : > { %606 = vmatprep.subr.bf16.mxu0 %v650_v9 }
  0x17   : > { %607 = vmatpush3.bf16.msra.mxu0 %v651_v11 }
  0x18   : > { %608 = vmatprep.subr.bf16.mxu0 %v652_v12 }
  0x1b   : > { %609 = vmatpush3.bf16.msra.mxu0 %v653_v14 }
  0x1c   : > { %610 = vmatprep.subr.bf16.mxu0 %v654_v16 }
  0x1f   : > { %611 = vmatpush3.bf16.msra.mxu0 %v655_v18 }
  0x20   : > { %612 = vmatprep.subr.bf16.mxu0 %v657_v19 }
  0x23   : > { %613 = vmatpush3.bf16.msra.mxu0 %v658_v20 }
  0x26   : > { %389 = vmatmul.mubr.bf16.vlgmr.msra.gmra.mrb[0].mxu0 %v660_v21 }
  0xe5   : > { %v431_v22 = vpop.f32.mrb[0].mxu1 }
  0xe6   : > { %v629_v23 = vpop.f32.mrb[1].mxu1 }
  0xe7   : > { %v434_v24 = vpop.f32.mrb[2].mxu1 }
  0xe8   : > { %v630_v25 = vpop.f32.mrb[3].mxu1 }
  0xf9   : > { %v614_v26 = vpop.f32.mrb[0].mxu0 }
  0xfa   : > { %v615_v27 = vpop.f32.mrb[1].mxu0 }
  0xfb   : > { %v616_v28 = vadd.f32 %v615_v27, %v614_v26  ;;  %v617_v29 = vpop.f32.mrb[2].mxu0 }
  0xfc   : > { %v618_v30 = vpop.f32.mrb[3].mxu0 }
  0xfd   : > { %v432_v31 = vadd.f32 %v616_v28, %v431_v22  ;;  %v619_v32 = vadd.f32 %v618_v30, %v617_v29 }
  0xff   : > { %v596_v33 = vpack.c.bf16 %v432_v31, %v432_v31  ;;  %v461_v34 = vmul.f32 %v432_v31, %v432_v31  ;;  %v435_v35 = vadd.f32 %v619_v32, %v434_v24  ;;  %v450_v36 = vsel %vm449_vm3, %v432_v31, 0.0 }
 0x101   : > { %447 = vst.msk [vmem:[%s182_s7] sm:$0xf] %vm446_vm2, %v596_v33  ;;  %v597_v37 = vpack.c.bf16 %v435_v35, %v435_v35  ;;  %v451_v38 = vsel %vm449_vm3, %v435_v35, 0.0  ;;  %v462_v39 = vmul.f32 %v435_v35, %v435_v35  ;;  %v463_v41 = vsel %vm449_vm3, %v461_v34, 0.0 }
 0x102   : > { %v452_v40 = vadd.f32 %v451_v38, %v450_v36 }
 0x103   : > { %448 = vst.msk [vmem:[%s182_s7 + $0x4] sm:$0xf] %vm446_vm2, %v597_v37  ;;  %v464_v42 = vsel %vm449_vm3, %v462_v39, 0.0 }
 0x104   : > { %v453_v43 = vrot.slane %v452_v40, 4  ;;  %v465_v44 = vadd.f32 %v464_v42, %v463_v41 }
 0x106   : > { %v454_v45 = vadd.f32 %v453_v43, %v452_v40  ;;  %v466_v46 = vrot.slane %v465_v44, 4 }
 0x108   : > { %v455_v47 = vrot.slane %v454_v45, 2  ;;  %v467_v48 = vadd.f32 %v466_v46, %v465_v44 }
 0x10a   : > { %v456_v49 = vadd.f32 %v455_v47, %v454_v45  ;;  %v468_v50 = vrot.slane %v467_v48, 2 }
 0x10c   : > { %v457_v51 = vrot.slane %v456_v49, 1  ;;  %v469_v52 = vadd.f32 %v468_v50, %v467_v48 }
 0x10e   : > { %v458_v53 = vadd.f32 %v457_v51, %v456_v49  ;;  %v470_v54 = vrot.slane %v469_v52, 1 }
 0x110   : > { %460 = vst.msk [vmem:[%s187_s10] sm:$0x1] %vm459_vm4, %v458_v53  ;;  %v471_v55 = vadd.f32 %v470_v54, %v469_v52 }
 0x112   : > { %472 = vst.msk [vmem:[%s187_s10 + $0x1] sm:$0x1] %vm459_vm4, %v471_v55 }
 0x113 PF: > { %s14_s12 = sadd.s32 1, %s670_s12  }
 0x114   : > { %p11_p5 = scmp.ge.s32.totalorder %s14_s12, 4  }
 0x116   :  { %13 = sbr.rel (!%p11_p5) target bundleno = 1 (0x1), region = 70 }

// kernel: resnet_forward.48
= control target key start
LH: loop header
LB: loop body
LE: loop exit
PB: predicated region body
PF: predicated region fallthrough
CT: control target
= control target key end

     0   :  { %s352_s15 = smov 0   ;;  %s372_s0 = inlined_call_operand.vmem [shape: bf16[16,128], index: 0, kind: input, shape index: {}]   ;;  %s373_s1 = inlined_call_operand.vmem [shape: f32[1,128], index: 1, kind: input, shape index: {}]   ;;  %s374_s2 = inlined_call_operand.vmem [shape: f32[1,128], index: 2, kind: input, shape index: {}]   ;;  %s375_s3 = inlined_call_operand.vmem [shape: bf16[16,128], index: 3, kind: input, shape index: {}]   ;;  %s376_s4 = inlined_call_operand.vmem [shape: bf16[16,128], index: 4, kind: output, shape index: {}]  }
   0x1 LB: > { %s299_s16 = sadd.s32 4294967295, %s325_s15   ;;  %p303_p0 = scmp.ge.s32.totalorder %s325_s15, 1  ;;  %s325_s15 = sphi %s352_s15, %s14_s15  }
   0x2   : > { %p170_p1 = scmp.lt.s32.totalorder %s325_s15, 3 }
   0x4   : > { %p171_p2 = pnand %p303_p0, %p170_p1 }
   0x5   : > { %p198_p3 = scmp.lt.s32.totalorder (!%p171_p2), %s299_s16, 1  ;;  %v307_v1 = vld [vmem:[%s373_s1] ss:$0 sm:$0xff] (!%p171_p2) }
   0x6   : > { %174 = sbr.rel (%p171_p2) target bundleno = 30 (0x1e), region = 36  ;;  %v308_v4 = vld [vmem:[%s374_s2] ss:$0 sm:$0xff] (!%p171_p2) }
   0xd   : > { %s378_s16 = smov (!%p198_p3, %s299_s16), 1 }
   0xe   : > { %s304_s17 = sshll.u32 %s378_s16, 2 }
   0xf   : > { %s201_s20 = scalar_lea.vmem %s372_s0, %s304_s17  ;;  %s205_s23 = scalar_lea.vmem %s375_s3, %s304_s17 }
  0x10   : > { %v210_v0 = vld [vmem:[%s201_s20] sm:$0xf]  ;;  %s209_s30 = scalar_lea.vmem %s376_s4, %s304_s17 }
  0x11   : > { %v228_v2 = vld [vmem:[%s205_s23] sm:$0xf]  ;;  %v211_v3 = vunpack.c.l.bf16 %v210_v0 }
  0x12   : > { %v229_v6 = vunpack.c.l.bf16 %v228_v2 }
  0x13   : > { %v219_v5 = vmul.f32 %v307_v1, %v211_v3 }
  0x15   : > { %v227_v7 = vadd.f32 %v308_v4, %v219_v5 }
  0x17   : > { %v230_v8 = vadd.f32 %v229_v6, %v227_v7 }
  0x19   : > { %v231_v9 = vmax.f32 %v230_v8, 0.0 }
  0x1b   : > { %v232_v10 = vpack.c.bf16 %v231_v9, %v231_v9 }
  0x1d   : > { %233 = vst [vmem:[%s209_s30] sm:$0xf] %v232_v10 }
  0x1e PF: > { %s14_s15 = sadd.s32 1, %s325_s15  }
  0x1f   : > { %p11_p4 = scmp.ge.s32.totalorder %s14_s15, 4  }
  0x21   :  { %13 = sbr.rel (!%p11_p4) target bundleno = 1 (0x1), region = 69 }

// kernel: resnet_forward.53
= control target key start
LH: loop header
LB: loop body
LE: loop exit
PB: predicated region body
PF: predicated region fallthrough
CT: control target
= control target key end

     0   :  { %v231_v3 = vmov 0.0|0.0   ;;  %vm232_vm0 = vmmov 0   ;;  %v233_v6 = vmov 0.0   ;;  %vm23_vm1 = vcmask 523264   ;;  %s305_s0 = inlined_call_operand.vmem [shape: bf16[2,16,64], index: 0, kind: input, shape index: {}]   ;;  %s306_s1 = inlined_call_operand.vmem [shape: f32[64,10], index: 1, kind: input, shape index: {}]   ;;  %s307_s2 = inlined_call_operand.vmem [shape: f32[1,10], index: 2, kind: input, shape index: {}]   ;;  %s308_s3 = inlined_call_operand.hbm [shape: f32[2,10], index: 3, kind: output, shape index: {}]  }
   0x1   :  { %v45_v0 = vld [vmem:[%s306_s1] sm:$0xff]  ;;  %v46_v1 = vld [vmem:[%s306_s1 + $0x8] sm:$0xff]  ;;  %v47_v2 = vld [vmem:[%s306_s1 + $0x10] sm:$0xff]  ;;  %191 = vmatprep.subr.bf16.mxu0 %v231_v3  ;;  %188 = vmatprep.mubr.msk.f32.mxu0 %vm232_vm0, %v233_v6 }
   0x2   :  { %v192_v4 = vpack.c.bf16 %v46_v1, %v45_v0  ;;  %v48_v5 = vld [vmem:[%s306_s1 + $0x18] sm:$0xff]  ;;  %v155_v7 = vld [vmem:[%s305_s0] sm:$0xff]   ;;  %v162_v11 = vld [vmem:[%s305_s0 + $0x8] sm:$0xff]  }
   0x3   :  { %v195_v8 = vpack.c.bf16 %v48_v5, %v47_v2  ;;  %v156_v9 = vunpack.c.l.bf16 %v155_v7  ;;  %v157_v10 = vunpack.c.h.bf16 %v155_v7 }
   0x4   :  { %193 = vmatpush3.bf16.msra.mxu0 %v192_v4 }
   0x5   :  { %8 = vsyncpa [#allocation3], 0  ;;  %194 = vmatprep.subr.bf16.mxu0 %v231_v3  ;;  %v49_v12 = vld [vmem:[%s306_s1 + $0x20] sm:$0xff]  ;;  %v50_v13 = vld [vmem:[%s306_s1 + $0x28] sm:$0xff]  ;;  %v160_v14 = vunpack.c.l.bf16 %v162_v11  ;;  %v161_v15 = vunpack.c.h.bf16 %v162_v11  ;;  %v24_v16 = vsel %vm23_vm1, %v156_v9, 0.0  ;;  %v25_v17 = vsel %vm23_vm1, %v157_v10, 0.0 }
   0x6   :  { %v26_v18 = vadd.f32 %v25_v17, %v24_v16  ;;  %v198_v21 = vpack.c.bf16 %v50_v13, %v49_v12  ;;  %v51_v23 = vld [vmem:[%s306_s1 + $0x30] sm:$0xff]  ;;  %v52_v24 = vld [vmem:[%s306_s1 + $0x38] sm:$0xff]  ;;  %vm62_vm2 = vcmask 1041409   ;;  %v152_v41 = vld [vmem:[%s307_s2] ss:$0 sm:$0xff]  ;;  %s234_s5 = smov [#allocation2]  }
   0x7   :  { %v33_v19 = vsel %vm23_vm1, %v160_v14, 0.0  ;;  %v34_v20 = vsel %vm23_vm1, %v161_v15, 0.0  ;;  %v201_v28 = vpack.c.bf16 %v52_v24, %v51_v23  ;;  %s144_s6 = sshll.u32 %s234_s5, 4  ;;  %vm136_vm3 = vcmask 74752   ;;  %s145_s6 = int_to_ptr.vmem [resolvable:$true] %s144_s6 }
   0x8   :  { %196 = vmatpush3.bf16.msra.mxu0 %v195_v8  ;;  %v35_v22 = vadd.f32 %v34_v20, %v33_v19  ;;  %v27_v25 = vrot.slane %v26_v18, 4  ;;  %s207_s7 = scalar_lea.vmem %s145_s6, 32  ;;  %p212_p1 = scmp.lt.s32.totalorder %s145_s6, %s145_s6 }
   0x9   :  { %197 = vmatprep.subr.bf16.mxu0 %v231_v3  ;;  %p208_p0 = scmp.ne.s32.totalorder %s145_s6, %s207_s7  ;;  %p213_p2 = scmp.lt.s32.totalorder %s207_s7, %s207_s7 }
   0xa   :  { %v36_v26 = vrot.slane %v35_v22, 4  ;;  %v28_v27 = vadd.f32 %v27_v25, %v26_v18 }
   0xb   :  { %p214_p3 = por %p213_p2, %p212_p1 }
   0xc   :  { %199 = vmatpush3.bf16.msra.mxu0 %v198_v21  ;;  %v37_v29 = vadd.f32 %v36_v26, %v35_v22  ;;  %v29_v30 = vrot.slane %v28_v27, 2 }
   0xd   :  { %200 = vmatprep.subr.bf16.mxu0 %v231_v3  ;;  %p215_p4 = pnand %p214_p3, %p208_p0 }
   0xe   :  { %v38_v31 = vrot.slane %v37_v29, 2  ;;  %v30_v32 = vadd.f32 %v29_v30, %v28_v27 }
  0x10   :  { %202 = vmatpush3.bf16.msra.mxu0 %v201_v28  ;;  %v39_v33 = vadd.f32 %v38_v31, %v37_v29  ;;  %v31_v34 = vrot.slane %v30_v32, 1 }
  0x12   :  { %v40_v35 = vrot.slane %v39_v33, 1  ;;  %v32_v36 = vadd.f32 %v31_v34, %v30_v32 }
  0x14   :  { %v41_v37 = vadd.f32 %v40_v35, %v39_v33  ;;  %v43_v38 = vmul.f32 0.0625, %v32_v36 }
  0x16   :  { %v44_v39 = vmul.f32 0.0625, %v41_v37 }
  0x18   :  { %v63_v40 = vsel %vm62_vm2, %v44_v39, %v43_v38 }
  0x19   :  { %189 = vmatmul.mubr.msk.f32.vlgmr.msra.gmra.mrb[0].mxu0 %vm23_vm1, %v63_v40 }
  0xec   :  { %v132_v42 = vpop.f32.mrb[0].mxu0 }
  0xed   :  { %v133_v43 = vadd.f32 %v152_v41, %v132_v42  ;;  %v190_v44 = vpop.f32.mrb[1].mxu0 }
  0xef   :  { %137 = vst.msk [vmem:[#allocation2] sm:$0x3] %vm136_vm3, %v133_v43 }
  0xf0   :  { %218 = shalt.err (!%p215_p4)
}
  0xf1   :  { %s219_s10 = scalar_lea.hbm %s308_s3, 32 }
  0xf2   :  { %p220_p5 = scmp.ne.s32.totalorder %s308_s3, %s219_s10  ;;  %p223_p6 = scmp.lt.u32.totalorder %s219_s10, %s308_s3 }
  0xf4   :  { %p225_p7 = pnand %p223_p6, %p220_p5 }
  0xf6   :  { %228 = shalt.err (!%p225_p7)
}
  0xf7   :  { %147 = dma.vmem_to_hbm [thread:$0]  %s145_s6, 32, %s308_s3, [#allocation3]  }
  0xf8   :  { %229 = dma.done.wait [#allocation3], 32  }
  0xf9   :  { %230 = vsyncadd [#allocation3], 4294967264 }
  0xfa   :  { %151 = vsyncpa [#allocation3], 1 }

// kernel: resnet_forward.47
= control target key start
LH: loop header
LB: loop body
LE: loop exit
PB: predicated region body
PF: predicated region fallthrough
CT: control target
= control target key end

     0   :  { %s959_s12 = smov 0   ;;  %s1101_s0 = inlined_call_operand.vmem [shape: bf16[32,576], index: 0, kind: input, shape index: {}]   ;;  %s1102_s1 = inlined_call_operand.vmem [shape: bf16[576,64], index: 1, kind: input, shape index: {}]   ;;  %s1103_s2 = inlined_call_operand.vmem [shape: bf16[32,64], index: 2, kind: output, shape index: {0}]   ;;  %s1104_s3 = inlined_call_operand.vmem [shape: f32[2,2,64], index: 3, kind: output, shape index: {1}]  }
   0x1 LB: > { %s965_s13 = sadd.s32 4294967295, %s935_s12   ;;  %p760_p0 = scmp.ge.s32.totalorder %s935_s12, 1  ;;  %s935_s12 = sphi %s959_s12, %s14_s12  }
   0x2   : > { %p142_p1 = scmp.lt.s32.totalorder %s935_s12, 3 }
   0x4   : > { %p143_p2 = pnand %p760_p0, %p142_p1 }
   0x5   : > { %v886_v0 = vld [vmem:[%s1102_s1 + $0x40] sm:$0xff] (!%p143_p2)   ;;  %v890_v4 = vld [vmem:[%s1102_s1 + $0x48] sm:$0xff] (!%p143_p2)   ;;  %v894_v8 = vld [vmem:[%s1102_s1 + $0x50] sm:$0xff] (!%p143_p2)   ;;  %s761_s19 = sshll.u32 (!%p143_p2), %s965_s13, 1  ;;  %v937_v34 = vmov (!%p143_p2), 0.0   ;;  %vm938_vm0 = vmmov (!%p143_p2), 0  }
   0x6   : > { %146 = sbr.rel (%p143_p2) target bundleno = 289 (0x121), region = 28  ;;  %v887_v1 = vld [vmem:[%s1102_s1 + $0xc0] sm:$0xff] (!%p143_p2)   ;;  %814 = vmatprep.subr.bf16.mxu0 (!%p143_p2), %v886_v0  ;;  %v891_v5 = vld [vmem:[%s1102_s1 + $0xc8] sm:$0xff] (!%p143_p2)   ;;  %v895_v9 = vld [vmem:[%s1102_s1 + $0xd0] sm:$0xff] (!%p143_p2)   ;;  %p172_p3 = scmp.lt.s32.totalorder (!%p143_p2), %s761_s19, 3  ;;  %vm508_vm1 = vcmask (!%p143_p2), 523264  }
   0x7   : > { %v888_v2 = vld [vmem:[%s1102_s1] sm:$0xff] (!%p143_p2)   ;;  %836 = vmatprep.subr.bf16.mxu1 (!%p143_p2), %v887_v1  ;;  %v892_v6 = vld [vmem:[%s1102_s1 + $0x8] sm:$0xff] (!%p143_p2)   ;;  %v896_v10 = vld [vmem:[%s1102_s1 + $0x10] sm:$0xff] (!%p143_p2)   ;;  %vm643_vm2 = vcmask (!%p143_p2), 519168   ;;  %p184_p4 = scmp.lt.s32.totalorder (!%p143_p2), %s965_s13, 1  ;;  %vm655_vm3 = vcmask (!%p143_p2), 516096  }
   0x8   : > { %v889_v3 = vld [vmem:[%s1102_s1 + $0x80] sm:$0xff] (!%p143_p2)   ;;  %815 = vmatpush3.bf16.msra.mxu0 (!%p143_p2), %v888_v2  ;;  %v893_v7 = vld [vmem:[%s1102_s1 + $0x88] sm:$0xff] (!%p143_p2)   ;;  %v897_v11 = vld [vmem:[%s1102_s1 + $0x90] sm:$0xff] (!%p143_p2)  }
   0x9   : > { %837 = vmatpush3.bf16.msra.mxu1 (!%p143_p2), %v889_v3  ;;  %816 = vmatprep.subr.bf16.mxu0 (!%p143_p2), %v890_v4  ;;  %v898_v12 = vld [vmem:[%s1102_s1 + $0x58] sm:$0xff] (!%p143_p2)   ;;  %v902_v16 = vld [vmem:[%s1102_s1 + $0x60] sm:$0xff] (!%p143_p2)   ;;  %v906_v20 = vld [vmem:[%s1102_s1 + $0x68] sm:$0xff] (!%p143_p2)  }
   0xa   : > { %838 = vmatprep.subr.bf16.mxu1 (!%p143_p2), %v891_v5  ;;  %v899_v13 = vld [vmem:[%s1102_s1 + $0xd8] sm:$0xff] (!%p143_p2)   ;;  %v903_v17 = vld [vmem:[%s1102_s1 + $0xe0] sm:$0xff] (!%p143_p2)   ;;  %v907_v21 = vld [vmem:[%s1102_s1 + $0xe8] sm:$0xff] (!%p143_p2)  }
   0xb   : > { %v900_v14 = vld [vmem:[%s1102_s1 + $0x18] sm:$0xff] (!%p143_p2)   ;;  %v904_v18 = vld [vmem:[%s1102_s1 + $0x20] sm:$0xff] (!%p143_p2)   ;;  %v908_v22 = vld [vmem:[%s1102_s1 + $0x28] sm:$0xff] (!%p143_p2)  }
   0xc   : > { %817 = vmatpush3.bf16.msra.mxu0 (!%p143_p2), %v892_v6  ;;  %v901_v15 = vld [vmem:[%s1102_s1 + $0x98] sm:$0xff] (!%p143_p2)   ;;  %v905_v19 = vld [vmem:[%s1102_s1 + $0xa0] sm:$0xff] (!%p143_p2)   ;;  %v909_v23 = vld [vmem:[%s1102_s1 + $0xa8] sm:$0xff] (!%p143_p2)  }
   0xd   : > { %839 = vmatpush3.bf16.msra.mxu1 %v893_v7  ;;  %818 = vmatprep.subr.bf16.mxu0 %v894_v8  ;;  %s1106_s19 = smov (!%p172_p3, %s761_s19), 3  ;;  %v910_v24 = vld [vmem:[%s1102_s1 + $0x70] sm:$0xff]   ;;  %v914_v28 = vld [vmem:[%s1102_s1 + $0x78] sm:$0xff]   ;;  %v924_v37 = vld [vmem:[%s1102_s1 + $0x100] sm:$0xff]   ;;  %s1108_s13 = smov (!%p184_p4, %s965_s13), 1 }
   0xe   : > { %840 = vmatprep.subr.bf16.mxu1 %v895_v9  ;;  %v911_v25 = vld [vmem:[%s1102_s1 + $0xf0] sm:$0xff]   ;;  %s875_s17 = smul.u32 20, %s1106_s19  ;;  %v915_v29 = vld [vmem:[%s1102_s1 + $0xf8] sm:$0xff]   ;;  %v925_v38 = vld [vmem:[%s1102_s1 + $0x108] sm:$0xff]  }
   0xf   : > { %v912_v26 = vld [vmem:[%s1102_s1 + $0x30] sm:$0xff]   ;;  %v916_v30 = vld [vmem:[%s1102_s1 + $0x38] sm:$0xff]  }
  0x10   : > { %819 = vmatpush3.bf16.msra.mxu0 %v896_v10  ;;  %v913_v27 = vld [vmem:[%s1102_s1 + $0xb0] sm:$0xff]   ;;  %s176_s29 = scalar_lea.vmem %s1101_s0, %s875_s17  ;;  %v917_v31 = vld [vmem:[%s1102_s1 + $0xb8] sm:$0xff]   ;;  %s764_s17 = sshll.u32 %s1106_s19, 2 }
  0x11   : > { %841 = vmatpush3.bf16.msra.mxu1 %v897_v11  ;;  %820 = vmatprep.subr.bf16.mxu0 %v898_v12  ;;  %v918_v32 = vld [vmem:[%s176_s29] ss:$20 sps:$4 sm:$0xff]   ;;  %v920_v33 = vld [vmem:[%s176_s29 + $0x4] ss:$20 sps:$4 sm:$0xff]   ;;  %v921_v35 = vld [vmem:[%s176_s29 + $0x8] ss:$20 sps:$4 sm:$0xff]   ;;  %s182_s21 = scalar_lea.vmem %s1103_s2, %s764_s17 }
  0x12   : > { %842 = vmatprep.subr.bf16.mxu1 %v899_v13  ;;  %v923_v36 = vld [vmem:[%s176_s29 + $0xc] ss:$20 sps:$4 sm:$0xff]   ;;  %544 = vmatprep.mubr.bf16.mxu0 %v920_v33  ;;  %v926_v39 = vld [vmem:[%s1102_s1 + $0x110] sm:$0xff]   ;;  %v927_v40 = vld [vmem:[%s1102_s1 + $0x118] sm:$0xff]   ;;  %s765_s19 = sshll.u32 %s1108_s13, 1 }
  0x13   : > { %585 = vmatprep.mubr.bf16.mxu1 %v923_v36  ;;  %v928_v41 = vld [vmem:[%s176_s29 + $0x10] ss:$20 sps:$4 sm:$0xff]   ;;  %s187_s24 = scalar_lea.vmem %s1104_s3, %s765_s19 }
  0x14   : > { %821 = vmatpush3.bf16.msra.mxu0 %v900_v14 }
  0x15   : > { %843 = vmatpush3.bf16.msra.mxu1 %v901_v15  ;;  %822 = vmatprep.subr.bf16.mxu0 %v902_v16 }
  0x16   : > { %844 = vmatprep.subr.bf16.mxu1 %v903_v17 }
  0x18   : > { %823 = vmatpush3.bf16.msra.mxu0 %v904_v18 }
  0x19   : > { %845 = vmatpush3.bf16.msra.mxu1 %v905_v19  ;;  %824 = vmatprep.subr.bf16.mxu0 %v906_v20 }
  0x1a   : > { %846 = vmatprep.subr.bf16.mxu1 %v907_v21 }
  0x1c   : > { %825 = vmatpush3.bf16.msra.mxu0 %v908_v22 }
  0x1d   : > { %847 = vmatpush3.bf16.msra.mxu1 %v909_v23  ;;  %826 = vmatprep.subr.bf16.mxu0 %v910_v24 }
  0x1e   : > { %848 = vmatprep.subr.bf16.mxu1 %v911_v25 }
  0x20   : > { %827 = vmatpush3.bf16.msra.mxu0 %v912_v26 }
  0x21   : > { %849 = vmatpush3.bf16.msra.mxu1 %v913_v27  ;;  %828 = vmatprep.subr.bf16.mxu0 %v914_v28 }
  0x22   : > { %850 = vmatprep.subr.bf16.mxu1 %v915_v29 }
  0x24   : > { %829 = vmatpush3.bf16.msra.mxu0 %v916_v30 }
  0x25   : > { %851 = vmatpush3.bf16.msra.mxu1 %v917_v31  ;;  %863 = vmatprep.subr.bf16.mxu0 %v937_v34 }
  0x27   : > { %545 = vmatmul.mubr.bf16.vlgmr.msra.gmra.mrb[0].mxu0 %v918_v32 }
  0x28   : > { %586 = vmatmul.mubr.bf16.vlgmr.msra.gmra.mrb[0].mxu1 %v921_v35  ;;  %864 = vmatpush3.bf16.msra.mxu0 %v924_v37 }
  0x29   : > { %865 = vmatprep.subr.bf16.mxu0 %v937_v34  ;;  %871 = vmatprep.mubr.msk.bf16.mxu0 %vm938_vm0, %v937_v34 }
  0x2c   : > { %866 = vmatpush3.bf16.msra.mxu0 %v925_v38 }
  0x2d   : > { %867 = vmatprep.subr.bf16.mxu0 %v937_v34 }
  0x30   : > { %868 = vmatpush3.bf16.msra.mxu0 %v926_v39 }
  0x31   : > { %869 = vmatprep.subr.bf16.mxu0 %v937_v34 }
  0x34   : > { %870 = vmatpush3.bf16.msra.mxu0 %v927_v40 }
  0x37   : > { %872 = vmatmul.mubr.msk.bf16.vlgmr.msra.gmra.mrb[4].mxu0 %vm508_vm1, %v928_v41 }
  0xfa   : > { %v830_v42 = vpop.f32.mrb[0].mxu0 }
  0xfb   : > { %v852_v43 = vpop.f32.mrb[0].mxu1  ;;  %v831_v44 = vpop.f32.mrb[1].mxu0 }
  0xfc   : > { %v832_v45 = vadd.f32 %v831_v44, %v830_v42  ;;  %v853_v46 = vpop.f32.mrb[1].mxu1  ;;  %v833_v47 = vpop.f32.mrb[2].mxu0 }
  0xfd   : > { %v854_v48 = vadd.f32 %v853_v46, %v852_v43  ;;  %v855_v49 = vpop.f32.mrb[2].mxu1  ;;  %v834_v50 = vpop.f32.mrb[3].mxu0 }
  0xfe   : > { %v835_v51 = vadd.f32 %v834_v50, %v833_v47  ;;  %v856_v52 = vpop.f32.mrb[3].mxu1 }
  0xff   : > { %v857_v53 = vadd.f32 %v856_v52, %v855_v49  ;;  %v588_v54 = vadd.f32 %v854_v48, %v832_v45 }
 0x101   : > { %v591_v55 = vadd.f32 %v857_v53, %v835_v51 }
 0x10a   : > { %v628_v56 = vpop.f32.mrb[4].mxu0 }
 0x10b   : > { %v629_v57 = vadd.f32 %v628_v56, %v588_v54  ;;  %v873_v58 = vpop.f32.mrb[5].mxu0 }
 0x10c   : > { %v631_v59 = vpop.f32.mrb[6].mxu0 }
 0x10d   : > { %v812_v60 = vpack.c.bf16 %v629_v57, %v629_v57  ;;  %v657_v61 = vmul.f32 %v629_v57, %v629_v57  ;;  %v632_v62 = vadd.f32 %v631_v59, %v591_v55  ;;  %v874_v63 = vpop.f32.mrb[7].mxu0  ;;  %v646_v0 = vsel %vm508_vm1, %v629_v57, 0.0 }
 0x10f   : > { %644 = vst.msk [vmem:[%s182_s21] sm:$0xf] %vm643_vm2, %v812_v60  ;;  %v813_v1 = vpack.c.bf16 %v632_v62, %v632_v62  ;;  %v647_v2 = vsel %vm508_vm1, %v632_v62, 0.0  ;;  %v658_v3 = vmul.f32 %v632_v62, %v632_v62  ;;  %v659_v5 = vsel %vm508_vm1, %v657_v61, 0.0 }
 0x110   : > { %v648_v4 = vadd.f32 %v647_v2, %v646_v0 }
 0x111   : > { %645 = vst.msk [vmem:[%s182_s21 + $0x4] sm:$0xf] %vm643_vm2, %v813_v1  ;;  %v660_v6 = vsel %vm508_vm1, %v658_v3, 0.0 }
 0x112   : > { %v649_v7 = vrot.slane %v648_v4, 4  ;;  %v661_v8 = vadd.f32 %v660_v6, %v659_v5 }
 0x114   : > { %v650_v9 = vadd.f32 %v649_v7, %v648_v4  ;;  %v662_v10 = vrot.slane %v661_v8, 4 }
 0x116   : > { %v651_v11 = vrot.slane %v650_v9, 2  ;;  %v663_v12 = vadd.f32 %v662_v10, %v661_v8 }
 0x118   : > { %v652_v13 = vadd.f32 %v651_v11, %v650_v9  ;;  %v664_v14 = vrot.slane %v663_v12, 2 }
 0x11a   : > { %v653_v15 = vrot.slane %v652_v13, 1  ;;  %v665_v16 = vadd.f32 %v664_v14, %v663_v12 }
 0x11c   : > { %v654_v17 = vadd.f32 %v653_v15, %v652_v13  ;;  %v666_v18 = vrot.slane %v665_v16, 1 }
 0x11e   : > { %656 = vst.msk [vmem:[%s187_s24] sm:$0x1] %vm655_vm3, %v654_v17  ;;  %v667_v19 = vadd.f32 %v666_v18, %v665_v16 }
 0x120   : > { %668 = vst.msk [vmem:[%s187_s24 + $0x1] sm:$0x1] %vm655_vm3, %v667_v19 }
 0x121 PF: > { %s14_s12 = sadd.s32 1, %s935_s12  }
 0x122   : > { %p11_p5 = scmp.ge.s32.totalorder %s14_s12, 4  }
 0x124   :  { %13 = sbr.rel (!%p11_p5) target bundleno = 1 (0x1), region = 70 }

</bundles_post_ra>
